<compile_context>
chip_gen: v7x
topology: tpu7x:2x2x1
jax: 0.10.0
libtpu: 0.0.40
codegen_flags: <defaults>
</compile_context>

<pallas_src>
from functools import partial

import jax
import jax.numpy as jnp
from jax.experimental import pallas as pl
from jax.experimental.pallas import tpu as pltpu

EPS = 1e-5


def _cdiv(a, b):
    return -(-a // b)


def _round_up(n, m):
    return ((n + m - 1) // m) * m


# ----------------------------- Pallas kernel ------------------------------- #
def cnn1d_kernel(x_ref, w1_ref, sh1_ref, w2_ref, sh2_ref, w3_ref, sh3_ref,
                 wfc0_ref, wfc1_ref, bfc_ref, out_ref):
    tb, nc = out_ref.shape                    # batch tile, num_class
    lpad = x_ref.shape[0] // tb               # padded conv1 input length (= 9)
    l1 = lpad - 1                             # conv1 output positions (= 8)
    c1 = w1_ref.shape[2]                      # 81
    c2 = w2_ref.shape[2]                      # 27
    c3 = w3_ref.shape[2]                      # 9

    def mm(a, w):
        return jnp.dot(a, w, preferred_element_type=jnp.float32)

    # ---- block 1: Conv1d(80->81,k=2,s=1,p=1)+BN+ReLU.
    #      x rows are position-major (rows [t*tb,(t+1)*tb) = padded position t),
    #      so the two conv taps are two accumulated bf16 matmuls over
    #      contiguous, tb-aligned sublane slices of the same VMEM block
    #      (no strided access, no channel-duplicated im2col).
    x_lo = x_ref[0:l1 * tb, :]                # padded positions 0..7  (tap 0)
    x_hi = x_ref[tb:lpad * tb, :]             # padded positions 1..8  (tap 1)
    sh1b = jnp.broadcast_to(sh1_ref[...], (l1 * tb, c1))           # hoisted, used once
    y1 = jnp.maximum(mm(x_lo, w1_ref[0]) + mm(x_hi, w1_ref[1]) + sh1b, 0.0)
    # MaxPool(2, 2): 4 elementwise maxes over contiguous tb-aligned row slices.
    p1 = [jnp.maximum(y1[(2 * j) * tb:(2 * j + 1) * tb, :],
                      y1[(2 * j + 1) * tb:(2 * j + 2) * tb, :])
          for j in range(l1 // 2)]                                  # 4 x (tb, 81)

    # ---- block 2: Conv1d(81->27,k=2,s=2,p=1)+BN+ReLU, then MaxPool(2, 1).
    #      padded length 6 -> outputs use taps (pad,p1[0]), (p1[1],p1[2]),
    #      (p1[3],pad); BN/bias already folded into w2/sh2.
    w2_0, w2_1 = w2_ref[0], w2_ref[1]                               # (81, 27) each
    sh2b = jnp.broadcast_to(sh2_ref[...], (tb, c2))                 # hoisted, reused x3
    y2_0 = jnp.maximum(mm(p1[0], w2_1) + sh2b, 0.0)
    y2_1 = jnp.maximum(mm(p1[1], w2_0) + mm(p1[2], w2_1) + sh2b, 0.0)
    y2_2 = jnp.maximum(mm(p1[3], w2_0) + sh2b, 0.0)
    p2_0 = jnp.maximum(y2_0, y2_1)
    p2_1 = jnp.maximum(y2_1, y2_2)

    # ---- block 3: Conv1d(27->9,k=2,s=2,p=1)+BN+ReLU (no pool).
    sh3b = jnp.broadcast_to(sh3_ref[...], (tb, c3))                 # hoisted, reused x2
    y3_0 = jnp.maximum(mm(p2_0, w3_ref[1]) + sh3b, 0.0)
    y3_1 = jnp.maximum(mm(p2_1, w3_ref[0]) + sh3b, 0.0)
    # conv4 block: ReLU on already-ReLU'd values + Dropout(eval) = identity.

    # ---- fc + sigmoid.  PyTorch flatten order 2*c+l was pre-split in the
    #      wrapper (wfc0 = W[:,0::2].T, wfc1 = W[:,1::2].T); the two K=9 dots
    #      accumulate on the MXU.  exp goes to the EUP.  (Output last dim
    #      7 < 128 -> masked stores; ~7 KB/tile, not the bottleneck.)
    logit = (mm(y3_0, wfc0_ref[...]) + mm(y3_1, wfc1_ref[...])
             + jnp.broadcast_to(bfc_ref[...], (tb, nc)))
    out_ref[...] = 1.0 / (1.0 + jnp.exp(-logit))


# ------------------------------- wrapper ------------------------------------ #
@partial(jax.jit, static_argnames=("batch_tile",))
def cnn1d_pallas(x, p, *, batch_tile=512):
    """x: (B, 80, L=7) in PyTorch NCL layout."""
    B, C0, L0 = x.shape
    assert C0 == 80 and L0 == 7, "fc(18, num_class) requires C=80, L=7"

    # --- fold conv bias + BatchNorm (eval) into weights / per-channel shift.
    def fold(w, b, bn):
        g, bt, m, v = bn
        sc = (g / jnp.sqrt(v + EPS)).astype(jnp.float32)            # (C_out,)
        w_kio = jnp.transpose(w, (2, 1, 0)).astype(jnp.float32)     # (K, C_in, C_out)
        w_kio = w_kio * sc[None, None, :]
        sh = ((b.astype(jnp.float32) - m) * sc + bt).reshape(1, -1)
        return w_kio, sh.astype(jnp.float32)

    w1, sh1 = fold(p["w1"], p["b1"], p["bn1"])        # (2, 80, 81), (1, 81)
    w2, sh2 = fold(p["w2"], p["b2"], p["bn2"])        # (2, 81, 27), (1, 27)
    w3, sh3 = fold(p["w3"], p["b3"], p["bn3"])        # (2, 27, 9),  (1, 9)
    w1 = w1.astype(jnp.bfloat16)                      # bf16 MXU operands for conv1

    wfc = p["wfc"].astype(jnp.float32)                # (num_class, 18)
    wfc0 = wfc[:, 0::2].T                             # (9, num_class)  l = 0 taps
    wfc1 = wfc[:, 1::2].T                             # (9, num_class)  l = 1 taps
    bfc = p["bfc"].reshape(1, -1).astype(jnp.float32)
    nc = wfc.shape[0]

    # --- batch tiling: multiple of 8 sublanes, capped so ntiles >= 2 whenever
    #     possible (keeps both v7x TensorCores busy on the "parallel" axis).
    tb = max(8, min(batch_tile, _round_up(_cdiv(B, 2), 8)))
    b_pad = _round_up(B, tb)
    ntiles = b_pad // tb
    lpad = L0 + 2                                     # L-padded length = 9

    # --- position-major relayout (single fused copy under this jit):
    #     (B, 80, 7) -> (b_pad, 9, 80) L-padded -> rows ordered position-major
    #     within each batch tile, bf16 so the HBM stream is half-width.
    x_blc = jnp.transpose(x, (0, 2, 1)).astype(jnp.bfloat16)         # (B, 7, 80)
    x_blc = jnp.pad(x_blc, ((0, b_pad - B), (1, 1), (0, 0)))         # (b_pad, 9, 80)
    x_pm = (x_blc.reshape(ntiles, tb, lpad, C0)
                 .transpose(0, 2, 1, 3)
                 .reshape(ntiles * lpad * tb, C0))                   # (ntiles*9*tb, 80)

    const2 = lambda shape: pl.BlockSpec(shape, lambda i: (0, 0))
    const3 = lambda shape: pl.BlockSpec(shape, lambda i: (0, 0, 0))

    out = pl.pallas_call(
        cnn1d_kernel,
        out_shape=jax.ShapeDtypeStruct((b_pad, nc), jnp.float32),
        grid=(ntiles,),
        in_specs=[
            pl.BlockSpec((lpad * tb, C0), lambda i: (i, 0)),   # x tile: pipelined
            const3(w1.shape),                                  # weights / shifts:
            const2(sh1.shape),                                 # constant index_map
            const3(w2.shape),                                  # -> VMEM-resident
            const2(sh2.shape),
            const3(w3.shape),
            const2(sh3.shape),
            const2(wfc0.shape),
            const2(wfc1.shape),
            const2(bfc.shape),
        ],
        out_specs=pl.BlockSpec((tb, nc), lambda i: (i, 0)),
        compiler_params=pltpu.CompilerParams(
            dimension_semantics=("parallel",),
            vmem_limit_bytes=32 * 1024 * 1024),
    )(x_pm, w1, sh1, w2, sh2, w3, sh3, wfc0, wfc1, bfc)
    return out[:B]


# --------------------------- pure-JAX reference ----------------------------- #
def reference_forward(x, p):
    def block(y, w, b, bn, stride, pool_k, pool_s):
        y = jax.lax.conv_general_dilated(
            y, w, window_strides=(stride,), padding=[(1, 1)],
            dimension_numbers=("NCH", "OIH", "NCH"),
            precision=jax.lax.Precision.HIGHEST)
        g, bt, m, v = bn
        y = y + b[None, :, None]
        y = (y - m[None, :, None]) / jnp.sqrt(v[None, :, None] + EPS)
        y = y * g[None, :, None] + bt[None, :, None]
        y = jnp.maximum(y, 0.0)
        if pool_k is not None:
            L = y.shape[2]
            lo = (L - pool_k) // pool_s + 1
            y = jnp.stack(
                [jnp.max(y[:, :, i * pool_s:i * pool_s + pool_k], axis=2)
                 for i in range(lo)], axis=2)
        return y

    y = block(x.astype(jnp.float32), p["w1"], p["b1"], p["bn1"], 1, 2, 2)
    y = block(y, p["w2"], p["b2"], p["bn2"], 2, 2, 1)
    y = block(y, p["w3"], p["b3"], p["bn3"], 2, None, None)
    y = jnp.maximum(y, 0.0)                       # conv4: ReLU (+ Dropout eval = id)
    flat = y.reshape(x.shape[0], -1)              # (B, 18)
    logit = flat @ p["wfc"].T + p["bfc"]
    return jax.nn.sigmoid(logit)


# ------------------------------ param init ---------------------------------- #
def init_params(key):
    ks = jax.random.split(key, 10)

    def conv_init(k, c_out, c_in, ksz):
        kw, kb = jax.random.split(k)
        bound = (c_in * ksz) ** -0.5
        w = jax.random.uniform(kw, (c_out, c_in, ksz), jnp.float32, -bound, bound)
        b = jax.random.uniform(kb, (c_out,), jnp.float32, -bound, bound)
        return w, b

    def bn_init(k, c):
        k1, k2, k3, k4 = jax.random.split(k, 4)
        gamma = jax.random.uniform(k1, (c,), jnp.float32, 0.5, 1.5)
        beta = jax.random.uniform(k2, (c,), jnp.float32, -0.1, 0.1)
        mean = jax.random.uniform(k3, (c,), jnp.float32, -0.1, 0.1)
        var = jax.random.uniform(k4, (c,), jnp.float32, 0.5, 1.5)
        return (gamma, beta, mean, var)

    w1, b1 = conv_init(ks[0], 81, 80, 2)
    w2, b2 = conv_init(ks[1], 27, 81, 2)
    w3, b3 = conv_init(ks[2], 9, 27, 2)
    bn1 = bn_init(ks[3], 81)
    bn2 = bn_init(ks[4], 27)
    bn3 = bn_init(ks[5], 9)
    bound = 18 ** -0.5
    wfc = jax.random.uniform(ks[6], (7, 18), jnp.float32, -bound, bound)
    bfc = jax.random.uniform(ks[7], (7,), jnp.float32, -bound, bound)
    return dict(w1=w1, b1=b1, bn1=bn1, w2=w2, b2=b2, bn2=bn2,
                w3=w3, b3=b3, bn3=bn3, wfc=wfc, bfc=bfc)


if __name__ == "__main__":
    key = jax.random.PRNGKey(0)
    kx, kp = jax.random.split(key)
    # PyTorch-layout input (B, C=80, L=7).  L=7 makes the flatten produce 18
    # features (matching nn.Linear(18, 7)).  B=384 exercises the 2-tile path
    # (tb capped at 192 so the "parallel" batch axis has >= 2 grid steps).
    x = jax.random.normal(kx, (384, 80, 7), jnp.float32)
    params = init_params(kp)

    out = jax.block_until_ready(cnn1d_pallas(x, params))
    assert out.shape == (384, 7)

    ref = reference_forward(x, params)
    # Tolerance deliberately widened to 1e-2 (sigmoid output in [0,1]): conv1
    # operands are bf16 in the kernel vs f32/HIGHEST in the reference.
    if not bool(jnp.allclose(out, ref, atol=1e-2, rtol=1e-2)):
        raise AssertionError(
            f"kernel/reference mismatch, max abs err = "
            f"{float(jnp.max(jnp.abs(out - ref)))}")
    print("KERNEL_OK")
</pallas_src>

<mosaic_0001>
module attributes {stable_mosaic.version = 11 : i64} {
  func.func @cnn1d_kernel(%arg0: i32, %arg1: memref<1728x80xbf16, #tpu.memory_space<vmem>>, %arg2: memref<2x80x81xbf16, #tpu.memory_space<vmem>>, %arg3: memref<1x81xf32, #tpu.memory_space<vmem>>, %arg4: memref<2x81x27xf32, #tpu.memory_space<vmem>>, %arg5: memref<1x27xf32, #tpu.memory_space<vmem>>, %arg6: memref<2x27x9xf32, #tpu.memory_space<vmem>>, %arg7: memref<1x9xf32, #tpu.memory_space<vmem>>, %arg8: memref<9x7xf32, #tpu.memory_space<vmem>>, %arg9: memref<9x7xf32, #tpu.memory_space<vmem>>, %arg10: memref<1x7xf32, #tpu.memory_space<vmem>>, %arg11: memref<192x7xf32, #tpu.memory_space<vmem>>) attributes {dimension_semantics = [#tpu.dimension_semantics<parallel>], iteration_bounds = array<i64: 2>, scalar_prefetch = 0 : i64, scratch_operands = 0 : i64, tpu.core_type = #tpu.core_type<tc>, window_params = [{transform_indices = @transform_0, window_bounds = array<i64: 1728, 80>}, {pipeline_mode = #tpu.pipeline_mode<synchronous>, transform_indices = @transform_1, window_bounds = array<i64: 2, 80, 81>}, {pipeline_mode = #tpu.pipeline_mode<synchronous>, transform_indices = @transform_2, window_bounds = array<i64: 1, 81>}, {pipeline_mode = #tpu.pipeline_mode<synchronous>, transform_indices = @transform_3, window_bounds = array<i64: 2, 81, 27>}, {pipeline_mode = #tpu.pipeline_mode<synchronous>, transform_indices = @transform_4, window_bounds = array<i64: 1, 27>}, {pipeline_mode = #tpu.pipeline_mode<synchronous>, transform_indices = @transform_5, window_bounds = array<i64: 2, 27, 9>}, {pipeline_mode = #tpu.pipeline_mode<synchronous>, transform_indices = @transform_6, window_bounds = array<i64: 1, 9>}, {pipeline_mode = #tpu.pipeline_mode<synchronous>, transform_indices = @transform_7, window_bounds = array<i64: 9, 7>}, {pipeline_mode = #tpu.pipeline_mode<synchronous>, transform_indices = @transform_8, window_bounds = array<i64: 9, 7>}, {pipeline_mode = #tpu.pipeline_mode<synchronous>, transform_indices = @transform_9, window_bounds = array<i64: 1, 7>}, {transform_indices = @transform_10, window_bounds = array<i64: 192, 7>}]} {
    %c0 = arith.constant 0 : index
    %c0_0 = arith.constant 0 : index
    %0 = vector.load %arg1[%c0, %c0_0] : memref<1728x80xbf16, #tpu.memory_space<vmem>>, vector<1536x80xbf16>
    %c192 = arith.constant 192 : index
    %c0_1 = arith.constant 0 : index
    %1 = vector.load %arg1[%c192, %c0_1] : memref<1728x80xbf16, #tpu.memory_space<vmem>>, vector<1536x80xbf16>
    %c0_2 = arith.constant 0 : index
    %c0_3 = arith.constant 0 : index
    %2 = vector.load %arg3[%c0_2, %c0_3] : memref<1x81xf32, #tpu.memory_space<vmem>>, vector<1x81xf32>
    %3 = vector.shape_cast %2 : vector<1x81xf32> to vector<1x81xf32>
    %4 = vector.broadcast %3 : vector<1x81xf32> to vector<1536x81xf32>
    %c0_4 = arith.constant 0 : index
    %c0_5 = arith.constant 0 : index
    %c0_6 = arith.constant 0 : index
    %5 = vector.load %arg2[%c0_4, %c0_5, %c0_6] : memref<2x80x81xbf16, #tpu.memory_space<vmem>>, vector<1x80x81xbf16>
    %6 = vector.shape_cast %5 : vector<1x80x81xbf16> to vector<80x81xbf16>
    %cst = arith.constant dense<0.000000e+00> : vector<1536x81xf32>
    %7 = tpu.matmul %0, %6, %cst {dimension_numbers = #tpu.dot_dimension_numbers<[1], [0], [0], [1], [0, 0, 1, 1], [], []>} : vector<1536x80xbf16>, vector<80x81xbf16>, vector<1536x81xf32> -> vector<1536x81xf32>
    %c1 = arith.constant 1 : index
    %c0_7 = arith.constant 0 : index
    %c0_8 = arith.constant 0 : index
    %8 = vector.load %arg2[%c1, %c0_7, %c0_8] : memref<2x80x81xbf16, #tpu.memory_space<vmem>>, vector<1x80x81xbf16>
    %9 = vector.shape_cast %8 : vector<1x80x81xbf16> to vector<80x81xbf16>
    %cst_9 = arith.constant dense<0.000000e+00> : vector<1536x81xf32>
    %10 = tpu.matmul %1, %9, %cst_9 {dimension_numbers = #tpu.dot_dimension_numbers<[1], [0], [0], [1], [0, 0, 1, 1], [], []>} : vector<1536x80xbf16>, vector<80x81xbf16>, vector<1536x81xf32> -> vector<1536x81xf32>
    %11 = arith.addf %7, %10 : vector<1536x81xf32>
    %12 = arith.addf %11, %4 : vector<1536x81xf32>
    %cst_10 = arith.constant 0.000000e+00 : f32
    %13 = vector.broadcast %cst_10 : f32 to vector<1536x81xf32>
    %14 = arith.maximumf %12, %13 : vector<1536x81xf32>
    %15 = vector.extract_strided_slice %14 {offsets = [0, 0], sizes = [192, 81], strides = [1, 1]} : vector<1536x81xf32> to vector<192x81xf32>
    %16 = vector.extract_strided_slice %14 {offsets = [192, 0], sizes = [192, 81], strides = [1, 1]} : vector<1536x81xf32> to vector<192x81xf32>
    %17 = arith.maximumf %15, %16 : vector<192x81xf32>
    %18 = vector.extract_strided_slice %14 {offsets = [384, 0], sizes = [192, 81], strides = [1, 1]} : vector<1536x81xf32> to vector<192x81xf32>
    %19 = vector.extract_strided_slice %14 {offsets = [576, 0], sizes = [192, 81], strides = [1, 1]} : vector<1536x81xf32> to vector<192x81xf32>
    %20 = arith.maximumf %18, %19 : vector<192x81xf32>
    %21 = vector.extract_strided_slice %14 {offsets = [768, 0], sizes = [192, 81], strides = [1, 1]} : vector<1536x81xf32> to vector<192x81xf32>
    %22 = vector.extract_strided_slice %14 {offsets = [960, 0], sizes = [192, 81], strides = [1, 1]} : vector<1536x81xf32> to vector<192x81xf32>
    %23 = arith.maximumf %21, %22 : vector<192x81xf32>
    %24 = vector.extract_strided_slice %14 {offsets = [1152, 0], sizes = [192, 81], strides = [1, 1]} : vector<1536x81xf32> to vector<192x81xf32>
    %25 = vector.extract_strided_slice %14 {offsets = [1344, 0], sizes = [192, 81], strides = [1, 1]} : vector<1536x81xf32> to vector<192x81xf32>
    %26 = arith.maximumf %24, %25 : vector<192x81xf32>
    %c0_11 = arith.constant 0 : index
    %c0_12 = arith.constant 0 : index
    %c0_13 = arith.constant 0 : index
    %27 = vector.load %arg4[%c0_11, %c0_12, %c0_13] : memref<2x81x27xf32, #tpu.memory_space<vmem>>, vector<1x81x27xf32>
    %28 = vector.shape_cast %27 : vector<1x81x27xf32> to vector<81x27xf32>
    %c1_14 = arith.constant 1 : index
    %c0_15 = arith.constant 0 : index
    %c0_16 = arith.constant 0 : index
    %29 = vector.load %arg4[%c1_14, %c0_15, %c0_16] : memref<2x81x27xf32, #tpu.memory_space<vmem>>, vector<1x81x27xf32>
    %30 = vector.shape_cast %29 : vector<1x81x27xf32> to vector<81x27xf32>
    %c0_17 = arith.constant 0 : index
    %c0_18 = arith.constant 0 : index
    %31 = vector.load %arg5[%c0_17, %c0_18] : memref<1x27xf32, #tpu.memory_space<vmem>>, vector<1x27xf32>
    %32 = vector.shape_cast %31 : vector<1x27xf32> to vector<1x27xf32>
    %33 = vector.broadcast %32 : vector<1x27xf32> to vector<192x27xf32>
    %cst_19 = arith.constant dense<0.000000e+00> : vector<192x27xf32>
    %34 = tpu.matmul %17, %30, %cst_19 {dimension_numbers = #tpu.dot_dimension_numbers<[1], [0], [0], [1], [0, 0, 1, 1], [], []>} : vector<192x81xf32>, vector<81x27xf32>, vector<192x27xf32> -> vector<192x27xf32>
    %35 = arith.addf %34, %33 : vector<192x27xf32>
    %cst_20 = arith.constant 0.000000e+00 : f32
    %36 = vector.broadcast %cst_20 : f32 to vector<192x27xf32>
    %37 = arith.maximumf %35, %36 : vector<192x27xf32>
    %cst_21 = arith.constant dense<0.000000e+00> : vector<192x27xf32>
    %38 = tpu.matmul %20, %28, %cst_21 {dimension_numbers = #tpu.dot_dimension_numbers<[1], [0], [0], [1], [0, 0, 1, 1], [], []>} : vector<192x81xf32>, vector<81x27xf32>, vector<192x27xf32> -> vector<192x27xf32>
    %cst_22 = arith.constant dense<0.000000e+00> : vector<192x27xf32>
    %39 = tpu.matmul %23, %30, %cst_22 {dimension_numbers = #tpu.dot_dimension_numbers<[1], [0], [0], [1], [0, 0, 1, 1], [], []>} : vector<192x81xf32>, vector<81x27xf32>, vector<192x27xf32> -> vector<192x27xf32>
    %40 = arith.addf %38, %39 : vector<192x27xf32>
    %41 = arith.addf %40, %33 : vector<192x27xf32>
    %cst_23 = arith.constant 0.000000e+00 : f32
    %42 = vector.broadcast %cst_23 : f32 to vector<192x27xf32>
    %43 = arith.maximumf %41, %42 : vector<192x27xf32>
    %cst_24 = arith.constant dense<0.000000e+00> : vector<192x27xf32>
    %44 = tpu.matmul %26, %28, %cst_24 {dimension_numbers = #tpu.dot_dimension_numbers<[1], [0], [0], [1], [0, 0, 1, 1], [], []>} : vector<192x81xf32>, vector<81x27xf32>, vector<192x27xf32> -> vector<192x27xf32>
    %45 = arith.addf %44, %33 : vector<192x27xf32>
    %cst_25 = arith.constant 0.000000e+00 : f32
    %46 = vector.broadcast %cst_25 : f32 to vector<192x27xf32>
    %47 = arith.maximumf %45, %46 : vector<192x27xf32>
    %48 = arith.maximumf %37, %43 : vector<192x27xf32>
    %49 = arith.maximumf %43, %47 : vector<192x27xf32>
    %c0_26 = arith.constant 0 : index
    %c0_27 = arith.constant 0 : index
    %50 = vector.load %arg7[%c0_26, %c0_27] : memref<1x9xf32, #tpu.memory_space<vmem>>, vector<1x9xf32>
    %51 = vector.shape_cast %50 : vector<1x9xf32> to vector<1x9xf32>
    %52 = vector.broadcast %51 : vector<1x9xf32> to vector<192x9xf32>
    %c1_28 = arith.constant 1 : index
    %c0_29 = arith.constant 0 : index
    %c0_30 = arith.constant 0 : index
    %53 = vector.load %arg6[%c1_28, %c0_29, %c0_30] : memref<2x27x9xf32, #tpu.memory_space<vmem>>, vector<1x27x9xf32>
    %54 = vector.shape_cast %53 : vector<1x27x9xf32> to vector<27x9xf32>
    %cst_31 = arith.constant dense<0.000000e+00> : vector<192x9xf32>
    %55 = tpu.matmul %48, %54, %cst_31 {dimension_numbers = #tpu.dot_dimension_numbers<[1], [0], [0], [1], [0, 0, 1, 1], [], []>} : vector<192x27xf32>, vector<27x9xf32>, vector<192x9xf32> -> vector<192x9xf32>
    %56 = arith.addf %55, %52 : vector<192x9xf32>
    %cst_32 = arith.constant 0.000000e+00 : f32
    %57 = vector.broadcast %cst_32 : f32 to vector<192x9xf32>
    %58 = arith.maximumf %56, %57 : vector<192x9xf32>
    %c0_33 = arith.constant 0 : index
    %c0_34 = arith.constant 0 : index
    %c0_35 = arith.constant 0 : index
    %59 = vector.load %arg6[%c0_33, %c0_34, %c0_35] : memref<2x27x9xf32, #tpu.memory_space<vmem>>, vector<1x27x9xf32>
    %60 = vector.shape_cast %59 : vector<1x27x9xf32> to vector<27x9xf32>
    %cst_36 = arith.constant dense<0.000000e+00> : vector<192x9xf32>
    %61 = tpu.matmul %49, %60, %cst_36 {dimension_numbers = #tpu.dot_dimension_numbers<[1], [0], [0], [1], [0, 0, 1, 1], [], []>} : vector<192x27xf32>, vector<27x9xf32>, vector<192x9xf32> -> vector<192x9xf32>
    %62 = arith.addf %61, %52 : vector<192x9xf32>
    %cst_37 = arith.constant 0.000000e+00 : f32
    %63 = vector.broadcast %cst_37 : f32 to vector<192x9xf32>
    %64 = arith.maximumf %62, %63 : vector<192x9xf32>
    %c0_38 = arith.constant 0 : index
    %c0_39 = arith.constant 0 : index
    %65 = vector.load %arg8[%c0_38, %c0_39] : memref<9x7xf32, #tpu.memory_space<vmem>>, vector<9x7xf32>
    %cst_40 = arith.constant dense<0.000000e+00> : vector<192x7xf32>
    %66 = tpu.matmul %58, %65, %cst_40 {dimension_numbers = #tpu.dot_dimension_numbers<[1], [0], [0], [1], [0, 0, 1, 1], [], []>} : vector<192x9xf32>, vector<9x7xf32>, vector<192x7xf32> -> vector<192x7xf32>
    %c0_41 = arith.constant 0 : index
    %c0_42 = arith.constant 0 : index
    %67 = vector.load %arg9[%c0_41, %c0_42] : memref<9x7xf32, #tpu.memory_space<vmem>>, vector<9x7xf32>
    %cst_43 = arith.constant dense<0.000000e+00> : vector<192x7xf32>
    %68 = tpu.matmul %64, %67, %cst_43 {dimension_numbers = #tpu.dot_dimension_numbers<[1], [0], [0], [1], [0, 0, 1, 1], [], []>} : vector<192x9xf32>, vector<9x7xf32>, vector<192x7xf32> -> vector<192x7xf32>
    %69 = arith.addf %66, %68 : vector<192x7xf32>
    %c0_44 = arith.constant 0 : index
    %c0_45 = arith.constant 0 : index
    %70 = vector.load %arg10[%c0_44, %c0_45] : memref<1x7xf32, #tpu.memory_space<vmem>>, vector<1x7xf32>
    %71 = vector.shape_cast %70 : vector<1x7xf32> to vector<1x7xf32>
    %72 = vector.broadcast %71 : vector<1x7xf32> to vector<192x7xf32>
    %73 = arith.addf %69, %72 : vector<192x7xf32>
    %cst_46 = arith.constant 0.000000e+00 : f32
    %74 = vector.broadcast %cst_46 : f32 to vector<192x7xf32>
    %75 = arith.subf %74, %73 : vector<192x7xf32>
    %76 = math.exp %75 : vector<192x7xf32>
    %cst_47 = arith.constant 1.000000e+00 : f32
    %77 = vector.broadcast %cst_47 : f32 to vector<192x7xf32>
    %78 = arith.addf %77, %76 : vector<192x7xf32>
    %cst_48 = arith.constant 1.000000e+00 : f32
    %79 = vector.broadcast %cst_48 : f32 to vector<192x7xf32>
    %80 = arith.divf %79, %78 : vector<192x7xf32>
    %c0_49 = arith.constant 0 : index
    %c0_50 = arith.constant 0 : index
    %81 = vector.load %arg11[%c0_49, %c0_50] : memref<192x7xf32, #tpu.memory_space<vmem>>, vector<192x7xf32>
    tpu.vector_store %arg11[%c0_49, %c0_50], %80 {strides = array<i32>} : memref<192x7xf32, #tpu.memory_space<vmem>>, vector<192x7xf32>,
    return
  }
  func.func @transform_0(%arg0: i32) -> (i32, i32) {
    %c0_i32 = arith.constant 0 : i32
    %c0_i32_0 = arith.constant 0 : i32
    return %arg0, %c0_i32 : i32, i32
  }
  func.func @transform_1(%arg0: i32) -> (i32, i32, i32) {
    %c0_i32 = arith.constant 0 : i32
    %c0_i32_0 = arith.constant 0 : i32
    %c0_i32_1 = arith.constant 0 : i32
    %c0_i32_2 = arith.constant 0 : i32
    return %c0_i32, %c0_i32_0, %c0_i32_1 : i32, i32, i32
  }
  func.func @transform_2(%arg0: i32) -> (i32, i32) {
    %c0_i32 = arith.constant 0 : i32
    %c0_i32_0 = arith.constant 0 : i32
    %c0_i32_1 = arith.constant 0 : i32
    return %c0_i32, %c0_i32_0 : i32, i32
  }
  func.func @transform_3(%arg0: i32) -> (i32, i32, i32) {
    %c0_i32 = arith.constant 0 : i32
    %c0_i32_0 = arith.constant 0 : i32
    %c0_i32_1 = arith.constant 0 : i32
    %c0_i32_2 = arith.constant 0 : i32
    return %c0_i32, %c0_i32_0, %c0_i32_1 : i32, i32, i32
  }
  func.func @transform_4(%arg0: i32) -> (i32, i32) {
    %c0_i32 = arith.constant 0 : i32
    %c0_i32_0 = arith.constant 0 : i32
    %c0_i32_1 = arith.constant 0 : i32
    return %c0_i32, %c0_i32_0 : i32, i32
  }
  func.func @transform_5(%arg0: i32) -> (i32, i32, i32) {
    %c0_i32 = arith.constant 0 : i32
    %c0_i32_0 = arith.constant 0 : i32
    %c0_i32_1 = arith.constant 0 : i32
    %c0_i32_2 = arith.constant 0 : i32
    return %c0_i32, %c0_i32_0, %c0_i32_1 : i32, i32, i32
  }
  func.func @transform_6(%arg0: i32) -> (i32, i32) {
    %c0_i32 = arith.constant 0 : i32
    %c0_i32_0 = arith.constant 0 : i32
    %c0_i32_1 = arith.constant 0 : i32
    return %c0_i32, %c0_i32_0 : i32, i32
  }
  func.func @transform_7(%arg0: i32) -> (i32, i32) {
    %c0_i32 = arith.constant 0 : i32
    %c0_i32_0 = arith.constant 0 : i32
    %c0_i32_1 = arith.constant 0 : i32
    return %c0_i32, %c0_i32_0 : i32, i32
  }
  func.func @transform_8(%arg0: i32) -> (i32, i32) {
    %c0_i32 = arith.constant 0 : i32
    %c0_i32_0 = arith.constant 0 : i32
    %c0_i32_1 = arith.constant 0 : i32
    return %c0_i32, %c0_i32_0 : i32, i32
  }
  func.func @transform_9(%arg0: i32) -> (i32, i32) {
    %c0_i32 = arith.constant 0 : i32
    %c0_i32_0 = arith.constant 0 : i32
    %c0_i32_1 = arith.constant 0 : i32
    return %c0_i32, %c0_i32_0 : i32, i32
  }
  func.func @transform_10(%arg0: i32) -> (i32, i32) {
    %c0_i32 = arith.constant 0 : i32
    %c0_i32_0 = arith.constant 0 : i32
    return %arg0, %c0_i32 : i32, i32
  }
}

</mosaic_0001>

<bundles_post_ra>
// kernel: cnn1d_pallas.1
= control target key start
LH: loop header
LB: loop body
LE: loop exit
PB: predicated region body
PF: predicated region fallthrough
CT: control target
= control target key end

     0   :  { %s8646_s13 = smov 0   ;;  %s11091_s0 = inlined_call_operand.vmem [shape: bf16[3456,80], index: 0, kind: input, shape index: {}]   ;;  %s11092_s1 = inlined_call_operand.vmem [shape: bf16[2,80,81], index: 1, kind: input, shape index: {}]   ;;  %s11093_s2 = inlined_call_operand.vmem [shape: f32[1,81], index: 2, kind: input, shape index: {}]   ;;  %s11094_s3 = inlined_call_operand.vmem [shape: f32[2,81,27], index: 3, kind: input, shape index: {}]   ;;  %s11095_s4 = inlined_call_operand.vmem [shape: f32[1,27], index: 4, kind: input, shape index: {}]   ;;  %s11096_s5 = inlined_call_operand.vmem [shape: f32[2,27,9], index: 5, kind: input, shape index: {}]   ;;  %s11097_s6 = inlined_call_operand.vmem [shape: f32[1,9], index: 6, kind: input, shape index: {}]   ;;  %s11098_s7 = inlined_call_operand.vmem [shape: f32[9,7], index: 7, kind: input, shape index: {}]   ;;  %s11099_s8 = inlined_call_operand.vmem [shape: f32[9,7], index: 8, kind: input, shape index: {}]   ;;  %s11100_s9 = inlined_call_operand.vmem [shape: f32[1,7], index: 9, kind: input, shape index: {}]   ;;  %s11101_s10 = inlined_call_operand.vmem [shape: f32[384,7], index: 10, kind: output, shape index: {}]  }
   0x1 LB: > { %s6192_s14 = sadd.s32 4294967295, %s8588_s13   ;;  %p6196_p0 = scmp.ge.s32.totalorder %s8588_s13, 1  ;;  %s8588_s13 = sphi %s8646_s13, %s20_s13  }
   0x2   : > { %p313_p1 = scmp.lt.s32.totalorder %s8588_s13, 3 }
   0x4   : > { %p314_p2 = pnand %p6196_p0, %p313_p1 }
   0x6   : > { %317 = sbr.rel (%p314_p2) target bundleno = 1560 (0x618), region = 60 }
   0xd   : > { %v8365_v0 = vld [vmem:[%s11092_s1 + $0x28] sm:$0xff]   ;;  %s351_s17 = smul.u32 216, %s6192_s14  ;;  %v8366_v1 = vld [vmem:[%s11092_s1 + $0x30] sm:$0xff]   ;;  %v8367_v2 = vld [vmem:[%s11092_s1 + $0x38] sm:$0xff]   ;;  %vm1118_vm0 = vcmask 654336   ;;  %vm3718_vm1 = vcmask 1040384  }
   0xe   : > { %7190 = vmatprep.subr.bf16.mxu0 %v8365_v0  ;;  %8106 = vmatprep.subr.bf16.mxu1 %v8365_v0  ;;  %v8368_v3 = vld [vmem:[%s11092_s1 + $0x40] sm:$0xff]   ;;  %v8369_v5 = vld [vmem:[%s11092_s1 + $0x48] sm:$0xff]   ;;  %v8392_v10 = vld [vmem:[%s11092_s1 + $0x10] sm:$0xff]   ;;  %vm3645_vm2 = vcmask 662528   ;;  %vm4910_vm3 = vcmask 1042432   ;;  %vm8590_vm4 = vmmov 1  }
   0xf   : > { %p352_p3 = scmp.lt.s32.totalorder %s351_s17, 431  ;;  %7191 = vmatpush3.bf16.msra.mxu0 %v8365_v0  ;;  %8111 = vmatpush3.bf16.msra.mxu1 %v8365_v0  ;;  %v8372_v6 = vld [vmem:[%s11092_s1] sm:$0xff]   ;;  %v8382_v9 = vld [vmem:[%s11092_s1 + $0x8] sm:$0xff]   ;;  %v8403_v15 = vld [vmem:[%s11092_s1 + $0x18] sm:$0xff]   ;;  %vm4837_vm6 = vcmask 220160   ;;  %vm5415_vm8 = vcmask 72704  }
  0x10   : > { %7192 = vmatprep.subr.bf16.mxu0 %v8366_v1  ;;  %8107 = vmatprep.subr.bf16.mxu1 %v8366_v1  ;;  %v8414_v18 = vld [vmem:[%s11092_s1 + $0x20] sm:$0xff]   ;;  %vm10364_vm5 = vmpackc.low %vm4910_vm3, %vm8590_vm4  ;;  %s357_s12 = smul.u32 24, %s6192_s14  ;;  %vm6111_vm9 = vcmask 56320  }
  0x11   : > { %s11323_s17 = smov (!%p352_p3, %s351_s17), 431  ;;  %vm10808_vm7 = vmpackc.low %vm3718_vm1, %vm8590_vm4 }
  0x12   : > { %s6197_s22 = sshll.u32 %s11323_s17, 2  ;;  %p358_p4 = scmp.lt.s32.totalorder %s357_s12, 47 }
  0x13   : > { %7193 = vmatpush3.bf16.msra.mxu0 %v8366_v1  ;;  %s8671_s27 = scalar_lea.vmem %s11091_s0, %s6197_s22  ;;  %8112 = vmatpush3.bf16.msra.mxu1 %v8366_v1 }
  0x14   : > { %7194 = vmatprep.subr.bf16.mxu0 %v8367_v2  ;;  %v8674_v4 = vld [vmem:[%s8671_s27 + $0x60] sm:$0xff]   ;;  %8108 = vmatprep.subr.bf16.mxu1 %v8367_v2  ;;  %v8685_v7 = vld [vmem:[%s8671_s27 + $0x68] sm:$0xff]   ;;  %v8688_v8 = vld [vmem:[%s8671_s27 + $0x70] sm:$0xff]   ;;  %s11325_s12 = smov (!%p358_p4, %s357_s12), 47 }
  0x15   : > { %7200 = vmatprep.mubr.msk.bf16.mxu0 %vm1118_vm0, %v8674_v4  ;;  %v8701_v11 = vld [vmem:[%s8671_s27 + $0x78] sm:$0xff]   ;;  %v8704_v12 = vld [vmem:[%s8671_s27 + $0x80] sm:$0xff]   ;;  %v8711_v13 = vld [vmem:[%s8671_s27 + $0x88] sm:$0xff]   ;;  %s6198_s14 = sshll.u32 %s11325_s12, 3 }
  0x16   : > { %v8714_v14 = vld [vmem:[%s8671_s27 + $0x90] sm:$0xff]   ;;  %v8724_v16 = vld [vmem:[%s8671_s27 + $0x98] sm:$0xff]   ;;  %v8727_v17 = vld [vmem:[%s8671_s27 + $0xa0] sm:$0xff]   ;;  %s11028_s16 = scalar_lea.vmem %s11101_s10, %s6198_s14 }
  0x17   : > { %7195 = vmatpush3.bf16.msra.mxu0 %v8367_v2  ;;  %8113 = vmatpush3.bf16.msra.mxu1 %v8367_v2  ;;  %v8737_v19 = vld [vmem:[%s8671_s27 + $0xa8] sm:$0xff]   ;;  %v8740_v20 = vld [vmem:[%s8671_s27 + $0xb0] sm:$0xff]   ;;  %v8747_v21 = vld [vmem:[%s8671_s27 + $0xb8] sm:$0xff]  }
  0x18   : > { %7196 = vmatprep.subr.bf16.mxu0 %v8368_v3  ;;  %8109 = vmatprep.subr.bf16.mxu1 %v8368_v3  ;;  %v8750_v22 = vld [vmem:[%s8671_s27 + $0xc0] sm:$0xff]   ;;  %v8757_v23 = vld [vmem:[%s8671_s27 + $0xc8] sm:$0xff]   ;;  %v8760_v24 = vld [vmem:[%s8671_s27 + $0xd0] sm:$0xff]  }
  0x19   : > { %v8767_v25 = vld [vmem:[%s8671_s27 + $0xd8] sm:$0xff]   ;;  %v8770_v26 = vld [vmem:[%s8671_s27 + $0xe0] sm:$0xff]   ;;  %v8777_v27 = vld [vmem:[%s8671_s27 + $0xe8] sm:$0xff]  }
  0x1a   : > { %v8780_v28 = vld [vmem:[%s8671_s27 + $0xf0] sm:$0xff]   ;;  %v8787_v29 = vld [vmem:[%s8671_s27 + $0xf8] sm:$0xff]   ;;  %v8790_v30 = vld [vmem:[%s8671_s27 + $0x100] sm:$0xff]  }
  0x1b   : > { %7197 = vmatpush3.bf16.msra.mxu0 %v8368_v3  ;;  %8114 = vmatpush3.bf16.msra.mxu1 %v8368_v3  ;;  %v8797_v31 = vld [vmem:[%s8671_s27 + $0x108] sm:$0xff]   ;;  %v8800_v32 = vld [vmem:[%s8671_s27 + $0x110] sm:$0xff]   ;;  %v8807_v33 = vld [vmem:[%s8671_s27 + $0x118] sm:$0xff]  }
  0x1c   : > { %7198 = vmatprep.subr.bf16.mxu0 %v8369_v5  ;;  %8110 = vmatprep.subr.bf16.mxu1 %v8369_v5  ;;  %v8810_v34 = vld [vmem:[%s8671_s27 + $0x120] sm:$0xff]   ;;  %v8817_v35 = vld [vmem:[%s8671_s27 + $0x128] sm:$0xff]   ;;  %v8820_v36 = vld [vmem:[%s8671_s27 + $0x130] sm:$0xff]  }
  0x1d   : > { %v8827_v37 = vld [vmem:[%s8671_s27 + $0x138] sm:$0xff]   ;;  %v8830_v38 = vld [vmem:[%s8671_s27 + $0x140] sm:$0xff]   ;;  %v8837_v39 = vld [vmem:[%s8671_s27 + $0x148] sm:$0xff]  }
  0x1e   : > { %v8840_v40 = vld [vmem:[%s8671_s27 + $0x150] sm:$0xff]   ;;  %v8847_v41 = vld [vmem:[%s8671_s27 + $0x158] sm:$0xff]   ;;  %v8850_v42 = vld [vmem:[%s8671_s27 + $0x160] sm:$0xff]  }
  0x1f   : > { %7199 = vmatpush3.bf16.msra.mxu0 %v8369_v5  ;;  %8115 = vmatpush3.bf16.msra.mxu1 %v8369_v5  ;;  %v8857_v43 = vld [vmem:[%s8671_s27 + $0x168] sm:$0xff]   ;;  %v8860_v44 = vld [vmem:[%s8671_s27 + $0x170] sm:$0xff]   ;;  %v8867_v45 = vld [vmem:[%s8671_s27 + $0x178] sm:$0xff]  }
  0x20   : > { %7392 = vmatprep.subr.bf16.mxu0 %v8372_v6  ;;  %v8870_v46 = vld [vmem:[%s8671_s27 + $0x180] sm:$0xff]   ;;  %v8878_v48 = vld [vmem:[%s8671_s27 + $0x1e8] sm:$0xff]   ;;  %v8890_v50 = vld [vmem:[%s8671_s27 + $0x190] sm:$0xff]  }
  0x21   : > { %v8875_v47 = vld [vmem:[%s8671_s27 + $0x1e0] sm:$0xff]   ;;  %v8887_v49 = vld [vmem:[%s8671_s27 + $0x188] sm:$0xff]   ;;  %v8895_v51 = vld [vmem:[%s8671_s27 + $0x1f0] sm:$0xff]  }
  0x22   : > { %7201 = vmatmul.mubr.msk.bf16.vlgmr.msra.gmra.mrb[0].mxu0 %vm1118_vm0, %v8685_v7  ;;  %7296 = vmatprep.mubr.msk.bf16.mxu1 %vm1118_vm0, %v8875_v47  ;;  %v8898_v52 = vld [vmem:[%s8671_s27 + $0x1f8] sm:$0xff]   ;;  %v8910_v54 = vld [vmem:[%s8671_s27 + $0x1a0] sm:$0xff]   ;;  %v8918_v56 = vld [vmem:[%s8671_s27 + $0x208] sm:$0xff]  }
  0x23   : > { %7393 = vmatpush3.bf16.msra.mxu0 %v8372_v6  ;;  %7204 = vmatprep.mubr.msk.bf16.mxu0 %vm1118_vm0, %v8688_v8  ;;  %v8907_v53 = vld [vmem:[%s8671_s27 + $0x198] sm:$0xff]   ;;  %v8915_v55 = vld [vmem:[%s8671_s27 + $0x200] sm:$0xff]   ;;  %v8927_v57 = vld [vmem:[%s8671_s27 + $0x1a8] sm:$0xff]  }
  0x24   : > { %7394 = vmatprep.subr.bf16.mxu0 %v8382_v9  ;;  %7297 = vmatmul.mubr.msk.bf16.vlgmr.msra.gmra.mrb[0].mxu1 %vm1118_vm0, %v8878_v48  ;;  %v8930_v58 = vld [vmem:[%s8671_s27 + $0x1b0] sm:$0xff]   ;;  %v8938_v60 = vld [vmem:[%s8671_s27 + $0x218] sm:$0xff]   ;;  %v8950_v62 = vld [vmem:[%s8671_s27 + $0x1c0] sm:$0xff]  }
  0x25   : > { %7300 = vmatprep.mubr.msk.bf16.mxu1 %vm1118_vm0, %v8895_v51  ;;  %v8935_v59 = vld [vmem:[%s8671_s27 + $0x210] sm:$0xff]   ;;  %v8947_v61 = vld [vmem:[%s8671_s27 + $0x1b8] sm:$0xff]   ;;  %v8955_v63 = vld [vmem:[%s8671_s27 + $0x220] sm:$0xff]  }
  0x26   : > { %v8958_v0 = vld [vmem:[%s8671_s27 + $0x228] sm:$0xff]   ;;  %v8970_v2 = vld [vmem:[%s8671_s27 + $0x1d0] sm:$0xff]   ;;  %v8978_v5 = vld [vmem:[%s8671_s27 + $0x238] sm:$0xff]  }
  0x27   : > { %7395 = vmatpush3.bf16.msra.mxu0 %v8382_v9  ;;  %11116 = vst [vmem:[#allocation2_spill] sm:$0xff] %v8958_v0  ;;  %v8967_v1 = vld [vmem:[%s8671_s27 + $0x1c8] sm:$0xff]   ;;  %v8975_v3 = vld [vmem:[%s8671_s27 + $0x230] sm:$0xff]   ;;  %11118 = vst [vmem:[#allocation4_spill] sm:$0xff] %v8978_v5 }
  0x28   : > { %7396 = vmatprep.subr.bf16.mxu0 %v8392_v10  ;;  %11117 = vst [vmem:[#allocation3_spill] sm:$0xff] %v8975_v3  ;;  %v8987_v6 = vld [vmem:[%s8671_s27 + $0x1d8] sm:$0xff]   ;;  %v8423_v9 = vld [vmem:[%s8671_s27] sm:$0xff]  }
  0x2a   : > { %7205 = vmatmul.mubr.msk.bf16.gmra.mrb[4].mxu0 %vm1118_vm0, %v8701_v11 }
  0x2b   : > { %7208 = vmatprep.mubr.msk.bf16.mxu0 %vm1118_vm0, %v8704_v12  ;;  %7397 = vmatpush3.bf16.msra.mxu0 %v8392_v10  ;;  %v8993_v10 = vld [vmem:[%s8671_s27 + $0x240] sm:$0xff]  }
  0x2c   : > { %7398 = vmatprep.subr.bf16.mxu0 %v8403_v15  ;;  %7301 = vmatmul.mubr.msk.bf16.gmra.mrb[4].mxu1 %vm1118_vm0, %v8898_v52  ;;  %11119 = vst [vmem:[#allocation5_spill] sm:$0xff] %v8993_v10 }
  0x2d   : > { %7304 = vmatprep.mubr.msk.bf16.mxu1 %vm1118_vm0, %v8915_v55 }
  0x2f   : > { %7399 = vmatpush3.bf16.msra.mxu0 %v8403_v15  ;;  %v8996_v15 = vld [vmem:[%s8671_s27 + $0x248] sm:$0xff]  }
  0x30   : > { %7400 = vmatprep.subr.bf16.mxu0 %v8414_v18  ;;  %11120 = vst [vmem:[#allocation6_spill] sm:$0xff] %v8996_v15 }
  0x32   : > { %7209 = vmatmul.mubr.msk.bf16.gmra.mrb[8].mxu0 %vm1118_vm0, %v8711_v13 }
  0x33   : > { %7212 = vmatprep.mubr.msk.bf16.mxu0 %vm1118_vm0, %v8714_v14  ;;  %7401 = vmatpush3.bf16.msra.mxu0 %v8414_v18  ;;  %v8424_v18 = vld [vmem:[%s8671_s27 + $0x8] sm:$0xff]  }
  0x34   : > { %7305 = vmatmul.mubr.msk.bf16.gmra.mrb[8].mxu1 %vm1118_vm0, %v8918_v56 }
  0x35   : > { %7308 = vmatprep.mubr.msk.bf16.mxu1 %vm1118_vm0, %v8935_v59 }
  0x3a   : > { %7213 = vmatmul.mubr.msk.bf16.gmra.mrb[12].mxu0 %vm1118_vm0, %v8724_v16 }
  0x3b   : > { %7216 = vmatprep.mubr.msk.bf16.mxu0 %vm1118_vm0, %v8727_v17 }
  0x3c   : > { %7309 = vmatmul.mubr.msk.bf16.gmra.mrb[12].mxu1 %vm1118_vm0, %v8938_v60 }
  0x3d   : > { %7312 = vmatprep.mubr.msk.bf16.mxu1 %vm1118_vm0, %v8955_v63 }
  0x42   : > { %7217 = vmatmul.mubr.msk.bf16.gmra.mrb[16].mxu0 %vm1118_vm0, %v8737_v19 }
  0x43   : > { %7220 = vmatprep.mubr.msk.bf16.mxu0 %vm1118_vm0, %v8740_v20 }
  0x44   : > { %7313 = vmatmul.mubr.msk.bf16.gmra.mrb[16].mxu1 %vm1118_vm0, %v8958_v0  ;;  %v9010_v0 = vld [vmem:[%s8671_s27 + $0x258] sm:$0xff]  }
  0x45   : > { %7316 = vmatprep.mubr.msk.bf16.mxu1 %vm1118_vm0, %v8975_v3  ;;  %v9007_v3 = vld [vmem:[%s8671_s27 + $0x250] sm:$0xff]   ;;  %11122 = vst [vmem:[#allocation8_spill] sm:$0xff] %v9010_v0 }
  0x46   : > { %11121 = vst [vmem:[#allocation7_spill] sm:$0xff] %v9007_v3 }
  0x4a   : > { %7221 = vmatmul.mubr.msk.bf16.gmra.mrb[20].mxu0 %vm1118_vm0, %v8747_v21 }
  0x4b   : > { %7224 = vmatprep.mubr.msk.bf16.mxu0 %vm1118_vm0, %v8750_v22 }
  0x4c   : > { %7317 = vmatmul.mubr.msk.bf16.gmra.mrb[20].mxu1 %vm1118_vm0, %v8978_v5  ;;  %v8425_v5 = vld [vmem:[%s8671_s27 + $0x10] sm:$0xff]  }
  0x4d   : > { %7320 = vmatprep.mubr.msk.bf16.mxu1 %vm1118_vm0, %v8993_v10  ;;  %v9024_v10 = vld [vmem:[%s8671_s27 + $0x268] sm:$0xff]  }
  0x4e   : > { %11124 = vst [vmem:[#allocation10_spill] sm:$0xff] %v9024_v10 }
  0x52   : > { %7225 = vmatmul.mubr.msk.bf16.gmra.mrb[24].mxu0 %vm1118_vm0, %v8757_v23 }
  0x53   : > { %7228 = vmatprep.mubr.msk.bf16.mxu0 %vm1118_vm0, %v8760_v24 }
  0x54   : > { %7321 = vmatmul.mubr.msk.bf16.gmra.mrb[24].mxu1 %vm1118_vm0, %v8996_v15  ;;  %v8427_v15 = vld [vmem:[%s8671_s27 + $0x20] sm:$0xff]  }
  0x55   : > { %7324 = vmatprep.mubr.msk.bf16.mxu1 %vm1118_vm0, %v9007_v3  ;;  %v9038_v3 = vld [vmem:[%s8671_s27 + $0x278] sm:$0xff]  }
  0x56   : > { %11126 = vst [vmem:[#allocation12_spill] sm:$0xff] %v9038_v3 }
  0x5a   : > { %7229 = vmatmul.mubr.msk.bf16.gmra.mrb[28].mxu0 %vm1118_vm0, %v8767_v25 }
  0x5b   : > { %7232 = vmatprep.mubr.msk.bf16.mxu0 %vm1118_vm0, %v8770_v26 }
  0x5c   : > { %7325 = vmatmul.mubr.msk.bf16.gmra.mrb[28].mxu1 %vm1118_vm0, %v9010_v0  ;;  %v8429_v0 = vld [vmem:[%s8671_s27 + $0x30] sm:$0xff]  }
  0x62   : > { %7233 = vmatmul.mubr.msk.bf16.gmra.mrb[32].mxu0 %vm1118_vm0, %v8777_v27 }
  0x63   : > { %7236 = vmatprep.mubr.msk.bf16.mxu0 %vm1118_vm0, %v8780_v28 }
  0x6a   : > { %7237 = vmatmul.mubr.msk.bf16.gmra.mrb[36].mxu0 %vm1118_vm0, %v8787_v29 }
  0x6b   : > { %7240 = vmatprep.mubr.msk.bf16.mxu0 %vm1118_vm0, %v8790_v30 }
  0x72   : > { %7241 = vmatmul.mubr.msk.bf16.gmra.mrb[40].mxu0 %vm1118_vm0, %v8797_v31 }
  0x73   : > { %7244 = vmatprep.mubr.msk.bf16.mxu0 %vm1118_vm0, %v8800_v32 }
  0x7a   : > { %7245 = vmatmul.mubr.msk.bf16.gmra.mrb[44].mxu0 %vm1118_vm0, %v8807_v33 }
  0x7b   : > { %7248 = vmatprep.mubr.msk.bf16.mxu0 %vm1118_vm0, %v8810_v34 }
  0x82   : > { %7249 = vmatmul.mubr.msk.bf16.gmra.mrb[48].mxu0 %vm1118_vm0, %v8817_v35 }
  0x83   : > { %7252 = vmatprep.mubr.msk.bf16.mxu0 %vm1118_vm0, %v8820_v36 }
  0x8a   : > { %7253 = vmatmul.mubr.msk.bf16.gmra.mrb[52].mxu0 %vm1118_vm0, %v8827_v37 }
  0x8b   : > { %7256 = vmatprep.mubr.msk.bf16.mxu0 %vm1118_vm0, %v8830_v38 }
  0x92   : > { %7257 = vmatmul.mubr.msk.bf16.gmra.mrb[56].mxu0 %vm1118_vm0, %v8837_v39 }
  0x93   : > { %7260 = vmatprep.mubr.msk.bf16.mxu0 %vm1118_vm0, %v8840_v40 }
  0x9a   : > { %7261 = vmatmul.mubr.msk.bf16.gmra.mrb[60].mxu0 %vm1118_vm0, %v8847_v41 }
  0x9b   : > { %7264 = vmatprep.mubr.msk.bf16.mxu0 %vm1118_vm0, %v8850_v42 }
  0xa2   : > { %7265 = vmatmul.mubr.msk.bf16.gmra.mrb[64].mxu0 %vm1118_vm0, %v8857_v43 }
  0xa3   : > { %7268 = vmatprep.mubr.msk.bf16.mxu0 %vm1118_vm0, %v8860_v44 }
  0xaa   : > { %7269 = vmatmul.mubr.msk.bf16.gmra.mrb[68].mxu0 %vm1118_vm0, %v8867_v45 }
  0xab   : > { %7272 = vmatprep.mubr.msk.bf16.mxu0 %vm1118_vm0, %v8870_v46 }
  0xb2   : > { %7273 = vmatmul.mubr.msk.bf16.gmra.mrb[72].mxu0 %vm1118_vm0, %v8887_v49 }
  0xb3   : > { %7276 = vmatprep.mubr.msk.bf16.mxu0 %vm1118_vm0, %v8890_v50 }
  0xba   : > { %7277 = vmatmul.mubr.msk.bf16.gmra.mrb[76].mxu0 %vm1118_vm0, %v8907_v53 }
  0xbb   : > { %7280 = vmatprep.mubr.msk.bf16.mxu0 %vm1118_vm0, %v8910_v54 }
  0xc2   : > { %7281 = vmatmul.mubr.msk.bf16.gmra.mrb[80].mxu0 %vm1118_vm0, %v8927_v57 }
  0xc3   : > { %7284 = vmatprep.mubr.msk.bf16.mxu0 %vm1118_vm0, %v8930_v58 }
  0xca   : > { %7285 = vmatmul.mubr.msk.bf16.gmra.mrb[84].mxu0 %vm1118_vm0, %v8947_v61 }
  0xcb   : > { %7288 = vmatprep.mubr.msk.bf16.mxu0 %vm1118_vm0, %v8950_v62 }
  0xd2   : > { %7289 = vmatmul.mubr.msk.bf16.gmra.mrb[88].mxu0 %vm1118_vm0, %v8967_v1 }
  0xd3   : > { %7292 = vmatprep.mubr.msk.bf16.mxu0 %vm1118_vm0, %v8970_v2 }
  0xda   : > { %7293 = vmatmul.mubr.msk.bf16.gmra.mrb[92].mxu0 %vm1118_vm0, %v8987_v6 }
  0xdb   : > { %7402 = vmatprep.mubr.msk.bf16.mxu0 %vm1118_vm0, %v8423_v9  ;;  %v8426_v9 = vld [vmem:[%s8671_s27 + $0x18] sm:$0xff]  }
  0xe2   : > { %7403 = vmatmul.mubr.msk.bf16.vlgmr.msra.gmra.mrb[0].mxu0 %vm1118_vm0, %v8424_v18  ;;  %v9021_v18 = vld [vmem:[%s8671_s27 + $0x260] sm:$0xff]  }
  0xe3   : > { %7406 = vmatprep.mubr.msk.bf16.mxu0 %vm1118_vm0, %v8425_v5  ;;  %11123 = vst [vmem:[#allocation9_spill] sm:$0xff] %v9021_v18  ;;  %7328 = vmatprep.mubr.msk.bf16.mxu1 %vm1118_vm0, %v9021_v18  ;;  %v8428_v5 = vld [vmem:[%s8671_s27 + $0x28] sm:$0xff]  }
  0xe4   : > { %7329 = vmatmul.mubr.msk.bf16.gmra.mrb[32].mxu1 %vm1118_vm0, %v9024_v10  ;;  %v8431_v10 = vld [vmem:[%s8671_s27 + $0x40] sm:$0xff]   ;;  %v9052_v18 = vld [vmem:[%s8671_s27 + $0x288] sm:$0xff]  }
  0xe5   : > { %11127 = vst [vmem:[#allocation13_spill] sm:$0xff] %v9052_v18 }
  0xea   : > { %7407 = vmatmul.mubr.msk.bf16.gmra.mrb[4].mxu0 %vm1118_vm0, %v8426_v9  ;;  %v9035_v9 = vld [vmem:[%s8671_s27 + $0x270] sm:$0xff]  }
  0xeb   : > { %7410 = vmatprep.mubr.msk.bf16.mxu0 %vm1118_vm0, %v8427_v15  ;;  %11125 = vst [vmem:[#allocation11_spill] sm:$0xff] %v9035_v9  ;;  %7332 = vmatprep.mubr.msk.bf16.mxu1 %vm1118_vm0, %v9035_v9  ;;  %v8430_v15 = vld [vmem:[%s8671_s27 + $0x38] sm:$0xff]  }
  0xec   : > { %7333 = vmatmul.mubr.msk.bf16.gmra.mrb[36].mxu1 %vm1118_vm0, %v9038_v3  ;;  %v8433_v3 = vld [vmem:[%s8671_s27 + $0x50] sm:$0xff]   ;;  %v9066_v9 = vld [vmem:[%s8671_s27 + $0x298] sm:$0xff]  }
  0xf2   : > { %7411 = vmatmul.mubr.msk.bf16.gmra.mrb[8].mxu0 %vm1118_vm0, %v8428_v5  ;;  %v9049_v5 = vld [vmem:[%s8671_s27 + $0x280] sm:$0xff]  }
  0xf3   : > { %7414 = vmatprep.mubr.msk.bf16.mxu0 %vm1118_vm0, %v8429_v0  ;;  %7336 = vmatprep.mubr.msk.bf16.mxu1 %vm1118_vm0, %v9049_v5  ;;  %v8432_v0 = vld [vmem:[%s8671_s27 + $0x48] sm:$0xff]  }
  0xf4   : > { %7337 = vmatmul.mubr.msk.bf16.gmra.mrb[40].mxu1 %vm1118_vm0, %v9052_v18  ;;  %v9076_v18 = vld [vmem:[%s8671_s27 + $0x2a0] sm:$0xff]  }
  0xfa   : > { %7415 = vmatmul.mubr.msk.bf16.gmra.mrb[12].mxu0 %vm1118_vm0, %v8430_v15  ;;  %v9063_v15 = vld [vmem:[%s8671_s27 + $0x290] sm:$0xff]  }
  0xfb   : > { %7418 = vmatprep.mubr.msk.bf16.mxu0 %vm1118_vm0, %v8431_v10  ;;  %7340 = vmatprep.mubr.msk.bf16.mxu1 %vm1118_vm0, %v9063_v15  ;;  %v8434_v10 = vld [vmem:[%s8671_s27 + $0x58] sm:$0xff]  }
  0xfc   : > { %7341 = vmatmul.mubr.msk.bf16.gmra.mrb[44].mxu1 %vm1118_vm0, %v9066_v9 }
  0xfd   : > { %7344 = vmatprep.mubr.msk.bf16.mxu1 %vm1118_vm0, %v9076_v18 }
 0x102   : > { %7419 = vmatmul.mubr.msk.bf16.gmra.mrb[16].mxu0 %vm1118_vm0, %v8432_v0  ;;  %v9079_v0 = vld [vmem:[%s8671_s27 + $0x2a8] sm:$0xff]  }
 0x103   : > { %7422 = vmatprep.mubr.msk.bf16.mxu0 %vm1118_vm0, %v8433_v3  ;;  %v9090_v3 = vld [vmem:[%s8671_s27 + $0x2b0] sm:$0xff]  }
 0x104   : > { %7345 = vmatmul.mubr.msk.bf16.gmra.mrb[48].mxu1 %vm1118_vm0, %v9079_v0 }
 0x105   : > { %7348 = vmatprep.mubr.msk.bf16.mxu1 %vm1118_vm0, %v9090_v3 }
 0x10a   : > { %7423 = vmatmul.mubr.msk.bf16.gmra.mrb[20].mxu0 %vm1118_vm0, %v8434_v10  ;;  %v9093_v10 = vld [vmem:[%s8671_s27 + $0x2b8] sm:$0xff]  }
 0x10b   : > { %7426 = vmatprep.mubr.msk.bf16.mxu0 %vm1118_vm0, %v8674_v4  ;;  %v9104_v4 = vld [vmem:[%s8671_s27 + $0x2c0] sm:$0xff]  }
 0x10c   : > { %7349 = vmatmul.mubr.msk.bf16.gmra.mrb[52].mxu1 %vm1118_vm0, %v9093_v10 }
 0x10d   : > { %7352 = vmatprep.mubr.msk.bf16.mxu1 %vm1118_vm0, %v9104_v4 }
 0x112   : > { %7427 = vmatmul.mubr.msk.bf16.gmra.mrb[24].mxu0 %vm1118_vm0, %v8685_v7  ;;  %v9107_v7 = vld [vmem:[%s8671_s27 + $0x2c8] sm:$0xff]  }
 0x113   : > { %7430 = vmatprep.mubr.msk.bf16.mxu0 %vm1118_vm0, %v8688_v8  ;;  %v9118_v8 = vld [vmem:[%s8671_s27 + $0x2d0] sm:$0xff]  }
 0x114   : > { %7353 = vmatmul.mubr.msk.bf16.gmra.mrb[56].mxu1 %vm1118_vm0, %v9107_v7 }
 0x115   : > { %7356 = vmatprep.mubr.msk.bf16.mxu1 %vm1118_vm0, %v9118_v8 }
 0x11a   : > { %7431 = vmatmul.mubr.msk.bf16.gmra.mrb[28].mxu0 %vm1118_vm0, %v8701_v11  ;;  %v9121_v11 = vld [vmem:[%s8671_s27 + $0x2d8] sm:$0xff]  }
 0x11b   : > { %7434 = vmatprep.mubr.msk.bf16.mxu0 %vm1118_vm0, %v8704_v12  ;;  %v9132_v12 = vld [vmem:[%s8671_s27 + $0x2e0] sm:$0xff]  }
 0x11c   : > { %7357 = vmatmul.mubr.msk.bf16.gmra.mrb[60].mxu1 %vm1118_vm0, %v9121_v11 }
 0x11d   : > { %7360 = vmatprep.mubr.msk.bf16.mxu1 %vm1118_vm0, %v9132_v12 }
 0x122   : > { %7435 = vmatmul.mubr.msk.bf16.gmra.mrb[32].mxu0 %vm1118_vm0, %v8711_v13  ;;  %v9135_v13 = vld [vmem:[%s8671_s27 + $0x2e8] sm:$0xff]  }
 0x123   : > { %7438 = vmatprep.mubr.msk.bf16.mxu0 %vm1118_vm0, %v8714_v14  ;;  %v9148_v14 = vld [vmem:[%s8671_s27 + $0x2f0] sm:$0xff]  }
 0x124   : > { %7361 = vmatmul.mubr.msk.bf16.gmra.mrb[64].mxu1 %vm1118_vm0, %v9135_v13 }
 0x125   : > { %7364 = vmatprep.mubr.msk.bf16.mxu1 %vm1118_vm0, %v9148_v14 }
 0x12a   : > { %7439 = vmatmul.mubr.msk.bf16.gmra.mrb[36].mxu0 %vm1118_vm0, %v8724_v16  ;;  %v8470_v16 = vld [vmem:[%s8671_s27 + $0x2f8] sm:$0xff]  }
 0x12b   : > { %7442 = vmatprep.mubr.msk.bf16.mxu0 %vm1118_vm0, %v8727_v17  ;;  %v8471_v17 = vld [vmem:[%s8671_s27 + $0x300] sm:$0xff]  }
 0x12c   : > { %7365 = vmatmul.mubr.msk.bf16.gmra.mrb[68].mxu1 %vm1118_vm0, %v8470_v16  ;;  %v8473_v16 = vld [vmem:[%s8671_s27 + $0x310] sm:$0xff]  }
 0x12d   : > { %7368 = vmatprep.mubr.msk.bf16.mxu1 %vm1118_vm0, %v8471_v17  ;;  %v8474_v17 = vld [vmem:[%s8671_s27 + $0x318] sm:$0xff]  }
 0x132   : > { %7443 = vmatmul.mubr.msk.bf16.gmra.mrb[40].mxu0 %vm1118_vm0, %v8737_v19  ;;  %v8472_v19 = vld [vmem:[%s8671_s27 + $0x308] sm:$0xff]  }
 0x133   : > { %7446 = vmatprep.mubr.msk.bf16.mxu0 %vm1118_vm0, %v8740_v20  ;;  %v6520_v20 = vld [vmem:[%s11094_s3 + $0x58] sm:$0xff] }
 0x134   : > { %7369 = vmatmul.mubr.msk.bf16.gmra.mrb[72].mxu1 %vm1118_vm0, %v8472_v19  ;;  %v8477_v19 = vld [vmem:[%s8671_s27 + $0x330] sm:$0xff]  }
 0x135   : > { %7372 = vmatprep.mubr.msk.bf16.mxu1 %vm1118_vm0, %v8473_v16 }
 0x13a   : > { %7447 = vmatmul.mubr.msk.bf16.gmra.mrb[44].mxu0 %vm1118_vm0, %v8747_v21  ;;  %v6521_v21 = vld [vmem:[%s11094_s3 + $0x60] sm:$0xff] }
 0x13b   : > { %7450 = vmatprep.mubr.msk.bf16.mxu0 %vm1118_vm0, %v8750_v22  ;;  %v9172_v22 = vpack.c.bf16 %v6521_v21, %v6520_v20  ;;  %v8478_v20 = vld [vmem:[%s8671_s27 + $0x338] sm:$0xff]   ;;  %v8480_v21 = vld [vmem:[%s8671_s27 + $0x348] sm:$0xff]  }
 0x13c   : > { %7373 = vmatmul.mubr.msk.bf16.gmra.mrb[76].mxu1 %vm1118_vm0, %v8474_v17  ;;  %v6526_v17 = vld [vmem:[%s11094_s3 + $0x88] sm:$0xff] }
 0x13d   : > { %7995 = vmatprep.subr.bf16.mxu1 %v9172_v22 }
 0x13e   : > { %7997 = vmatpush3.bf16.msra.mxu1 %v9172_v22 }
 0x142   : > { %7451 = vmatmul.mubr.msk.bf16.gmra.mrb[48].mxu0 %vm1118_vm0, %v8757_v23  ;;  %v8475_v23 = vld [vmem:[%s8671_s27 + $0x320] sm:$0xff]  }
 0x143   : > { %7454 = vmatprep.mubr.msk.bf16.mxu0 %vm1118_vm0, %v8760_v24  ;;  %v8476_v24 = vld [vmem:[%s8671_s27 + $0x328] sm:$0xff]   ;;  %7376 = vmatprep.mubr.msk.bf16.mxu1 %vm1118_vm0, %v8475_v23  ;;  %v6527_v23 = vld [vmem:[%s11094_s3 + $0x90] sm:$0xff] }
 0x144   : > { %7377 = vmatmul.mubr.msk.bf16.gmra.mrb[80].mxu1 %vm1118_vm0, %v8476_v24  ;;  %v9234_v24 = vpack.c.bf16 %v6527_v23, %v6526_v17 }
 0x145   : > { %7380 = vmatprep.mubr.msk.bf16.mxu1 %vm1118_vm0, %v8477_v19  ;;  %v8481_v19 = vld [vmem:[%s8671_s27 + $0x350] sm:$0xff]  }
 0x14a   : > { %7455 = vmatmul.mubr.msk.bf16.gmra.mrb[52].mxu0 %vm1118_vm0, %v8767_v25  ;;  %v6522_v25 = vld [vmem:[%s11094_s3 + $0x68] sm:$0xff] }
 0x14b   : > { %7458 = vmatprep.mubr.msk.bf16.mxu0 %vm1118_vm0, %v8770_v26  ;;  %v6523_v26 = vld [vmem:[%s11094_s3 + $0x70] sm:$0xff] }
 0x14c   : > { %7381 = vmatmul.mubr.msk.bf16.gmra.mrb[84].mxu1 %vm1118_vm0, %v8478_v20  ;;  %v8482_v20 = vld [vmem:[%s8671_s27 + $0x358] sm:$0xff]  }
 0x152   : > { %7459 = vmatmul.mubr.msk.bf16.gmra.mrb[56].mxu0 %vm1118_vm0, %v8777_v27  ;;  %v9206_v27 = vpack.c.bf16 %v6523_v26, %v6522_v25  ;;  %v6529_v25 = vld [vmem:[%s11094_s3 + $0xa0] sm:$0xff] }
 0x153   : > { %7462 = vmatprep.mubr.msk.bf16.mxu0 %vm1118_vm0, %v8780_v28  ;;  %v8479_v28 = vld [vmem:[%s8671_s27 + $0x340] sm:$0xff]  }
 0x154   : > { %7999 = vmatprep.subr.bf16.mxu1 %v9206_v27  ;;  %7384 = vmatprep.mubr.msk.bf16.mxu1 %vm1118_vm0, %v8479_v28 }
 0x155   : > { %8001 = vmatpush3.bf16.msra.mxu1 %v9206_v27 }
 0x156   : > { %7385 = vmatmul.mubr.msk.bf16.gmra.mrb[88].mxu1 %vm1118_vm0, %v8480_v21 }
 0x157   : > { %7388 = vmatprep.mubr.msk.bf16.mxu1 %vm1118_vm0, %v8481_v19 }
 0x15a   : > { %7463 = vmatmul.mubr.msk.bf16.gmra.mrb[60].mxu0 %vm1118_vm0, %v8787_v29  ;;  %v6524_v29 = vld [vmem:[%s11094_s3 + $0x78] sm:$0xff] }
 0x15b   : > { %7466 = vmatprep.mubr.msk.bf16.mxu0 %vm1118_vm0, %v8790_v30  ;;  %v6525_v30 = vld [vmem:[%s11094_s3 + $0x80] sm:$0xff] }
 0x15c   : > { %v9219_v16 = vpack.c.bf16 %v6525_v30, %v6524_v29 }
 0x15e   : > { %8003 = vmatprep.subr.bf16.mxu1 %v9219_v16  ;;  %7389 = vmatmul.mubr.msk.bf16.gmra.mrb[92].mxu1 %vm1118_vm0, %v8482_v20 }
 0x15f   : > { %8005 = vmatpush3.bf16.msra.mxu1 %v9219_v16 }
 0x160   : > { %8007 = vmatprep.subr.bf16.mxu1 %v9234_v24 }
 0x162   : > { %7467 = vmatmul.mubr.msk.bf16.gmra.mrb[64].mxu0 %vm1118_vm0, %v8797_v31  ;;  %v6528_v31 = vld [vmem:[%s11094_s3 + $0x98] sm:$0xff] }
 0x163   : > { %7470 = vmatprep.mubr.msk.bf16.mxu0 %vm1118_vm0, %v8800_v32  ;;  %8009 = vmatpush3.bf16.msra.mxu1 %v9234_v24  ;;  %v9247_v26 = vpack.c.bf16 %v6529_v25, %v6528_v31  ;;  %v9259_v32 = vld [vmem:[%s11094_s3 + $0xa8] sm:$0x1] }
 0x165   : > { %8011 = vmatprep.subr.bf16.mxu1 %v9247_v26 }
 0x167   : > { %8013 = vmatpush3.bf16.msra.mxu1 %v9247_v26 }
 0x168   : > { %7614 = vmatprep.subr.msk.mxu1 %vm3718_vm1, %v9259_v32 }
 0x16a   : > { %7471 = vmatmul.mubr.msk.bf16.gmra.mrb[68].mxu0 %vm1118_vm0, %v8807_v33 }
 0x16b   : > { %7474 = vmatprep.mubr.msk.bf16.mxu0 %vm1118_vm0, %v8810_v34  ;;  %7615 = vmatpush3.msk.msra.mxu1 %vm3718_vm1, %v9259_v32 }
 0x16c   : > { %8015 = vmatprep.subr.bf16.mxu1 %v9172_v22 }
 0x172   : > { %7475 = vmatmul.mubr.msk.bf16.gmra.mrb[72].mxu0 %vm1118_vm0, %v8817_v35 }
 0x173   : > { %7478 = vmatprep.mubr.msk.bf16.mxu0 %vm1118_vm0, %v8820_v36 }
 0x17a   : > { %7479 = vmatmul.mubr.msk.bf16.gmra.mrb[76].mxu0 %vm1118_vm0, %v8827_v37 }
 0x17b   : > { %7482 = vmatprep.mubr.msk.bf16.mxu0 %vm1118_vm0, %v8830_v38 }
 0x182   : > { %7483 = vmatmul.mubr.msk.bf16.gmra.mrb[80].mxu0 %vm1118_vm0, %v8837_v39 }
 0x183   : > { %7486 = vmatprep.mubr.msk.bf16.mxu0 %vm1118_vm0, %v8840_v40 }
 0x18a   : > { %7487 = vmatmul.mubr.msk.bf16.gmra.mrb[84].mxu0 %vm1118_vm0, %v8847_v41 }
 0x18b   : > { %7490 = vmatprep.mubr.msk.bf16.mxu0 %vm1118_vm0, %v8850_v42 }
 0x192   : > { %7491 = vmatmul.mubr.msk.bf16.gmra.mrb[88].mxu0 %vm1118_vm0, %v8857_v43 }
 0x193   : > { %7494 = vmatprep.mubr.msk.bf16.mxu0 %vm1118_vm0, %v8860_v44 }
 0x19a   : > { %7495 = vmatmul.mubr.msk.bf16.gmra.mrb[92].mxu0 %vm1118_vm0, %v8867_v45 }
 0x19b   : > { %7498 = vmatprep.mubr.msk.bf16.mxu0 %vm1118_vm0, %v8870_v46 }
 0x1a2   : > { %7499 = vmatmul.mubr.msk.bf16.gmra.mrb[96].mxu0 %vm1118_vm0, %v8887_v49 }
 0x1a3   : > { %7502 = vmatprep.mubr.msk.bf16.mxu0 %vm1118_vm0, %v8890_v50 }
 0x1aa   : > { %7503 = vmatmul.mubr.msk.bf16.gmra.mrb[100].mxu0 %vm1118_vm0, %v8907_v53 }
 0x1ab   : > { %7506 = vmatprep.mubr.msk.bf16.mxu0 %vm1118_vm0, %v8910_v54 }
 0x1b2   : > { %7507 = vmatmul.mubr.msk.bf16.gmra.mrb[104].mxu0 %vm1118_vm0, %v8927_v57 }
 0x1b3   : > { %7510 = vmatprep.mubr.msk.bf16.mxu0 %vm1118_vm0, %v8930_v58 }
 0x1b5   : > { %v7404_v33 = vpop.f32.mrb[0].mxu0 }
 0x1b6   : > { %v2368_v34 = vpop.f32.mrb[1].mxu0 }
 0x1b7   : > { %v7405_v35 = vpop.f32.mrb[2].mxu0 }
 0x1b8   : > { %v2371_v36 = vpop.f32.mrb[3].mxu0 }
 0x1ba   : > { %7511 = vmatmul.mubr.msk.bf16.gmra.mrb[108].mxu0 %vm1118_vm0, %v8947_v61 }
 0x1bb   : > { %7514 = vmatprep.mubr.msk.bf16.mxu0 %vm1118_vm0, %v8950_v62  ;;  %v9365_v62 = vld [vmem:[%s11093_s2] ss:$0 sm:$0xff] }
 0x1bc   : > { %v3138_v29 = vadd.f32 %v7405_v35, %v9365_v62 }
 0x1bd   : > { %v9306_v37 = vpop.f32.mrb[4].mxu0 }
 0x1be   : > { %v9308_v38 = vpop.f32.mrb[5].mxu0 }
 0x1bf   : > { %v9310_v39 = vpop.f32.mrb[6].mxu0 }
 0x1c0   : > { %v9312_v40 = vpop.f32.mrb[7].mxu0 }
 0x1c2   : > { %7515 = vmatmul.mubr.msk.bf16.gmra.mrb[112].mxu0 %vm1118_vm0, %v8967_v1  ;;  %v3137_v1 = vadd.f32 %v7404_v33, %v9365_v62 }
 0x1c3   : > { %7518 = vmatprep.mubr.msk.bf16.mxu0 %vm1118_vm0, %v8970_v2 }
 0x1c4   : > { %v3329_v31 = vmax.f32 %v3137_v1, 0.0 }
 0x1c5   : > { %v9318_v41 = vpop.f32.mrb[8].mxu0 }
 0x1c6   : > { %v9320_v42 = vpop.f32.mrb[9].mxu0 }
 0x1c7   : > { %v9322_v43 = vpop.f32.mrb[10].mxu0 }
 0x1c8   : > { %v9324_v44 = vpop.f32.mrb[11].mxu0 }
 0x1ca   : > { %7519 = vmatmul.mubr.msk.bf16.gmra.mrb[116].mxu0 %vm1118_vm0, %v8987_v6  ;;  %v3135_v6 = vadd.f32 %v9365_v62, %v2368_v34 }
 0x1cb   : > { %7522 = vmatprep.mubr.msk.bf16.mxu0 %vm1118_vm0, %v8875_v47 }
 0x1cc   : > { %v3327_v35 = vmax.f32 %v3135_v6, 0.0 }
 0x1cd   : > { %v9330_v45 = vpop.f32.mrb[12].mxu0 }
 0x1ce   : > { %v9332_v46 = vpop.f32.mrb[13].mxu0 }
 0x1cf   : > { %v9334_v49 = vpop.f32.mrb[14].mxu0 }
 0x1d0   : > { %v9336_v50 = vpop.f32.mrb[15].mxu0 }
 0x1d2   : > { %7523 = vmatmul.mubr.msk.bf16.gmra.mrb[120].mxu0 %vm1118_vm0, %v8878_v48 }
 0x1d3   : > { %7526 = vmatprep.mubr.msk.bf16.mxu0 %vm1118_vm0, %v8895_v51 }
 0x1d5   : > { %v9342_v53 = vpop.f32.mrb[16].mxu0 }
 0x1d6   : > { %v9344_v54 = vpop.f32.mrb[17].mxu0 }
 0x1d7   : > { %v9346_v57 = vpop.f32.mrb[18].mxu0 }
 0x1d8   : > { %v9348_v47 = vpop.f32.mrb[19].mxu0 }
 0x1da   : > { %7527 = vmatmul.mubr.msk.bf16.gmra.mrb[124].mxu0 %vm1118_vm0, %v8898_v52  ;;  %v9369_v52 = vpop.f32.mrb[0].mxu1 }
 0x1db   : > { %7530 = vmatprep.mubr.msk.bf16.mxu0 %vm1118_vm0, %v8915_v55  ;;  %11128 = vst [vmem:[#allocation14_spill] sm:$0xff] %v9369_v52  ;;  %v9373_v55 = vpop.f32.mrb[1].mxu1 }
 0x1dc   : > { %11129 = vst [vmem:[#allocation15_spill] sm:$0xff] %v9373_v55  ;;  %v9376_v2 = vpop.f32.mrb[2].mxu1 }
 0x1dd   : > { %v9354_v58 = vpop.f32.mrb[20].mxu0  ;;  %11130 = vst [vmem:[#allocation16_spill] sm:$0xff] %v9376_v2  ;;  %v9379_v21 = vpop.f32.mrb[3].mxu1 }
 0x1de   : > { %v9356_v48 = vpop.f32.mrb[21].mxu0  ;;  %11131 = vst [vmem:[#allocation17_spill] sm:$0xff] %v9379_v21  ;;  %v9383_v17 = vpop.f32.mrb[4].mxu1 }
 0x1df   : > { %v9358_v61 = vpop.f32.mrb[22].mxu0  ;;  %11132 = vst [vmem:[#allocation18_spill] sm:$0xff] %v9383_v17  ;;  %v9387_v20 = vpop.f32.mrb[5].mxu1  ;;  %v3330_v17 = vmax.f32 %v3138_v29, 0.0 }
 0x1e0   : > { %v9360_v51 = vpop.f32.mrb[23].mxu0  ;;  %v9390_v21 = vpop.f32.mrb[6].mxu1 }
 0x1e1   : > { %v9393_v55 = vpop.f32.mrb[7].mxu1 }
 0x1e2   : > { %7531 = vmatmul.mubr.msk.bf16.gmra.mrb[128].mxu0 %vm1118_vm0, %v8918_v56  ;;  %v9397_v1 = vpop.f32.mrb[8].mxu1 }
 0x1e3   : > { %7534 = vmatprep.mubr.msk.bf16.mxu0 %vm1118_vm0, %v8935_v59  ;;  %v3136_v59 = vadd.f32 %v9365_v62, %v2371_v36  ;;  %v9401_v6 = vpop.f32.mrb[9].mxu1 }
 0x1e5   : > { %v7428_v28 = vpop.f32.mrb[24].mxu0 }
 0x1e6   : > { %v3161_v56 = vadd.f32 %v7428_v28, %v9365_v62  ;;  %v2464_v30 = vpop.f32.mrb[25].mxu0 }
 0x1e7   : > { %v3159_v23 = vadd.f32 %v9365_v62, %v2464_v30  ;;  %v7429_v19 = vpop.f32.mrb[26].mxu0 }
 0x1e8   : > { %v3353_v25 = vmax.f32 %v3161_v56, 0.0  ;;  %v3162_v33 = vadd.f32 %v7429_v19, %v9365_v62  ;;  %v2467_v34 = vpop.f32.mrb[27].mxu0  ;;  %v3328_v56 = vmax.f32 %v3136_v59, 0.0 }
 0x1e9   : > { %v3351_v2 = vmax.f32 %v3159_v23, 0.0  ;;  %v3160_v28 = vadd.f32 %v9365_v62, %v2467_v34  ;;  %v3141_v23 = vadd.f32 %v9306_v37, %v9365_v62  ;;  %v3140_v37 = vadd.f32 %v9365_v62, %v9312_v40 }
 0x1ea   : > { %v3521_v36 = vmax.f32 %v3329_v31, %v3353_v25  ;;  %v3354_v52 = vmax.f32 %v3162_v33, 0.0  ;;  %7535 = vmatmul.mubr.msk.bf16.gmra.mrb[132].mxu0 %vm1118_vm0, %v8938_v60  ;;  %v9405_v31 = vpop.f32.mrb[10].mxu1  ;;  %v3139_v60 = vadd.f32 %v9365_v62, %v9308_v38 }
 0x1eb   : > { %v3519_v30 = vmax.f32 %v3327_v35, %v3351_v2  ;;  %v3352_v19 = vmax.f32 %v3160_v28, 0.0  ;;  %7538 = vmatprep.mubr.msk.bf16.mxu0 %vm1118_vm0, %v8955_v63  ;;  %v9410_v2 = vpop.f32.mrb[11].mxu1  ;;  %v3142_v63 = vadd.f32 %v9310_v39, %v9365_v62  ;;  %v3333_v28 = vmax.f32 %v3141_v23, 0.0 }
 0x1ec   : > { %v3522_v29 = vmax.f32 %v3330_v17, %v3354_v52  ;;  %11133 = vst [vmem:[#allocation19_spill] sm:$0xff] %v9410_v2  ;;  %v9415_v35 = vpop.f32.mrb[12].mxu1 }
 0x1ed   : > { %v3520_v25 = vmax.f32 %v3328_v56, %v3352_v19  ;;  %v7432_v33 = vpop.f32.mrb[28].mxu0  ;;  %7616 = vmatprep.mubr.msk.f32.mxu1 %vm3645_vm2, %v3519_v30  ;;  %11134 = vst [vmem:[#allocation20_spill] sm:$0xff] %v9415_v35  ;;  %v9421_v17 = vpop.f32.mrb[13].mxu1 }
 0x1ee   : > { %v3165_v59 = vadd.f32 %v7432_v33, %v9365_v62  ;;  %v2480_v34 = vpop.f32.mrb[29].mxu0  ;;  %11135 = vst [vmem:[#allocation21_spill] sm:$0xff] %v9421_v17  ;;  %v9425_v19 = vpop.f32.mrb[14].mxu1  ;;  %v3331_v33 = vmax.f32 %v3139_v60, 0.0  ;;  %v11137_v17 = vld [vmem:[#allocation2_spill] sm:$0xff] }
 0x1ef   : > { %v3163_v52 = vadd.f32 %v9365_v62, %v2480_v34  ;;  %v7433_v38 = vpop.f32.mrb[30].mxu0  ;;  %7617 = vmatmul.mubr.msk.f32.vlgmr.msra.gmra.mrb[96].mxu1 %vm3645_vm2, %v3520_v25  ;;  %11136 = vst [vmem:[#allocation22_spill] sm:$0xff] %v9425_v19  ;;  %v9429_v35 = vpop.f32.mrb[15].mxu1  ;;  %v3334_v25 = vmax.f32 %v3142_v63, 0.0  ;;  %v3145_v63 = vadd.f32 %v9318_v41, %v9365_v62 }
 0x1f0   : > { %v3357_v56 = vmax.f32 %v3165_v59, 0.0  ;;  %v3166_v30 = vadd.f32 %v7433_v38, %v9365_v62  ;;  %v2483_v39 = vpop.f32.mrb[31].mxu0  ;;  %7619 = vmatprep.mubr.msk.f32.mxu1 %vm3645_vm2, %v3521_v36  ;;  %8017 = vmatpush3.bf16.msra.mxu1 %v9172_v22  ;;  %v9434_v38 = vpop.f32.mrb[16].mxu1  ;;  %v3332_v36 = vmax.f32 %v3140_v37, 0.0  ;;  %v11138_v22 = vld [vmem:[#allocation3_spill] sm:$0xff]  ;;  %v3143_v37 = vadd.f32 %v9365_v62, %v9320_v42 }
 0x1f1   : > { %v3355_v40 = vmax.f32 %v3163_v52, 0.0  ;;  %v3164_v34 = vadd.f32 %v9365_v62, %v2483_v39  ;;  %8019 = vmatprep.subr.bf16.mxu1 %v9206_v27  ;;  %v9439_v60 = vpop.f32.mrb[17].mxu1 }
 0x1f2   : > { %v3525_v23 = vmax.f32 %v3333_v28, %v3357_v56  ;;  %v3358_v59 = vmax.f32 %v3166_v30, 0.0  ;;  %7539 = vmatmul.mubr.msk.bf16.gmra.mrb[136].mxu0 %vm1118_vm0, %v11137_v17  ;;  %v9443_v28 = vpop.f32.mrb[18].mxu1  ;;  %v3146_v30 = vadd.f32 %v9322_v43, %v9365_v62 }
 0x1f3   : > { %v3523_v19 = vmax.f32 %v3331_v33, %v3355_v40  ;;  %v3356_v2 = vmax.f32 %v3164_v34, 0.0  ;;  %7620 = vmatmul.mubr.msk.f32.gmra.mrb[98].mxu1 %vm3645_vm2, %v3522_v29  ;;  %7542 = vmatprep.mubr.msk.bf16.mxu0 %vm1118_vm0, %v11138_v22  ;;  %v9449_v29 = vpop.f32.mrb[19].mxu1  ;;  %v3337_v40 = vmax.f32 %v3145_v63, 0.0 }
 0x1f4   : > { %v3526_v52 = vmax.f32 %v3334_v25, %v3358_v59  ;;  %8021 = vmatpush3.bf16.msra.mxu1 %v9206_v27  ;;  %v9455_v33 = vpop.f32.mrb[20].mxu1  ;;  %v3144_v27 = vadd.f32 %v9365_v62, %v9324_v44 }
 0x1f5   : > { %v3524_v17 = vmax.f32 %v3332_v36, %v3356_v2  ;;  %v7436_v56 = vpop.f32.mrb[32].mxu0  ;;  %7622 = vmatprep.mubr.msk.f32.mxu1 %vm3645_vm2, %v3523_v19  ;;  %8023 = vmatprep.subr.bf16.mxu1 %v9219_v16  ;;  %v9461_v19 = vpop.f32.mrb[21].mxu1  ;;  %v3335_v36 = vmax.f32 %v3143_v37, 0.0 }
 0x1f6   : > { %v3169_v41 = vadd.f32 %v7436_v56, %v9365_v62  ;;  %v2496_v39 = vpop.f32.mrb[33].mxu0  ;;  %11139 = vst [vmem:[#allocation2_spill] sm:$0xff] %v9461_v19  ;;  %v9465_v59 = vpop.f32.mrb[22].mxu1 }
 0x1f7   : > { %v3167_v42 = vadd.f32 %v9365_v62, %v2496_v39  ;;  %v7437_v2 = vpop.f32.mrb[34].mxu0  ;;  %7623 = vmatmul.mubr.msk.f32.gmra.mrb[100].mxu1 %vm3645_vm2, %v3524_v17  ;;  %11140 = vst [vmem:[#allocation3_spill] sm:$0xff] %v9465_v59  ;;  %v9469_v56 = vpop.f32.mrb[23].mxu1  ;;  %v3338_v17 = vmax.f32 %v3146_v30, 0.0  ;;  %v11141_v39 = vld [vmem:[#allocation4_spill] sm:$0xff]  ;;  %v3149_v30 = vadd.f32 %v9330_v45, %v9365_v62 }
 0x1f8   : > { %v3361_v34 = vmax.f32 %v3169_v41, 0.0  ;;  %v3170_v25 = vadd.f32 %v7437_v2, %v9365_v62  ;;  %v2499_v43 = vpop.f32.mrb[35].mxu0  ;;  %7625 = vmatprep.mubr.msk.f32.mxu1 %vm3645_vm2, %v3525_v23  ;;  %8025 = vmatpush3.bf16.msra.mxu1 %v9219_v16  ;;  %v9474_v2 = vpop.f32.mrb[24].mxu1  ;;  %v3336_v23 = vmax.f32 %v3144_v27, 0.0  ;;  %v11142_v16 = vld [vmem:[#allocation5_spill] sm:$0xff]  ;;  %v3147_v27 = vadd.f32 %v9365_v62, %v9332_v46 }
 0x1f9   : > { %v3359_v44 = vmax.f32 %v3167_v42, 0.0  ;;  %v3168_v22 = vadd.f32 %v9365_v62, %v2499_v43  ;;  %8027 = vmatprep.subr.bf16.mxu1 %v9234_v24  ;;  %v9479_v37 = vpop.f32.mrb[25].mxu1  ;;  %v3150_v43 = vadd.f32 %v9334_v49, %v9365_v62 }
 0x1fa   : > { %v3529_v63 = vmax.f32 %v3337_v40, %v3361_v34  ;;  %v3362_v41 = vmax.f32 %v3170_v25, 0.0  ;;  %7543 = vmatmul.mubr.msk.bf16.gmra.mrb[140].mxu0 %vm1118_vm0, %v11141_v39  ;;  %v9483_v40 = vpop.f32.mrb[26].mxu1 }
 0x1fb   : > { %v3527_v59 = vmax.f32 %v3335_v36, %v3359_v44  ;;  %v3360_v19 = vmax.f32 %v3168_v22, 0.0  ;;  %7626 = vmatmul.mubr.msk.f32.gmra.mrb[102].mxu1 %vm3645_vm2, %v3526_v52  ;;  %7546 = vmatprep.mubr.msk.bf16.mxu0 %vm1118_vm0, %v11142_v16  ;;  %v9489_v52 = vpop.f32.mrb[27].mxu1  ;;  %v3341_v22 = vmax.f32 %v3149_v30, 0.0  ;;  %v3342_v30 = vmax.f32 %v3150_v43, 0.0 }
 0x1fc   : > { %v3530_v42 = vmax.f32 %v3338_v17, %v3362_v41  ;;  %8029 = vmatpush3.bf16.msra.mxu1 %v9234_v24  ;;  %v9495_v44 = vpop.f32.mrb[28].mxu1  ;;  %v3148_v24 = vadd.f32 %v9365_v62, %v9336_v50  ;;  %v3153_v43 = vadd.f32 %v9342_v53, %v9365_v62 }
 0x1fd   : > { %v3528_v34 = vmax.f32 %v3336_v23, %v3360_v19  ;;  %v7440_v25 = vpop.f32.mrb[36].mxu0  ;;  %7628 = vmatprep.mubr.msk.f32.mxu1 %vm3645_vm2, %v3527_v59  ;;  %8031 = vmatprep.subr.bf16.mxu1 %v9247_v26  ;;  %v9501_v59 = vpop.f32.mrb[29].mxu1  ;;  %v3339_v23 = vmax.f32 %v3147_v27, 0.0  ;;  %v11147_v27 = vld [vmem:[#allocation7_spill] sm:$0xff] }
 0x1fe   : > { %v3173_v45 = vadd.f32 %v7440_v25, %v9365_v62  ;;  %v2512_v36 = vpop.f32.mrb[37].mxu0  ;;  %v9505_v39 = vpop.f32.mrb[30].mxu1 }
 0x1ff   : > { %v3171_v46 = vadd.f32 %v9365_v62, %v2512_v36  ;;  %v7441_v19 = vpop.f32.mrb[38].mxu0  ;;  %7629 = vmatmul.mubr.msk.f32.gmra.mrb[104].mxu1 %vm3645_vm2, %v3528_v34  ;;  %11143 = vst [vmem:[#allocation4_spill] sm:$0xff] %v9505_v39  ;;  %v9509_v25 = vpop.f32.mrb[31].mxu1  ;;  %v11145_v36 = vld [vmem:[#allocation6_spill] sm:$0xff] }
 0x200   : > { %v3365_v17 = vmax.f32 %v3173_v45, 0.0  ;;  %v3174_v41 = vadd.f32 %v7441_v19, %v9365_v62  ;;  %v2515_v49 = vpop.f32.mrb[39].mxu0  ;;  %7631 = vmatprep.mubr.msk.f32.mxu1 %vm3645_vm2, %v3529_v63  ;;  %8033 = vmatpush3.bf16.msra.mxu1 %v9247_v26  ;;  %11144 = vst [vmem:[#allocation5_spill] sm:$0xff] %v9509_v25  ;;  %v9515_v63 = vpop.f32.mrb[32].mxu1  ;;  %v3340_v19 = vmax.f32 %v3148_v24, 0.0  ;;  %v3151_v24 = vadd.f32 %v9365_v62, %v9344_v54 }
 0x201   : > { %v3363_v50 = vmax.f32 %v3171_v46, 0.0  ;;  %v3172_v16 = vadd.f32 %v9365_v62, %v2515_v49  ;;  %7672 = vmatprep.subr.msk.mxu1 %vm3718_vm1, %v9259_v32  ;;  %11146 = vst [vmem:[#allocation6_spill] sm:$0xff] %v9515_v63  ;;  %v9520_v46 = vpop.f32.mrb[33].mxu1 }
 0x202   : > { %v3533_v34 = vmax.f32 %v3341_v22, %v3365_v17  ;;  %v3366_v45 = vmax.f32 %v3174_v41, 0.0  ;;  %7547 = vmatmul.mubr.msk.bf16.gmra.mrb[144].mxu0 %vm1118_vm0, %v11145_v36  ;;  %11148 = vst [vmem:[#allocation7_spill] sm:$0xff] %v9520_v46  ;;  %v9524_v17 = vpop.f32.mrb[34].mxu1 }
 0x203   : > { %v3531_v39 = vmax.f32 %v3339_v23, %v3363_v50  ;;  %v3364_v26 = vmax.f32 %v3172_v16, 0.0  ;;  %7632 = vmatmul.mubr.msk.f32.gmra.mrb[106].mxu1 %vm3645_vm2, %v3530_v42  ;;  %7550 = vmatprep.mubr.msk.bf16.mxu0 %vm1118_vm0, %v11147_v27  ;;  %11149 = vst [vmem:[#allocation23_spill] sm:$0xff] %v9524_v17  ;;  %v9531_v42 = vpop.f32.mrb[35].mxu1  ;;  %v3154_v23 = vadd.f32 %v9346_v57, %v9365_v62  ;;  %v3343_v27 = vmax.f32 %v3151_v24, 0.0  ;;  %v11155_v17 = vld [vmem:[#allocation8_spill] sm:$0xff] }
 0x204   : > { %v3534_v22 = vmax.f32 %v3342_v30, %v3366_v45  ;;  %7673 = vmatpush3.msk.msra.mxu1 %vm3718_vm1, %v9259_v32  ;;  %11150 = vst [vmem:[#allocation24_spill] sm:$0xff] %v9531_v42  ;;  %v9536_v16 = vpop.f32.mrb[36].mxu1  ;;  %v3152_v32 = vadd.f32 %v9365_v62, %v9348_v47 }
 0x205   : > { %v3532_v41 = vmax.f32 %v3340_v19, %v3364_v26  ;;  %v7444_v49 = vpop.f32.mrb[40].mxu0  ;;  %7634 = vmatprep.mubr.msk.f32.mxu1 %vm3645_vm2, %v3531_v39  ;;  %11151 = vst [vmem:[#allocation25_spill] sm:$0xff] %v9536_v16  ;;  %v9542_v45 = vpop.f32.mrb[37].mxu1  ;;  %v3345_v39 = vmax.f32 %v3153_v43, 0.0 }
 0x206   : > { %v3177_v53 = vadd.f32 %v7444_v49, %v9365_v62  ;;  %v2528_v50 = vpop.f32.mrb[41].mxu0  ;;  %11152 = vst [vmem:[#allocation26_spill] sm:$0xff] %v9542_v45  ;;  %v9546_v26 = vpop.f32.mrb[38].mxu1 }
 0x207   : > { %v3175_v30 = vadd.f32 %v9365_v62, %v2528_v50  ;;  %v7445_v54 = vpop.f32.mrb[42].mxu0  ;;  %7635 = vmatmul.mubr.msk.f32.gmra.mrb[108].mxu1 %vm3645_vm2, %v3532_v41  ;;  %11153 = vst [vmem:[#allocation27_spill] sm:$0xff] %v9546_v26  ;;  %v9549_v16 = vpop.f32.mrb[39].mxu1  ;;  %v3346_v50 = vmax.f32 %v3154_v23, 0.0  ;;  %v3157_v23 = vadd.f32 %v9354_v58, %v9365_v62  ;;  %v3156_v58 = vadd.f32 %v9365_v62, %v9360_v51 }
 0x208   : > { %v3369_v36 = vmax.f32 %v3177_v53, 0.0  ;;  %v3178_v19 = vadd.f32 %v7445_v54, %v9365_v62  ;;  %v2531_v57 = vpop.f32.mrb[43].mxu0  ;;  %7637 = vmatprep.mubr.msk.f32.mxu1 %vm3645_vm2, %v3533_v34  ;;  %11154 = vst [vmem:[#allocation28_spill] sm:$0xff] %v9549_v16  ;;  %v9553_v43 = vpop.f32.mrb[40].mxu1  ;;  %v3344_v53 = vmax.f32 %v3152_v32, 0.0  ;;  %v11157_v34 = vld [vmem:[#allocation9_spill] sm:$0xff] }
 0x209   : > { %v3367_v49 = vmax.f32 %v3175_v30, 0.0  ;;  %v3176_v47 = vadd.f32 %v9365_v62, %v2531_v57  ;;  %11156 = vst [vmem:[#allocation8_spill] sm:$0xff] %v9553_v43  ;;  %v9558_v24 = vpop.f32.mrb[41].mxu1 }
 0x20a   : > { %v3537_v42 = vmax.f32 %v3345_v39, %v3369_v36  ;;  %v3370_v41 = vmax.f32 %v3178_v19, 0.0  ;;  %7551 = vmatmul.mubr.msk.bf16.gmra.mrb[148].mxu0 %vm1118_vm0, %v11155_v17  ;;  %11158 = vst [vmem:[#allocation9_spill] sm:$0xff] %v9558_v24  ;;  %v9562_v39 = vpop.f32.mrb[42].mxu1  ;;  %v3155_v17 = vadd.f32 %v9365_v62, %v9356_v48 }
 0x20b   : > { %v3535_v54 = vmax.f32 %v3343_v27, %v3367_v49  ;;  %v3368_v45 = vmax.f32 %v3176_v47, 0.0  ;;  %7638 = vmatmul.mubr.msk.f32.gmra.mrb[110].mxu1 %vm3645_vm2, %v3534_v22  ;;  %7554 = vmatprep.mubr.msk.bf16.mxu0 %vm1118_vm0, %v11157_v34  ;;  %11159 = vst [vmem:[#allocation29_spill] sm:$0xff] %v9562_v39  ;;  %v9567_v19 = vpop.f32.mrb[43].mxu1  ;;  %v3158_v22 = vadd.f32 %v9358_v61, %v9365_v62  ;;  %v11165_v39 = vld [vmem:[#allocation10_spill] sm:$0xff] }
 0x20c   : > { %v3538_v30 = vmax.f32 %v3346_v50, %v3370_v41  ;;  %11160 = vst [vmem:[#allocation30_spill] sm:$0xff] %v9567_v19  ;;  %v9572_v49 = vpop.f32.mrb[44].mxu1  ;;  %v3349_v50 = vmax.f32 %v3157_v23, 0.0  ;;  %v3347_v34 = vmax.f32 %v3155_v17, 0.0 }
 0x20d   : > { %v3536_v36 = vmax.f32 %v3344_v53, %v3368_v45  ;;  %v7448_v32 = vpop.f32.mrb[44].mxu0  ;;  %7640 = vmatprep.mubr.msk.f32.mxu1 %vm3645_vm2, %v3535_v54  ;;  %11161 = vst [vmem:[#allocation31_spill] sm:$0xff] %v9572_v49  ;;  %v9578_v45 = vpop.f32.mrb[45].mxu1 }
 0x20e   : > { %v3181_v57 = vadd.f32 %v7448_v32, %v9365_v62  ;;  %v2544_v27 = vpop.f32.mrb[45].mxu0  ;;  %11162 = vst [vmem:[#allocation32_spill] sm:$0xff] %v9578_v45  ;;  %v9582_v54 = vpop.f32.mrb[46].mxu1 }
 0x20f   : > { %v3179_v47 = vadd.f32 %v9365_v62, %v2544_v27  ;;  %v7449_v48 = vpop.f32.mrb[46].mxu0  ;;  %7641 = vmatmul.mubr.msk.f32.gmra.mrb[112].mxu1 %vm3645_vm2, %v3536_v36  ;;  %11163 = vst [vmem:[#allocation33_spill] sm:$0xff] %v9582_v54  ;;  %v9585_v49 = vpop.f32.mrb[47].mxu1  ;;  %v3350_v27 = vmax.f32 %v3158_v22, 0.0 }
 0x210   : > { %v3373_v41 = vmax.f32 %v3181_v57, 0.0  ;;  %v3182_v53 = vadd.f32 %v7449_v48, %v9365_v62  ;;  %v2547_v61 = vpop.f32.mrb[47].mxu0  ;;  %7643 = vmatprep.mubr.msk.f32.mxu1 %vm3645_vm2, %v3537_v42  ;;  %11164 = vst [vmem:[#allocation34_spill] sm:$0xff] %v9585_v49  ;;  %v9589_v23 = vpop.f32.mrb[48].mxu1  ;;  %v3348_v57 = vmax.f32 %v3156_v58, 0.0  ;;  %v11167_v42 = vld [vmem:[#allocation11_spill] sm:$0xff] }
 0x211   : > { %v3371_v32 = vmax.f32 %v3179_v47, 0.0  ;;  %v3180_v51 = vadd.f32 %v9365_v62, %v2547_v61  ;;  %11166 = vst [vmem:[#allocation10_spill] sm:$0xff] %v9589_v23  ;;  %v9594_v17 = vpop.f32.mrb[49].mxu1 }
 0x212   : > { %v3541_v19 = vmax.f32 %v3349_v50, %v3373_v41  ;;  %v3374_v36 = vmax.f32 %v3182_v53, 0.0  ;;  %7555 = vmatmul.mubr.msk.bf16.gmra.mrb[152].mxu0 %vm1118_vm0, %v11165_v39  ;;  %11168 = vst [vmem:[#allocation11_spill] sm:$0xff] %v9594_v17  ;;  %v9596_v61 = vpop.f32.mrb[50].mxu1 }
 0x213   : > { %v3539_v48 = vmax.f32 %v3347_v34, %v3371_v32  ;;  %v3372_v45 = vmax.f32 %v3180_v51, 0.0  ;;  %7644 = vmatmul.mubr.msk.f32.gmra.mrb[114].mxu1 %vm3645_vm2, %v3538_v30  ;;  %7558 = vmatprep.mubr.msk.bf16.mxu0 %vm1118_vm0, %v11167_v42  ;;  %11169 = vst [vmem:[#allocation35_spill] sm:$0xff] %v9596_v61  ;;  %v9601_v39 = vpop.f32.mrb[51].mxu1  ;;  %v11175_v51 = vld [vmem:[#allocation12_spill] sm:$0xff] }
 0x214   : > { %v3542_v47 = vmax.f32 %v3350_v27, %v3374_v36  ;;  %11170 = vst [vmem:[#allocation36_spill] sm:$0xff] %v9601_v39  ;;  %v9605_v41 = vpop.f32.mrb[52].mxu1 }
 0x215   : > { %v3540_v22 = vmax.f32 %v3348_v57, %v3372_v45  ;;  %v9598_v50 = vpop.f32.mrb[48].mxu0  ;;  %7646 = vmatprep.mubr.msk.f32.mxu1 %vm3645_vm2, %v3539_v48  ;;  %11171 = vst [vmem:[#allocation37_spill] sm:$0xff] %v9605_v41  ;;  %v9610_v53 = vpop.f32.mrb[53].mxu1 }
 0x216   : > { %v9603_v58 = vpop.f32.mrb[49].mxu0  ;;  %11172 = vst [vmem:[#allocation38_spill] sm:$0xff] %v9610_v53  ;;  %v9615_v45 = vpop.f32.mrb[54].mxu1 }
 0x217   : > { %v9607_v30 = vpop.f32.mrb[50].mxu0  ;;  %7647 = vmatmul.mubr.msk.f32.gmra.mrb[116].mxu1 %vm3645_vm2, %v3540_v22  ;;  %11173 = vst [vmem:[#allocation39_spill] sm:$0xff] %v9615_v45  ;;  %v9617_v32 = vpop.f32.mrb[55].mxu1 }
 0x218   : > { %v9612_v34 = vpop.f32.mrb[51].mxu0  ;;  %7649 = vmatprep.mubr.msk.f32.mxu1 %vm3645_vm2, %v3541_v19  ;;  %11174 = vst [vmem:[#allocation40_spill] sm:$0xff] %v9617_v32  ;;  %v9621_v27 = vpop.f32.mrb[56].mxu1 }
 0x219   : > { %11176 = vst [vmem:[#allocation12_spill] sm:$0xff] %v9621_v27  ;;  %v9626_v36 = vpop.f32.mrb[57].mxu1 }
 0x21a   : > { %7559 = vmatmul.mubr.msk.bf16.gmra.mrb[156].mxu0 %vm1118_vm0, %v11175_v51  ;;  %11177 = vst [vmem:[#allocation41_spill] sm:$0xff] %v9626_v36  ;;  %v9628_v57 = vpop.f32.mrb[58].mxu1  ;;  %v11184_v36 = vld [vmem:[#allocation13_spill] sm:$0xff] }
 0x21b   : > { %7650 = vmatmul.mubr.msk.f32.gmra.mrb[118].mxu1 %vm3645_vm2, %v3542_v47  ;;  %7562 = vmatprep.mubr.msk.bf16.mxu0 %vm1118_vm0, %v9049_v5  ;;  %11178 = vst [vmem:[#allocation42_spill] sm:$0xff] %v9628_v57  ;;  %v9632_v19 = vpop.f32.mrb[59].mxu1 }
 0x21c   : > { %11179 = vst [vmem:[#allocation43_spill] sm:$0xff] %v9632_v19  ;;  %v9636_v22 = vpop.f32.mrb[60].mxu1 }
 0x21d   : > { %v9630_v48 = vpop.f32.mrb[52].mxu0  ;;  %11180 = vst [vmem:[#allocation44_spill] sm:$0xff] %v9636_v22  ;;  %v9640_v27 = vpop.f32.mrb[61].mxu1 }
 0x21e   : > { %v9634_v42 = vpop.f32.mrb[53].mxu0  ;;  %11181 = vst [vmem:[#allocation45_spill] sm:$0xff] %v9640_v27  ;;  %v9644_v32 = vpop.f32.mrb[62].mxu1 }
 0x21f   : > { %v9638_v51 = vpop.f32.mrb[54].mxu0  ;;  %11182 = vst [vmem:[#allocation46_spill] sm:$0xff] %v9644_v32  ;;  %v9646_v5 = vpop.f32.mrb[63].mxu1 }
 0x220   : > { %v9642_v47 = vpop.f32.mrb[55].mxu0  ;;  %11183 = vst [vmem:[#allocation47_spill] sm:$0xff] %v9646_v5  ;;  %v9650_v57 = vpop.f32.mrb[64].mxu1 }
 0x221   : > { %11185 = vst [vmem:[#allocation13_spill] sm:$0xff] %v9650_v57  ;;  %v9654_v19 = vpop.f32.mrb[65].mxu1 }
 0x222   : > { %7563 = vmatmul.mubr.msk.bf16.gmra.mrb[160].mxu0 %vm1118_vm0, %v11184_v36  ;;  %11186 = vst [vmem:[#allocation48_spill] sm:$0xff] %v9654_v19  ;;  %v9656_v22 = vpop.f32.mrb[66].mxu1 }
 0x223   : > { %7566 = vmatprep.mubr.msk.bf16.mxu0 %vm1118_vm0, %v9063_v15  ;;  %11187 = vst [vmem:[#allocation49_spill] sm:$0xff] %v9656_v22  ;;  %v9660_v27 = vpop.f32.mrb[67].mxu1 }
 0x224   : > { %11188 = vst [vmem:[#allocation50_spill] sm:$0xff] %v9660_v27  ;;  %v9664_v32 = vpop.f32.mrb[68].mxu1 }
 0x225   : > { %v9658_v45 = vpop.f32.mrb[56].mxu0  ;;  %11189 = vst [vmem:[#allocation51_spill] sm:$0xff] %v9664_v32  ;;  %v9668_v36 = vpop.f32.mrb[69].mxu1 }
 0x226   : > { %v9662_v53 = vpop.f32.mrb[57].mxu0  ;;  %11190 = vst [vmem:[#allocation52_spill] sm:$0xff] %v9668_v36  ;;  %v9672_v41 = vpop.f32.mrb[70].mxu1 }
 0x227   : > { %v9666_v5 = vpop.f32.mrb[58].mxu0  ;;  %11191 = vst [vmem:[#allocation53_spill] sm:$0xff] %v9672_v41  ;;  %v9674_v15 = vpop.f32.mrb[71].mxu1 }
 0x228   : > { %v9670_v57 = vpop.f32.mrb[59].mxu0  ;;  %11192 = vst [vmem:[#allocation54_spill] sm:$0xff] %v9674_v15  ;;  %v9678_v22 = vpop.f32.mrb[72].mxu1 }
 0x229   : > { %11193 = vst [vmem:[#allocation55_spill] sm:$0xff] %v9678_v22  ;;  %v9682_v27 = vpop.f32.mrb[73].mxu1 }
 0x22a   : > { %7567 = vmatmul.mubr.msk.bf16.gmra.mrb[164].mxu0 %vm1118_vm0, %v9066_v9  ;;  %11194 = vst [vmem:[#allocation56_spill] sm:$0xff] %v9682_v27  ;;  %v9684_v32 = vpop.f32.mrb[74].mxu1 }
 0x22b   : > { %7570 = vmatprep.mubr.msk.bf16.mxu0 %vm1118_vm0, %v9076_v18  ;;  %11195 = vst [vmem:[#allocation57_spill] sm:$0xff] %v9684_v32  ;;  %v9688_v36 = vpop.f32.mrb[75].mxu1 }
 0x22c   : > { %11196 = vst [vmem:[#allocation58_spill] sm:$0xff] %v9688_v36  ;;  %v9692_v41 = vpop.f32.mrb[76].mxu1 }
 0x22d   : > { %v9686_v19 = vpop.f32.mrb[60].mxu0  ;;  %11197 = vst [vmem:[#allocation59_spill] sm:$0xff] %v9692_v41  ;;  %v9696_v9 = vpop.f32.mrb[77].mxu1 }
 0x22e   : > { %v9690_v39 = vpop.f32.mrb[61].mxu0  ;;  %11198 = vst [vmem:[#allocation60_spill] sm:$0xff] %v9696_v9  ;;  %v9700_v61 = vpop.f32.mrb[78].mxu1 }
 0x22f   : > { %v9694_v15 = vpop.f32.mrb[62].mxu0  ;;  %11199 = vst [vmem:[#allocation61_spill] sm:$0xff] %v9700_v61  ;;  %v9702_v18 = vpop.f32.mrb[79].mxu1 }
 0x230   : > { %v9698_v22 = vpop.f32.mrb[63].mxu0  ;;  %11200 = vst [vmem:[#allocation62_spill] sm:$0xff] %v9702_v18  ;;  %v9706_v32 = vpop.f32.mrb[80].mxu1 }
 0x231   : > { %11201 = vst [vmem:[#allocation63_spill] sm:$0xff] %v9706_v32  ;;  %v9710_v36 = vpop.f32.mrb[81].mxu1 }
 0x232   : > { %7571 = vmatmul.mubr.msk.bf16.gmra.mrb[168].mxu0 %vm1118_vm0, %v9079_v0  ;;  %11202 = vst [vmem:[#allocation64_spill] sm:$0xff] %v9710_v36  ;;  %v9712_v41 = vpop.f32.mrb[82].mxu1  ;;  %v3615_v0 = vld [vmem:[%s11094_s3] sm:$0xff] }
 0x233   : > { %7574 = vmatprep.mubr.msk.bf16.mxu0 %vm1118_vm0, %v9090_v3  ;;  %11203 = vst [vmem:[#allocation65_spill] sm:$0xff] %v9712_v41  ;;  %v9716_v9 = vpop.f32.mrb[83].mxu1  ;;  %v3616_v3 = vld [vmem:[%s11094_s3 + $0x8] sm:$0xff] }
 0x234   : > { %11204 = vst [vmem:[#allocation66_spill] sm:$0xff] %v9716_v9  ;;  %v9720_v61 = vpop.f32.mrb[84].mxu1  ;;  %v9734_v32 = vpack.c.bf16 %v3616_v3, %v3615_v0 }
 0x235   : > { %v9714_v27 = vpop.f32.mrb[64].mxu0  ;;  %11205 = vst [vmem:[#allocation67_spill] sm:$0xff] %v9720_v61  ;;  %v9730_v36 = vpop.f32.mrb[85].mxu1 }
 0x236   : > { %v9718_v17 = vpop.f32.mrb[65].mxu0  ;;  %11206 = vst [vmem:[#allocation68_spill] sm:$0xff] %v9730_v36  ;;  %11207 = vst [vmem:[#allocation69_spill] sm:$0xff] %v9734_v32  ;;  %v9736_v9 = vpop.f32.mrb[86].mxu1  ;;  %8035 = vmatprep.subr.bf16.mxu1 %v9734_v32 }
 0x237   : > { %v9722_v18 = vpop.f32.mrb[66].mxu0  ;;  %11208 = vst [vmem:[#allocation70_spill] sm:$0xff] %v9736_v9  ;;  %v9738_v23 = vpop.f32.mrb[87].mxu1 }
 0x238   : > { %v9732_v41 = vpop.f32.mrb[67].mxu0  ;;  %11209 = vst [vmem:[#allocation71_spill] sm:$0xff] %v9738_v23  ;;  %v9743_v61 = vpop.f32.mrb[88].mxu1 }
 0x239   : > { %11210 = vst [vmem:[#allocation72_spill] sm:$0xff] %v9743_v61  ;;  %v9747_v49 = vpop.f32.mrb[89].mxu1 }
 0x23a   : > { %7575 = vmatmul.mubr.msk.bf16.gmra.mrb[172].mxu0 %vm1118_vm0, %v9093_v10  ;;  %11211 = vst [vmem:[#allocation73_spill] sm:$0xff] %v9747_v49  ;;  %v9749_v36 = vpop.f32.mrb[90].mxu1 }
 0x23b   : > { %7578 = vmatprep.mubr.msk.bf16.mxu0 %vm1118_vm0, %v9104_v4  ;;  %11212 = vst [vmem:[#allocation74_spill] sm:$0xff] %v9749_v36  ;;  %v9753_v3 = vpop.f32.mrb[91].mxu1 }
 0x23c   : > { %11213 = vst [vmem:[#allocation75_spill] sm:$0xff] %v9753_v3  ;;  %v9757_v23 = vpop.f32.mrb[92].mxu1  ;;  %v3185_v3 = vadd.f32 %v9598_v50, %v9365_v62 }
 0x23d   : > { %v9751_v0 = vpop.f32.mrb[68].mxu0  ;;  %11214 = vst [vmem:[#allocation76_spill] sm:$0xff] %v9757_v23  ;;  %v9761_v54 = vpop.f32.mrb[93].mxu1  ;;  %v3183_v23 = vadd.f32 %v9365_v62, %v9603_v58 }
 0x23e   : > { %v9755_v9 = vpop.f32.mrb[69].mxu0  ;;  %11215 = vst [vmem:[#allocation77_spill] sm:$0xff] %v9761_v54  ;;  %v9765_v24 = vpop.f32.mrb[94].mxu1  ;;  %v3186_v54 = vadd.f32 %v9607_v30, %v9365_v62 }
 0x23f   : > { %v9759_v10 = vpop.f32.mrb[70].mxu0  ;;  %11216 = vst [vmem:[#allocation78_spill] sm:$0xff] %v9765_v24  ;;  %v9767_v4 = vpop.f32.mrb[95].mxu1  ;;  %v3375_v46 = vmax.f32 %v3183_v23, 0.0 }
 0x240   : > { %v9763_v61 = vpop.f32.mrb[71].mxu0  ;;  %11217 = vst [vmem:[#allocation79_spill] sm:$0xff] %v9767_v4  ;;  %v3184_v4 = vadd.f32 %v9365_v62, %v9612_v34  ;;  %v3378_v32 = vmax.f32 %v3186_v54, 0.0 }
 0x242   : > { %7579 = vmatmul.mubr.msk.bf16.gmra.mrb[176].mxu0 %vm1118_vm0, %v9107_v7  ;;  %v3376_v34 = vmax.f32 %v3184_v4, 0.0 }
 0x243   : > { %7582 = vmatprep.mubr.msk.bf16.mxu0 %vm1118_vm0, %v9118_v8  ;;  %v3377_v8 = vmax.f32 %v3185_v3, 0.0 }
 0x245   : > { %v7476_v36 = vpop.f32.mrb[72].mxu0 }
 0x246   : > { %v3209_v24 = vadd.f32 %v7476_v36, %v9365_v62  ;;  %v2656_v49 = vpop.f32.mrb[73].mxu0 }
 0x247   : > { %v3207_v7 = vadd.f32 %v9365_v62, %v2656_v49  ;;  %v7477_v43 = vpop.f32.mrb[74].mxu0 }
 0x248   : > { %v3401_v16 = vmax.f32 %v3209_v24, 0.0  ;;  %v3210_v50 = vadd.f32 %v7477_v43, %v9365_v62  ;;  %v2659_v26 = vpop.f32.mrb[75].mxu0  ;;  %v3189_v43 = vadd.f32 %v9630_v48, %v9365_v62 }
 0x249   : > { %v3399_v58 = vmax.f32 %v3207_v7, 0.0  ;;  %v3208_v63 = vadd.f32 %v9365_v62, %v2659_v26 }
 0x24a   : > { %v9785_v30 = vmax.f32 %v3377_v8, %v3401_v16  ;;  %v3402_v36 = vmax.f32 %v3210_v50, 0.0  ;;  %7583 = vmatmul.mubr.msk.bf16.gmra.mrb[180].mxu0 %vm1118_vm0, %v9121_v11  ;;  %v3187_v16 = vadd.f32 %v9365_v62, %v9634_v42  ;;  %v3190_v11 = vadd.f32 %v9638_v51, %v9365_v62 }
 0x24b   : > { %v9789_v25 = vmax.f32 %v3375_v46, %v3399_v58  ;;  %v3400_v49 = vmax.f32 %v3208_v63, 0.0  ;;  %7586 = vmatprep.mubr.msk.bf16.mxu0 %vm1118_vm0, %v9132_v12  ;;  %v3188_v12 = vadd.f32 %v9365_v62, %v9642_v47 }
 0x24c   : > { %v9795_v24 = vmax.f32 %v3378_v32, %v3402_v36  ;;  %v3381_v32 = vmax.f32 %v3189_v43, 0.0  ;;  %v3379_v7 = vmax.f32 %v3187_v16, 0.0  ;;  %v3382_v58 = vmax.f32 %v3190_v11, 0.0 }
 0x24d   : > { %v9799_v26 = vmax.f32 %v3376_v34, %v3400_v49  ;;  %v7480_v54 = vpop.f32.mrb[76].mxu0  ;;  %v3380_v47 = vmax.f32 %v3188_v12, 0.0  ;;  %v3193_v43 = vadd.f32 %v9658_v45, %v9365_v62 }
 0x24e   : > { %v3213_v46 = vadd.f32 %v7480_v54, %v9365_v62  ;;  %v2672_v63 = vpop.f32.mrb[77].mxu0  ;;  %v3191_v54 = vadd.f32 %v9365_v62, %v9662_v53 }
 0x24f   : > { %v3211_v23 = vadd.f32 %v9365_v62, %v2672_v63  ;;  %v7481_v48 = vpop.f32.mrb[78].mxu0 }
 0x250   : > { %v3405_v3 = vmax.f32 %v3213_v46, 0.0  ;;  %v3214_v4 = vadd.f32 %v7481_v48, %v9365_v62  ;;  %v2675_v42 = vpop.f32.mrb[79].mxu0  ;;  %v3385_v48 = vmax.f32 %v3193_v43, 0.0 }
 0x251   : > { %v3403_v8 = vmax.f32 %v3211_v23, 0.0  ;;  %v3212_v50 = vadd.f32 %v9365_v62, %v2675_v42 }
 0x252   : > { %v9809_v51 = vmax.f32 %v3381_v32, %v3405_v3  ;;  %v3406_v36 = vmax.f32 %v3214_v4, 0.0  ;;  %7587 = vmatmul.mubr.msk.bf16.gmra.mrb[184].mxu0 %vm1118_vm0, %v9135_v13  ;;  %v3194_v13 = vadd.f32 %v9666_v5, %v9365_v62  ;;  %v3383_v4 = vmax.f32 %v3191_v54, 0.0 }
 0x253   : > { %v9813_v34 = vmax.f32 %v3379_v7, %v3403_v8  ;;  %v3404_v49 = vmax.f32 %v3212_v50, 0.0  ;;  %7590 = vmatprep.mubr.msk.bf16.mxu0 %vm1118_vm0, %v9148_v14  ;;  %v3192_v14 = vadd.f32 %v9365_v62, %v9670_v57  ;;  %v3195_v54 = vadd.f32 %v9365_v62, %v9690_v39 }
 0x254   : > { %v9819_v16 = vmax.f32 %v3382_v58, %v3406_v36  ;;  %v3386_v5 = vmax.f32 %v3194_v13, 0.0  ;;  %v8579_v58 = vld [vmem:[%s8671_s27 + $0x2f8] sm:$0xff]  }
 0x255   : > { %v9823_v11 = vmax.f32 %v3380_v47, %v3404_v49  ;;  %v7484_v46 = vpop.f32.mrb[80].mxu0  ;;  %v3384_v57 = vmax.f32 %v3192_v14, 0.0  ;;  %v3197_v49 = vadd.f32 %v9686_v19, %v9365_v62 }
 0x256   : > { %v3217_v63 = vadd.f32 %v7484_v46, %v9365_v62  ;;  %v2688_v12 = vpop.f32.mrb[81].mxu0 }
 0x257   : > { %v3215_v45 = vadd.f32 %v9365_v62, %v2688_v12  ;;  %v7485_v23 = vpop.f32.mrb[82].mxu0 }
 0x258   : > { %v3409_v32 = vmax.f32 %v3217_v63, 0.0  ;;  %v3218_v53 = vadd.f32 %v7485_v23, %v9365_v62  ;;  %v2691_v3 = vpop.f32.mrb[83].mxu0  ;;  %v3198_v63 = vadd.f32 %v9694_v15, %v9365_v62 }
 0x259   : > { %v3407_v42 = vmax.f32 %v3215_v45, 0.0  ;;  %v3216_v7 = vadd.f32 %v9365_v62, %v2691_v3  ;;  %v3196_v45 = vadd.f32 %v9365_v62, %v9698_v22  ;;  %v3387_v3 = vmax.f32 %v3195_v54, 0.0 }
 0x25a   : > { %v9833_v8 = vmax.f32 %v3385_v48, %v3409_v32  ;;  %v3410_v50 = vmax.f32 %v3218_v53, 0.0  ;;  %7591 = vmatmul.mubr.msk.bf16.gmra.mrb[188].mxu0 %vm1118_vm0, %v8579_v58  ;;  %v3389_v48 = vmax.f32 %v3197_v49, 0.0  ;;  %v3199_v49 = vadd.f32 %v9365_v62, %v9718_v17 }
 0x25b   : > { %v9837_v36 = vmax.f32 %v3383_v4, %v3407_v42  ;;  %v3408_v47 = vmax.f32 %v3216_v7, 0.0  ;;  %v3390_v7 = vmax.f32 %v3198_v63, 0.0  ;;  %v3202_v63 = vadd.f32 %v9722_v18, %v9365_v62 }
 0x25c   : > { %v9841_v43 = vmax.f32 %v3386_v5, %v3410_v50  ;;  %v3388_v50 = vmax.f32 %v3196_v45, 0.0  ;;  %v3200_v45 = vadd.f32 %v9365_v62, %v9732_v41 }
 0x25d   : > { %v9845_v46 = vmax.f32 %v3384_v57, %v3408_v47  ;;  %v7488_v13 = vpop.f32.mrb[84].mxu0  ;;  %v3201_v57 = vadd.f32 %v9714_v27, %v9365_v62 }
 0x25e   : > { %v3221_v12 = vadd.f32 %v7488_v13, %v9365_v62  ;;  %v2704_v14 = vpop.f32.mrb[85].mxu0 }
 0x25f   : > { %v3219_v23 = vadd.f32 %v9365_v62, %v2704_v14  ;;  %v7489_v19 = vpop.f32.mrb[86].mxu0 }
 0x260   : > { %v3413_v32 = vmax.f32 %v3221_v12, 0.0  ;;  %v3222_v53 = vadd.f32 %v7489_v19, %v9365_v62  ;;  %v2707_v39 = vpop.f32.mrb[87].mxu0  ;;  %v3393_v19 = vmax.f32 %v3201_v57, 0.0  ;;  %v3203_v57 = vadd.f32 %v9365_v62, %v9755_v9 }
 0x261   : > { %v3411_v4 = vmax.f32 %v3219_v23, 0.0  ;;  %v3220_v42 = vadd.f32 %v9365_v62, %v2707_v39 }
 0x262   : > { %v9855_v15 = vmax.f32 %v3389_v48, %v3413_v32  ;;  %v3414_v5 = vmax.f32 %v3222_v53, 0.0  ;;  %v3391_v53 = vmax.f32 %v3199_v49, 0.0 }
 0x263   : > { %v9857_v58 = vmax.f32 %v3387_v3, %v3411_v4  ;;  %v3412_v22 = vmax.f32 %v3220_v42, 0.0  ;;  %v3394_v4 = vmax.f32 %v3202_v63, 0.0  ;;  %v3206_v63 = vadd.f32 %v9759_v10, %v9365_v62 }
 0x264   : > { %v9861_v47 = vmax.f32 %v3390_v7, %v3414_v5  ;;  %v3392_v7 = vmax.f32 %v3200_v45, 0.0  ;;  %v3204_v45 = vadd.f32 %v9365_v62, %v9763_v61 }
 0x265   : > { %v9865_v54 = vmax.f32 %v3388_v50, %v3412_v22  ;;  %v7492_v13 = vpop.f32.mrb[88].mxu0  ;;  %v3205_v50 = vadd.f32 %v9751_v0, %v9365_v62 }
 0x266   : > { %v3225_v12 = vadd.f32 %v7492_v13, %v9365_v62  ;;  %v2720_v14 = vpop.f32.mrb[89].mxu0 }
 0x267   : > { %v3223_v23 = vadd.f32 %v9365_v62, %v2720_v14  ;;  %v7493_v27 = vpop.f32.mrb[90].mxu0 }
 0x268   : > { %v3417_v48 = vmax.f32 %v3225_v12, 0.0  ;;  %v3226_v32 = vadd.f32 %v7493_v27, %v9365_v62  ;;  %v2723_v17 = vpop.f32.mrb[91].mxu0  ;;  %v3397_v27 = vmax.f32 %v3205_v50, 0.0 }
 0x269   : > { %v3415_v39 = vmax.f32 %v3223_v23, 0.0  ;;  %v3224_v3 = vadd.f32 %v9365_v62, %v2723_v17 }
 0x26a   : > { %v9875_v18 = vmax.f32 %v3393_v19, %v3417_v48  ;;  %v3418_v42 = vmax.f32 %v3226_v32, 0.0  ;;  %v3395_v32 = vmax.f32 %v3203_v57, 0.0  ;;  %v11225_v57 = vld [vmem:[#allocation15_spill] sm:$0xff] }
 0x26b   : > { %v9877_v5 = vmax.f32 %v3391_v53, %v3415_v39  ;;  %v3416_v41 = vmax.f32 %v3224_v3, 0.0  ;;  %v3398_v39 = vmax.f32 %v3206_v63, 0.0 }
 0x26c   : > { %11218 = vst [vmem:[#allocation80_spill] sm:$0xff] %v9875_v18  ;;  %v9881_v22 = vmax.f32 %v3394_v4, %v3418_v42  ;;  %v3396_v4 = vmax.f32 %v3204_v45, 0.0 }
 0x26d   : > { %v9885_v49 = vmax.f32 %v3392_v7, %v3416_v41  ;;  %v7496_v13 = vpop.f32.mrb[92].mxu0 }
 0x26e   : > { %11219 = vst [vmem:[#allocation81_spill] sm:$0xff] %v9881_v22  ;;  %v3229_v12 = vadd.f32 %v7496_v13, %v9365_v62  ;;  %v2736_v14 = vpop.f32.mrb[93].mxu0  ;;  %v11224_v13 = vld [vmem:[#allocation14_spill] sm:$0xff] }
 0x26f   : > { %v3227_v23 = vadd.f32 %v9365_v62, %v2736_v14  ;;  %v7497_v0 = vpop.f32.mrb[94].mxu0 }
 0x270   : > { %v3421_v19 = vmax.f32 %v3229_v12, 0.0  ;;  %v3230_v48 = vadd.f32 %v7497_v0, %v9365_v62  ;;  %v2739_v9 = vpop.f32.mrb[95].mxu0 }
 0x271   : > { %v3419_v17 = vmax.f32 %v3227_v23, 0.0  ;;  %v3228_v53 = vadd.f32 %v9365_v62, %v2739_v9  ;;  %v11226_v62 = vld [vmem:[#allocation16_spill] sm:$0xff]  ;;  %v11228_v9 = vld [vmem:[#allocation18_spill] sm:$0xff] }
 0x272   : > { %v9895_v10 = vmax.f32 %v3397_v27, %v3421_v19  ;;  %v3422_v3 = vmax.f32 %v3230_v48, 0.0  ;;  %v11227_v19 = vld [vmem:[#allocation17_spill] sm:$0xff] }
 0x273   : > { %v9897_v42 = vmax.f32 %v3395_v32, %v3419_v17  ;;  %v3420_v61 = vmax.f32 %v3228_v53, 0.0 }
 0x274   : > { %11220 = vst [vmem:[#allocation82_spill] sm:$0xff] %v9895_v10  ;;  %v9899_v7 = vmax.f32 %v3398_v39, %v3422_v3 }
 0x275   : > { %11221 = vst [vmem:[#allocation83_spill] sm:$0xff] %v9897_v42  ;;  %v9901_v41 = vmax.f32 %v3396_v4, %v3420_v61  ;;  %v7500_v50 = vpop.f32.mrb[96].mxu0 }
 0x276   : > { %11222 = vst [vmem:[#allocation84_spill] sm:$0xff] %v9899_v7  ;;  %v2761_v12 = vadd.f32 %v7500_v50, %v11224_v13  ;;  %v2752_v14 = vpop.f32.mrb[97].mxu0  ;;  %v11234_v7 = vld [vmem:[#allocation3_spill] sm:$0xff] }
 0x277   : > { %11223 = vst [vmem:[#allocation85_spill] sm:$0xff] %v9901_v41  ;;  %v2753_v23 = vadd.f32 %v2752_v14, %v11225_v57  ;;  %v7501_v0 = vpop.f32.mrb[98].mxu0 }
 0x278   : > { %v2764_v63 = vadd.f32 %v7501_v0, %v11226_v62  ;;  %v2755_v27 = vpop.f32.mrb[99].mxu0 }
 0x279   : > { %v2756_v48 = vadd.f32 %v2755_v27, %v11227_v19  ;;  %v11229_v27 = vld [vmem:[#allocation19_spill] sm:$0xff] }
 0x27d   : > { %v7504_v45 = vpop.f32.mrb[100].mxu0 }
 0x27e   : > { %v9908_v32 = vadd.f32 %v7504_v45, %v11228_v9  ;;  %v2768_v17 = vpop.f32.mrb[101].mxu0  ;;  %v11230_v45 = vld [vmem:[#allocation20_spill] sm:$0xff] }
 0x27f   : > { %v9911_v53 = vadd.f32 %v2768_v17, %v9387_v20  ;;  %v7505_v39 = vpop.f32.mrb[102].mxu0  ;;  %v11231_v17 = vld [vmem:[#allocation21_spill] sm:$0xff] }
 0x280   : > { %v9914_v3 = vadd.f32 %v7505_v39, %v9390_v21  ;;  %v2771_v4 = vpop.f32.mrb[103].mxu0 }
 0x281   : > { %v9917_v61 = vadd.f32 %v2771_v4, %v9393_v55  ;;  %v11232_v4 = vld [vmem:[#allocation22_spill] sm:$0xff] }
 0x285   : > { %v7508_v50 = vpop.f32.mrb[104].mxu0 }
 0x286   : > { %v9920_v13 = vadd.f32 %v7508_v50, %v9397_v1  ;;  %v2784_v14 = vpop.f32.mrb[105].mxu0 }
 0x287   : > { %v9923_v57 = vadd.f32 %v2784_v14, %v9401_v6  ;;  %v7509_v0 = vpop.f32.mrb[106].mxu0 }
 0x288   : > { %v9926_v20 = vadd.f32 %v7509_v0, %v9405_v31  ;;  %v2787_v62 = vpop.f32.mrb[107].mxu0 }
 0x289   : > { %v9929_v21 = vadd.f32 %v2787_v62, %v11229_v27 }
 0x28d   : > { %v7512_v19 = vpop.f32.mrb[108].mxu0 }
 0x28e   : > { %v9932_v55 = vadd.f32 %v7512_v19, %v11230_v45  ;;  %v2800_v9 = vpop.f32.mrb[109].mxu0 }
 0x28f   : > { %v9935_v1 = vadd.f32 %v2800_v9, %v11231_v17  ;;  %v7513_v39 = vpop.f32.mrb[110].mxu0 }
 0x290   : > { %v9938_v6 = vadd.f32 %v7513_v39, %v11232_v4  ;;  %v2803_v50 = vpop.f32.mrb[111].mxu0 }
 0x291   : > { %v9941_v31 = vadd.f32 %v2803_v50, %v9429_v35  ;;  %v11233_v50 = vld [vmem:[#allocation2_spill] sm:$0xff] }
 0x295   : > { %v7516_v14 = vpop.f32.mrb[112].mxu0 }
 0x296   : > { %v9944_v0 = vadd.f32 %v7516_v14, %v9434_v38  ;;  %v2816_v62 = vpop.f32.mrb[113].mxu0 }
 0x297   : > { %v9947_v27 = vadd.f32 %v2816_v62, %v9439_v60  ;;  %v7517_v19 = vpop.f32.mrb[114].mxu0 }
 0x298   : > { %v9950_v45 = vadd.f32 %v7517_v19, %v9443_v28  ;;  %v2819_v9 = vpop.f32.mrb[115].mxu0 }
 0x299   : > { %v9953_v17 = vadd.f32 %v2819_v9, %v9449_v29  ;;  %v9970_v29 = vld [vmem:[%s11093_s2] ss:$0 sm:$0xff] }
 0x29a   : > { %v3232_v41 = vadd.f32 %v9970_v29, %v2756_v48  ;;  %v3618_v48 = vld [vmem:[%s11094_s3 + $0x18] sm:$0xff] }
 0x29d   : > { %v7520_v39 = vpop.f32.mrb[116].mxu0 }
 0x29e   : > { %v9956_v35 = vadd.f32 %v7520_v39, %v9455_v33  ;;  %v2832_v4 = vpop.f32.mrb[117].mxu0  ;;  %v3233_v33 = vadd.f32 %v9970_v29, %v2761_v12 }
 0x29f   : > { %v9959_v38 = vadd.f32 %v2832_v4, %v11233_v50  ;;  %v7521_v14 = vpop.f32.mrb[118].mxu0  ;;  %v3231_v4 = vadd.f32 %v9970_v29, %v2753_v23 }
 0x2a0   : > { %v9962_v60 = vadd.f32 %v7521_v14, %v11234_v7  ;;  %v2835_v62 = vpop.f32.mrb[119].mxu0  ;;  %v3234_v14 = vadd.f32 %v9970_v29, %v2764_v63 }
 0x2a1   : > { %v9965_v28 = vadd.f32 %v2835_v62, %v9469_v56  ;;  %v3423_v22 = vmax.f32 %v3231_v4, 0.0 }
 0x2a2   : > { %v3426_v63 = vmax.f32 %v3234_v14, 0.0 }
 0x2a5   : > { %v7524_v19 = vpop.f32.mrb[120].mxu0 }
 0x2a6   : > { %v2857_v9 = vadd.f32 %v7524_v19, %v9474_v2  ;;  %v2848_v39 = vpop.f32.mrb[121].mxu0  ;;  %v3425_v2 = vmax.f32 %v3233_v33, 0.0 }
 0x2a7   : > { %v2849_v7 = vadd.f32 %v2848_v39, %v9479_v37  ;;  %v7525_v50 = vpop.f32.mrb[122].mxu0 }
 0x2a8   : > { %v3257_v56 = vadd.f32 %v9970_v29, %v2857_v9  ;;  %v2860_v62 = vadd.f32 %v7525_v50, %v9483_v40  ;;  %v2851_v10 = vpop.f32.mrb[123].mxu0  ;;  %v3617_v40 = vld [vmem:[%s11094_s3 + $0x10] sm:$0xff] }
 0x2a9   : > { %v3255_v42 = vadd.f32 %v9970_v29, %v2849_v7  ;;  %v2852_v12 = vadd.f32 %v2851_v10, %v9489_v52  ;;  %v3424_v52 = vmax.f32 %v3232_v41, 0.0  ;;  %v9997_v41 = vpack.c.bf16 %v3618_v48, %v3617_v40 }
 0x2aa   : > { %v3449_v19 = vmax.f32 %v3257_v56, 0.0  ;;  %v3258_v23 = vadd.f32 %v9970_v29, %v2860_v62  ;;  %v3235_v56 = vadd.f32 %v9970_v29, %v9911_v53  ;;  %v3619_v53 = vld [vmem:[%s11094_s3 + $0x20] sm:$0xff] }
 0x2ab   : > { %v3447_v37 = vmax.f32 %v3255_v42, 0.0  ;;  %v3256_v39 = vadd.f32 %v9970_v29, %v2852_v12  ;;  %v3237_v42 = vadd.f32 %v9970_v29, %v9908_v32 }
 0x2ac   : > { %v3569_v18 = vmax.f32 %v3425_v2, %v3449_v19  ;;  %v3450_v9 = vmax.f32 %v3258_v23, 0.0  ;;  %v11235_v19 = vld [vmem:[#allocation4_spill] sm:$0xff] }
 0x2ad   : > { %v3567_v10 = vmax.f32 %v3423_v22, %v3447_v37  ;;  %v3448_v33 = vmax.f32 %v3256_v39, 0.0  ;;  %v7528_v7 = vpop.f32.mrb[124].mxu0  ;;  %v3238_v22 = vadd.f32 %v9970_v29, %v9914_v3  ;;  %v3236_v37 = vadd.f32 %v9970_v29, %v9917_v61 }
 0x2ae   : > { %v3570_v4 = vmax.f32 %v3426_v63, %v3450_v9  ;;  %v2873_v50 = vadd.f32 %v7528_v7, %v9495_v44  ;;  %v2864_v14 = vpop.f32.mrb[125].mxu0  ;;  %v11236_v63 = vld [vmem:[#allocation5_spill] sm:$0xff]  ;;  %v3429_v9 = vmax.f32 %v3237_v42, 0.0 }
 0x2af   : > { %v3568_v62 = vmax.f32 %v3424_v52, %v3448_v33  ;;  %v2865_v12 = vadd.f32 %v2864_v14, %v9501_v59  ;;  %v7529_v2 = vpop.f32.mrb[126].mxu0  ;;  %7674 = vmatprep.mubr.msk.f32.mxu1 %vm3645_vm2, %v3567_v10  ;;  %v3620_v59 = vld [vmem:[%s11094_s3 + $0x28] sm:$0xff]  ;;  %v11237_v52 = vld [vmem:[#allocation69_spill] sm:$0xff]  ;;  %v3427_v10 = vmax.f32 %v3235_v56, 0.0  ;;  %v3430_v14 = vmax.f32 %v3238_v22, 0.0 }
 0x2b0   : > { %v3261_v32 = vadd.f32 %v9970_v29, %v2873_v50  ;;  %v2876_v23 = vadd.f32 %v7529_v2, %v11235_v19  ;;  %v2867_v44 = vpop.f32.mrb[127].mxu0  ;;  %v10019_v61 = vpack.c.bf16 %v3620_v59, %v3619_v53  ;;  %v3621_v50 = vld [vmem:[%s11094_s3 + $0x30] sm:$0xff]  ;;  %v3622_v42 = vld [vmem:[%s11094_s3 + $0x38] sm:$0xff]  ;;  %v3241_v19 = vadd.f32 %v9970_v29, %v9920_v13 }
 0x2b1   : > { %v3259_v39 = vadd.f32 %v9970_v29, %v2865_v12  ;;  %v2868_v3 = vadd.f32 %v2867_v44, %v11236_v63  ;;  %7675 = vmatmul.mubr.msk.f32.vlgmr.msra.gmra.mrb[120].mxu1 %vm3645_vm2, %v3568_v62  ;;  %v3428_v12 = vmax.f32 %v3236_v37, 0.0  ;;  %v11238_v44 = vld [vmem:[#allocation6_spill] sm:$0xff]  ;;  %v3239_v22 = vadd.f32 %v9970_v29, %v9923_v57  ;;  %v11239_v63 = vld [vmem:[#allocation7_spill] sm:$0xff] }
 0x2b2   : > { %v3453_v40 = vmax.f32 %v3261_v32, 0.0  ;;  %v3262_v48 = vadd.f32 %v9970_v29, %v2876_v23  ;;  %7677 = vmatprep.mubr.msk.f32.mxu1 %vm3645_vm2, %v3569_v18  ;;  %8037 = vmatpush3.bf16.msra.mxu1 %v11237_v52  ;;  %v3242_v13 = vadd.f32 %v9970_v29, %v9926_v20  ;;  %v3623_v57 = vld [vmem:[%s11094_s3 + $0x40] sm:$0xff] }
 0x2b3   : > { %v3451_v33 = vmax.f32 %v3259_v39, 0.0  ;;  %v3260_v7 = vadd.f32 %v9970_v29, %v2868_v3  ;;  %8039 = vmatprep.subr.bf16.mxu1 %v9997_v41  ;;  %v10032_v39 = vpack.c.bf16 %v3622_v42, %v3621_v50  ;;  %v11241_v42 = vld [vmem:[#allocation24_spill] sm:$0xff] }
 0x2b4   : > { %v3573_v18 = vmax.f32 %v3429_v9, %v3453_v40  ;;  %v3454_v62 = vmax.f32 %v3262_v48, 0.0  ;;  %v11240_v40 = vld [vmem:[#allocation23_spill] sm:$0xff] }
 0x2b5   : > { %v3571_v56 = vmax.f32 %v3427_v10, %v3451_v33  ;;  %v3452_v2 = vmax.f32 %v3260_v7, 0.0  ;;  %v7532_v32 = vpop.f32.mrb[128].mxu0  ;;  %7678 = vmatmul.mubr.msk.f32.gmra.mrb[122].mxu1 %vm3645_vm2, %v3570_v4  ;;  %v3624_v33 = vld [vmem:[%s11094_s3 + $0x48] sm:$0xff]  ;;  %v3240_v7 = vadd.f32 %v9970_v29, %v9929_v21 }
 0x2b6   : > { %v3574_v23 = vmax.f32 %v3430_v14, %v3454_v62  ;;  %v2889_v53 = vadd.f32 %v7532_v32, %v11238_v44  ;;  %v2880_v59 = vpop.f32.mrb[129].mxu0  ;;  %8041 = vmatpush3.bf16.msra.mxu1 %v9997_v41  ;;  %v3433_v14 = vmax.f32 %v3241_v19, 0.0  ;;  %v10059_v21 = vpack.c.bf16 %v3624_v33, %v3623_v57 }
 0x2b7   : > { %v3572_v37 = vmax.f32 %v3428_v12, %v3452_v2  ;;  %v2881_v3 = vadd.f32 %v2880_v59, %v11239_v63  ;;  %v7533_v9 = vpop.f32.mrb[130].mxu0  ;;  %7680 = vmatprep.mubr.msk.f32.mxu1 %vm3645_vm2, %v3571_v56  ;;  %8043 = vmatprep.subr.bf16.mxu1 %v10019_v61  ;;  %v3431_v56 = vmax.f32 %v3239_v22, 0.0  ;;  %v3434_v44 = vmax.f32 %v3242_v13, 0.0 }
 0x2b8   : > { %v3265_v4 = vadd.f32 %v9970_v29, %v2889_v53  ;;  %v2892_v48 = vadd.f32 %v7533_v9, %v11240_v40  ;;  %v2883_v10 = vpop.f32.mrb[131].mxu0  ;;  %v11242_v9 = vld [vmem:[#allocation25_spill] sm:$0xff]  ;;  %v3243_v13 = vadd.f32 %v9970_v29, %v9935_v1  ;;  %v10078_v1 = vld [vmem:[%s11094_s3 + $0x50] sm:$0x1] }
 0x2b9   : > { %v3263_v50 = vadd.f32 %v9970_v29, %v2881_v3  ;;  %v2884_v20 = vadd.f32 %v2883_v10, %v11241_v42  ;;  %7681 = vmatmul.mubr.msk.f32.gmra.mrb[124].mxu1 %vm3645_vm2, %v3572_v37  ;;  %v3432_v37 = vmax.f32 %v3240_v7, 0.0  ;;  %v11243_v10 = vld [vmem:[#allocation26_spill] sm:$0xff]  ;;  %v11244_v7 = vld [vmem:[#allocation27_spill] sm:$0xff] }
 0x2ba   : > { %v3457_v62 = vmax.f32 %v3265_v4, 0.0  ;;  %v3266_v12 = vadd.f32 %v9970_v29, %v2892_v48  ;;  %7683 = vmatprep.mubr.msk.f32.mxu1 %vm3645_vm2, %v3573_v18  ;;  %8045 = vmatpush3.bf16.msra.mxu1 %v10019_v61  ;;  %v3245_v18 = vadd.f32 %v9970_v29, %v9932_v55  ;;  %v3246_v55 = vadd.f32 %v9970_v29, %v9938_v6 }
 0x2bb   : > { %v3455_v2 = vmax.f32 %v3263_v50, 0.0  ;;  %v3264_v32 = vadd.f32 %v9970_v29, %v2884_v20  ;;  %8047 = vmatprep.subr.bf16.mxu1 %v10032_v39  ;;  %v3244_v20 = vadd.f32 %v9970_v29, %v9941_v31 }
 0x2bc   : > { %v3577_v53 = vmax.f32 %v3433_v14, %v3457_v62  ;;  %v3458_v59 = vmax.f32 %v3266_v12, 0.0  ;;  %v11245_v62 = vld [vmem:[#allocation28_spill] sm:$0xff]  ;;  %v3437_v6 = vmax.f32 %v3245_v18, 0.0 }
 0x2bd   : > { %v3575_v19 = vmax.f32 %v3431_v56, %v3455_v2  ;;  %v3456_v63 = vmax.f32 %v3264_v32, 0.0  ;;  %v7536_v3 = vpop.f32.mrb[132].mxu0  ;;  %7684 = vmatmul.mubr.msk.f32.gmra.mrb[126].mxu1 %vm3645_vm2, %v3574_v23  ;;  %v3436_v18 = vmax.f32 %v3244_v20, 0.0 }
 0x2be   : > { %v3578_v22 = vmax.f32 %v3434_v44, %v3458_v59  ;;  %v2905_v4 = vadd.f32 %v7536_v3, %v11242_v9  ;;  %v2896_v40 = vpop.f32.mrb[133].mxu0  ;;  %8049 = vmatpush3.bf16.msra.mxu1 %v10032_v39  ;;  %v3435_v44 = vmax.f32 %v3243_v13, 0.0 }
 0x2bf   : > { %v3576_v48 = vmax.f32 %v3432_v37, %v3456_v63  ;;  %v2897_v57 = vadd.f32 %v2896_v40, %v11243_v10  ;;  %v7537_v33 = vpop.f32.mrb[134].mxu0  ;;  %7686 = vmatprep.mubr.msk.f32.mxu1 %vm3645_vm2, %v3575_v19  ;;  %8051 = vmatprep.subr.bf16.mxu1 %v10059_v21  ;;  %v3438_v19 = vmax.f32 %v3246_v55, 0.0  ;;  %v3247_v55 = vadd.f32 %v9970_v29, %v9947_v27 }
 0x2c0   : > { %v3269_v23 = vadd.f32 %v9970_v29, %v2905_v4  ;;  %v2908_v50 = vadd.f32 %v7537_v33, %v11244_v7  ;;  %v2899_v42 = vpop.f32.mrb[135].mxu0  ;;  %v11247_v7 = vld [vmem:[#allocation9_spill] sm:$0xff]  ;;  %v3248_v27 = vadd.f32 %v9970_v29, %v9953_v17 }
 0x2c1   : > { %v3267_v14 = vadd.f32 %v9970_v29, %v2897_v57  ;;  %v2900_v12 = vadd.f32 %v2899_v42, %v11245_v62  ;;  %7687 = vmatmul.mubr.msk.f32.gmra.mrb[128].mxu1 %vm3645_vm2, %v3576_v48  ;;  %v11246_v48 = vld [vmem:[#allocation8_spill] sm:$0xff] }
 0x2c2   : > { %v3461_v56 = vmax.f32 %v3269_v23, 0.0  ;;  %v3270_v2 = vadd.f32 %v9970_v29, %v2908_v50  ;;  %v10086_v32 = vpop.f32.mrb[96].mxu1  ;;  %7689 = vmatprep.mubr.msk.f32.mxu1 %vm3645_vm2, %v3577_v53  ;;  %8053 = vmatpush3.bf16.msra.mxu1 %v10059_v21  ;;  %v3249_v53 = vadd.f32 %v9970_v29, %v9944_v0  ;;  %v3250_v0 = vadd.f32 %v9970_v29, %v9950_v45 }
 0x2c3   : > { %v3459_v59 = vmax.f32 %v3267_v14, 0.0  ;;  %v3268_v31 = vadd.f32 %v9970_v29, %v2900_v12  ;;  %v10091_v37 = vpop.f32.mrb[97].mxu1  ;;  %7730 = vmatprep.subr.msk.mxu1 %vm3718_vm1, %v10078_v1  ;;  %v11248_v14 = vld [vmem:[#allocation29_spill] sm:$0xff]  ;;  %v3439_v45 = vmax.f32 %v3247_v55, 0.0 }
 0x2c4   : > { %v3581_v63 = vmax.f32 %v3437_v6, %v3461_v56  ;;  %v3462_v3 = vmax.f32 %v3270_v2, 0.0  ;;  %v11249_v56 = vld [vmem:[#allocation30_spill] sm:$0xff]  ;;  %v3442_v17 = vmax.f32 %v3250_v0, 0.0  ;;  %v3251_v0 = vadd.f32 %v9970_v29, %v9959_v38 }
 0x2c5   : > { %v3579_v9 = vmax.f32 %v3435_v44, %v3459_v59  ;;  %v3460_v4 = vmax.f32 %v3268_v31, 0.0  ;;  %v7540_v40 = vpop.f32.mrb[136].mxu0  ;;  %7690 = vmatmul.mubr.msk.f32.gmra.mrb[130].mxu1 %vm3645_vm2, %v3578_v22  ;;  %v3441_v44 = vmax.f32 %v3249_v53, 0.0 }
 0x2c6   : > { %v3582_v13 = vmax.f32 %v3438_v19, %v3462_v3  ;;  %v2921_v10 = vadd.f32 %v7540_v40, %v11246_v48  ;;  %v2912_v57 = vpop.f32.mrb[137].mxu0  ;;  %v10099_v33 = vpop.f32.mrb[98].mxu1  ;;  %7731 = vmatpush3.msk.msra.mxu1 %vm3718_vm1, %v10078_v1  ;;  %v3440_v48 = vmax.f32 %v3248_v27, 0.0 }
 0x2c7   : > { %v3580_v23 = vmax.f32 %v3436_v18, %v3460_v4  ;;  %v2913_v50 = vadd.f32 %v2912_v57, %v11247_v7  ;;  %v7541_v42 = vpop.f32.mrb[138].mxu0  ;;  %v10106_v22 = vpop.f32.mrb[99].mxu1  ;;  %7692 = vmatprep.mubr.msk.f32.mxu1 %vm3645_vm2, %v3579_v9  ;;  %8055 = vmatprep.subr.bf16.mxu1 %v11237_v52 }
 0x2c8   : > { %v3273_v20 = vadd.f32 %v9970_v29, %v2921_v10  ;;  %v2924_v62 = vadd.f32 %v7541_v42, %v11248_v14  ;;  %v2915_v12 = vpop.f32.mrb[139].mxu0  ;;  %v11251_v14 = vld [vmem:[#allocation32_spill] sm:$0xff] }
 0x2c9   : > { %v3271_v6 = vadd.f32 %v9970_v29, %v2913_v50  ;;  %v2916_v2 = vadd.f32 %v2915_v12, %v11249_v56  ;;  %7693 = vmatmul.mubr.msk.f32.gmra.mrb[132].mxu1 %vm3645_vm2, %v3580_v23  ;;  %v3253_v23 = vadd.f32 %v9970_v29, %v9956_v35  ;;  %v3254_v35 = vadd.f32 %v9970_v29, %v9962_v60 }
 0x2ca   : > { %v3465_v59 = vmax.f32 %v3273_v20, 0.0  ;;  %v3274_v31 = vadd.f32 %v9970_v29, %v2924_v62  ;;  %v10120_v19 = vpop.f32.mrb[100].mxu1  ;;  %7695 = vmatprep.mubr.msk.f32.mxu1 %vm3645_vm2, %v3581_v63  ;;  %v11250_v63 = vld [vmem:[#allocation31_spill] sm:$0xff]  ;;  %v3443_v60 = vmax.f32 %v3251_v0, 0.0 }
 0x2cb   : > { %v3463_v3 = vmax.f32 %v3271_v6, 0.0  ;;  %v3272_v18 = vadd.f32 %v9970_v29, %v2916_v2  ;;  %v10124_v9 = vpop.f32.mrb[101].mxu1  ;;  %v11252_v6 = vld [vmem:[#allocation33_spill] sm:$0xff] }
 0x2cc   : > { %v3585_v4 = vmax.f32 %v3441_v44, %v3465_v59  ;;  %v3466_v40 = vmax.f32 %v3274_v31, 0.0  ;;  %v3252_v44 = vadd.f32 %v9970_v29, %v9965_v28  ;;  %v11253_v59 = vld [vmem:[#allocation34_spill] sm:$0xff]  ;;  %v3446_v28 = vmax.f32 %v3254_v35, 0.0 }
 0x2cd   : > { %v3583_v10 = vmax.f32 %v3439_v45, %v3463_v3  ;;  %v3464_v57 = vmax.f32 %v3272_v18, 0.0  ;;  %v7544_v53 = vpop.f32.mrb[140].mxu0  ;;  %7696 = vmatmul.mubr.msk.f32.gmra.mrb[134].mxu1 %vm3645_vm2, %v3582_v13  ;;  %v3445_v45 = vmax.f32 %v3253_v23, 0.0 }
 0x2ce   : > { %v3586_v7 = vmax.f32 %v3442_v17, %v3466_v40  ;;  %v2937_v55 = vadd.f32 %v7544_v53, %v11250_v63  ;;  %v2928_v50 = vpop.f32.mrb[141].mxu0  ;;  %v10130_v42 = vpop.f32.mrb[102].mxu1  ;;  %v3444_v63 = vmax.f32 %v3252_v44, 0.0 }
 0x2cf   : > { %v3584_v20 = vmax.f32 %v3440_v48, %v3464_v57  ;;  %v2929_v62 = vadd.f32 %v2928_v50, %v11251_v14  ;;  %v7545_v12 = vpop.f32.mrb[142].mxu0  ;;  %v10135_v27 = vpop.f32.mrb[103].mxu1  ;;  %7698 = vmatprep.mubr.msk.f32.mxu1 %vm3645_vm2, %v3583_v10  ;;  %v11254_v14 = vld [vmem:[#allocation10_spill] sm:$0xff] }
 0x2d0   : > { %v3277_v13 = vadd.f32 %v9970_v29, %v2937_v55  ;;  %v2940_v56 = vadd.f32 %v7545_v12, %v11252_v6  ;;  %v2931_v2 = vpop.f32.mrb[143].mxu0 }
 0x2d1   : > { %v3275_v38 = vadd.f32 %v9970_v29, %v2929_v62  ;;  %v2932_v31 = vadd.f32 %v2931_v2, %v11253_v59  ;;  %7699 = vmatmul.mubr.msk.f32.gmra.mrb[136].mxu1 %vm3645_vm2, %v3584_v20  ;;  %v11256_v2 = vld [vmem:[#allocation35_spill] sm:$0xff] }
 0x2d2   : > { %v3469_v3 = vmax.f32 %v3277_v13, 0.0  ;;  %v3278_v18 = vadd.f32 %v9970_v29, %v2940_v56  ;;  %v10148_v17 = vpop.f32.mrb[104].mxu1  ;;  %7701 = vmatprep.mubr.msk.f32.mxu1 %vm3645_vm2, %v3585_v4  ;;  %v11255_v13 = vld [vmem:[#allocation11_spill] sm:$0xff] }
 0x2d3   : > { %v3467_v40 = vmax.f32 %v3275_v38, 0.0  ;;  %v3276_v48 = vadd.f32 %v9970_v29, %v2932_v31  ;;  %v10152_v10 = vpop.f32.mrb[105].mxu1  ;;  %v11257_v38 = vld [vmem:[#allocation36_spill] sm:$0xff] }
 0x2d4   : > { %v3589_v57 = vmax.f32 %v3445_v45, %v3469_v3  ;;  %v3470_v53 = vmax.f32 %v3278_v18, 0.0  ;;  %v11258_v18 = vld [vmem:[#allocation37_spill] sm:$0xff] }
 0x2d5   : > { %v3587_v55 = vmax.f32 %v3443_v60, %v3467_v40  ;;  %v3468_v50 = vmax.f32 %v3276_v48, 0.0  ;;  %v7548_v23 = vpop.f32.mrb[144].mxu0  ;;  %7702 = vmatmul.mubr.msk.f32.gmra.mrb[138].mxu1 %vm3645_vm2, %v3586_v7 }
 0x2d6   : > { %v3590_v20 = vmax.f32 %v3446_v28, %v3470_v53  ;;  %v10156_v62 = vadd.f32 %v7548_v23, %v11254_v14  ;;  %v2944_v4 = vpop.f32.mrb[145].mxu0  ;;  %v10158_v0 = vpop.f32.mrb[106].mxu1  ;;  %v11259_v28 = vld [vmem:[#allocation38_spill] sm:$0xff] }
 0x2d7   : > { %v3588_v12 = vmax.f32 %v3444_v63, %v3468_v50  ;;  %v10161_v6 = vadd.f32 %v2944_v4, %v11255_v13  ;;  %v7549_v35 = vpop.f32.mrb[146].mxu0  ;;  %v10163_v56 = vpop.f32.mrb[107].mxu1  ;;  %7704 = vmatprep.mubr.msk.f32.mxu1 %vm3645_vm2, %v3587_v55  ;;  %v11262_v13 = vld [vmem:[#allocation12_spill] sm:$0xff] }
 0x2d8   : > { %v10167_v44 = vadd.f32 %v7549_v35, %v11256_v2  ;;  %v2947_v7 = vpop.f32.mrb[147].mxu0 }
 0x2d9   : > { %v10170_v59 = vadd.f32 %v2947_v7, %v11257_v38  ;;  %7705 = vmatmul.mubr.msk.f32.gmra.mrb[140].mxu1 %vm3645_vm2, %v3588_v12 }
 0x2da   : > { %v10173_v31 = vpop.f32.mrb[108].mxu1  ;;  %7707 = vmatprep.mubr.msk.f32.mxu1 %vm3645_vm2, %v3589_v57  ;;  %v11260_v57 = vld [vmem:[#allocation39_spill] sm:$0xff] }
 0x2db   : > { %v10176_v45 = vpop.f32.mrb[109].mxu1 }
 0x2dd   : > { %v7552_v3 = vpop.f32.mrb[148].mxu0  ;;  %7708 = vmatmul.mubr.msk.f32.gmra.mrb[142].mxu1 %vm3645_vm2, %v3590_v20  ;;  %v11261_v20 = vld [vmem:[#allocation40_spill] sm:$0xff] }
 0x2de   : > { %v10180_v60 = vadd.f32 %v7552_v3, %v11258_v18  ;;  %v2960_v40 = vpop.f32.mrb[149].mxu0  ;;  %v10182_v48 = vpop.f32.mrb[110].mxu1  ;;  %7732 = vmatprep.mubr.msk.f32.mxu1 %vm3645_vm2, %v9789_v25 }
 0x2df   : > { %v10187_v53 = vadd.f32 %v2960_v40, %v11259_v28  ;;  %v7553_v63 = vpop.f32.mrb[150].mxu0  ;;  %v10189_v55 = vpop.f32.mrb[111].mxu1  ;;  %v11266_v40 = vld [vmem:[#allocation43_spill] sm:$0xff] }
 0x2e0   : > { %v10192_v50 = vadd.f32 %v7553_v63, %v11260_v57  ;;  %v2963_v23 = vpop.f32.mrb[151].mxu0  ;;  %v11269_v57 = vld [vmem:[#allocation44_spill] sm:$0xff] }
 0x2e1   : > { %v10195_v14 = vadd.f32 %v2963_v23, %v11261_v20  ;;  %7733 = vmatmul.mubr.msk.f32.vlgmr.msra.gmra.mrb[120].mxu1 %vm3645_vm2, %v9799_v26 }
 0x2e2   : > { %v10199_v4 = vpop.f32.mrb[112].mxu1  ;;  %7735 = vmatprep.mubr.msk.f32.mxu1 %vm3645_vm2, %v9785_v30  ;;  %8057 = vmatpush3.bf16.msra.mxu1 %v11237_v52  ;;  %v11263_v30 = vld [vmem:[#allocation41_spill] sm:$0xff] }
 0x2e3   : > { %v10204_v25 = vpop.f32.mrb[113].mxu1  ;;  %8059 = vmatprep.subr.bf16.mxu1 %v9997_v41 }
 0x2e5   : > { %v7556_v12 = vpop.f32.mrb[152].mxu0  ;;  %7736 = vmatmul.mubr.msk.f32.gmra.mrb[122].mxu1 %vm3645_vm2, %v9795_v24  ;;  %v11265_v24 = vld [vmem:[#allocation42_spill] sm:$0xff] }
 0x2e6   : > { %v10210_v35 = vadd.f32 %v7556_v12, %v11262_v13  ;;  %v2976_v2 = vpop.f32.mrb[153].mxu0  ;;  %v10212_v26 = vpop.f32.mrb[114].mxu1  ;;  %7738 = vmatprep.mubr.msk.f32.mxu1 %vm3645_vm2, %v9813_v34  ;;  %8061 = vmatpush3.bf16.msra.mxu1 %v9997_v41 }
 0x2e7   : > { %v10218_v52 = vadd.f32 %v2976_v2, %v11263_v30  ;;  %v7557_v7 = vpop.f32.mrb[154].mxu0  ;;  %v10220_v38 = vpop.f32.mrb[115].mxu1  ;;  %8063 = vmatprep.subr.bf16.mxu1 %v10019_v61 }
 0x2e8   : > { %11264 = vst [vmem:[#allocation14_spill] sm:$0xff] %v10220_v38  ;;  %v10224_v3 = vadd.f32 %v7557_v7, %v11265_v24  ;;  %v2979_v18 = vpop.f32.mrb[155].mxu0  ;;  %v6633_v7 = vld [vmem:[%s11096_s5 + $0x20] sm:$0xff] }
 0x2e9   : > { %v10227_v28 = vadd.f32 %v2979_v18, %v11266_v40  ;;  %7739 = vmatmul.mubr.msk.f32.gmra.mrb[124].mxu1 %vm3645_vm2, %v9823_v11 }
 0x2ea   : > { %v10231_v34 = vpop.f32.mrb[116].mxu1  ;;  %7741 = vmatprep.mubr.msk.f32.mxu1 %vm3645_vm2, %v9809_v51  ;;  %8065 = vmatpush3.bf16.msra.mxu1 %v10019_v61  ;;  %v11271_v51 = vld [vmem:[#allocation45_spill] sm:$0xff] }
 0x2eb   : > { %11267 = vst [vmem:[#allocation15_spill] sm:$0xff] %v10231_v34  ;;  %v10236_v41 = vpop.f32.mrb[117].mxu1  ;;  %8067 = vmatprep.subr.bf16.mxu1 %v10032_v39 }
 0x2ec   : > { %11268 = vst [vmem:[#allocation16_spill] sm:$0xff] %v10236_v41 }
 0x2ed   : > { %v7560_v63 = vpop.f32.mrb[156].mxu0  ;;  %7742 = vmatmul.mubr.msk.f32.gmra.mrb[126].mxu1 %vm3645_vm2, %v9819_v16  ;;  %v11273_v16 = vld [vmem:[#allocation46_spill] sm:$0xff] }
 0x2ee   : > { %v10242_v23 = vadd.f32 %v7560_v63, %v11269_v57  ;;  %v2992_v20 = vpop.f32.mrb[157].mxu0  ;;  %v10244_v11 = vpop.f32.mrb[118].mxu1  ;;  %7744 = vmatprep.mubr.msk.f32.mxu1 %vm3645_vm2, %v9837_v36  ;;  %8069 = vmatpush3.bf16.msra.mxu1 %v10032_v39  ;;  %v6634_v36 = vld [vmem:[%s11096_s5 + $0x28] sm:$0xff]  ;;  %v11275_v63 = vld [vmem:[#allocation13_spill] sm:$0xff] }
 0x2ef   : > { %11270 = vst [vmem:[#allocation17_spill] sm:$0xff] %v10244_v11  ;;  %v10250_v61 = vadd.f32 %v2992_v20, %v11271_v51  ;;  %v7561_v12 = vpop.f32.mrb[158].mxu0  ;;  %v10252_v13 = vpop.f32.mrb[119].mxu1  ;;  %8071 = vmatprep.subr.bf16.mxu1 %v10059_v21  ;;  %v11274_v39 = vld [vmem:[#allocation47_spill] sm:$0xff]  ;;  %v10274_v18 = vpack.c.bf16 %v6634_v36, %v6633_v7  ;;  %v11277_v51 = vld [vmem:[#allocation49_spill] sm:$0xff] }
 0x2f0   : > { %11272 = vst [vmem:[#allocation18_spill] sm:$0xff] %v10252_v13  ;;  %v10256_v2 = vadd.f32 %v7561_v12, %v11273_v16  ;;  %v2995_v30 = vpop.f32.mrb[159].mxu0  ;;  %v11278_v16 = vld [vmem:[#allocation50_spill] sm:$0xff]  ;;  %v11290_v11 = vld [vmem:[#allocation85_spill] sm:$0xff] }
 0x2f1   : > { %v10265_v24 = vadd.f32 %v2995_v30, %v11274_v39  ;;  %7745 = vmatmul.mubr.msk.f32.gmra.mrb[128].mxu1 %vm3645_vm2, %v9845_v46  ;;  %v11280_v39 = vld [vmem:[#allocation52_spill] sm:$0xff] }
 0x2f2   : > { %7747 = vmatprep.mubr.msk.f32.mxu1 %vm3645_vm2, %v9833_v8  ;;  %8073 = vmatpush3.bf16.msra.mxu1 %v10059_v21  ;;  %v11276_v8 = vld [vmem:[#allocation48_spill] sm:$0xff] }
 0x2f3   : > { %7788 = vmatprep.subr.msk.mxu1 %vm3718_vm1, %v10078_v1 }
 0x2f5   : > { %v7564_v40 = vpop.f32.mrb[160].mxu0  ;;  %7748 = vmatmul.mubr.msk.f32.gmra.mrb[130].mxu1 %vm3645_vm2, %v9841_v43 }
 0x2f6   : > { %v10279_v57 = vadd.f32 %v7564_v40, %v11275_v63  ;;  %v3008_v20 = vpop.f32.mrb[161].mxu0  ;;  %7750 = vmatprep.mubr.msk.f32.mxu1 %vm3645_vm2, %v9857_v58  ;;  %7789 = vmatpush3.msk.msra.mxu1 %vm3718_vm1, %v10078_v1  ;;  %v11279_v1 = vld [vmem:[#allocation51_spill] sm:$0xff] }
 0x2f7   : > { %v10286_v46 = vadd.f32 %v3008_v20, %v11276_v8  ;;  %v7565_v21 = vpop.f32.mrb[162].mxu0  ;;  %8075 = vmatprep.subr.bf16.mxu1 %v10274_v18  ;;  %v11281_v20 = vld [vmem:[#allocation53_spill] sm:$0xff] }
 0x2f8   : > { %v10290_v12 = vadd.f32 %v7565_v21, %v11277_v51  ;;  %v3011_v43 = vpop.f32.mrb[163].mxu0 }
 0x2f9   : > { %v10293_v30 = vadd.f32 %v3011_v43, %v11278_v16  ;;  %7751 = vmatmul.mubr.msk.f32.gmra.mrb[132].mxu1 %vm3645_vm2, %v9865_v54  ;;  %v11284_v43 = vld [vmem:[#allocation81_spill] sm:$0xff]  ;;  %v11285_v16 = vld [vmem:[#allocation55_spill] sm:$0xff] }
 0x2fa   : > { %7753 = vmatprep.mubr.msk.f32.mxu1 %vm3645_vm2, %v9855_v15  ;;  %v11282_v15 = vld [vmem:[#allocation54_spill] sm:$0xff] }
 0x2fd   : > { %v7568_v58 = vpop.f32.mrb[164].mxu0  ;;  %7754 = vmatmul.mubr.msk.f32.gmra.mrb[134].mxu1 %vm3645_vm2, %v9861_v47  ;;  %v11283_v47 = vld [vmem:[#allocation80_spill] sm:$0xff] }
 0x2fe   : > { %v10302_v7 = vadd.f32 %v7568_v58, %v11279_v1  ;;  %v3024_v36 = vpop.f32.mrb[165].mxu0  ;;  %7756 = vmatprep.mubr.msk.f32.mxu1 %vm3645_vm2, %v9877_v5  ;;  %v3281_v5 = vadd.f32 %v9970_v29, %v10156_v62 }
 0x2ff   : > { %v10307_v40 = vadd.f32 %v3024_v36, %v11280_v39  ;;  %v7569_v63 = vpop.f32.mrb[166].mxu0  ;;  %v11286_v36 = vld [vmem:[#allocation83_spill] sm:$0xff]  ;;  %v3279_v39 = vadd.f32 %v9970_v29, %v10161_v6 }
 0x300   : > { %v10310_v54 = vadd.f32 %v7569_v63, %v11281_v20  ;;  %v3027_v8 = vpop.f32.mrb[167].mxu0  ;;  %v3473_v6 = vmax.f32 %v3281_v5, 0.0 }
 0x301   : > { %v10313_v21 = vadd.f32 %v3027_v8, %v11282_v15  ;;  %7757 = vmatmul.mubr.msk.f32.gmra.mrb[136].mxu1 %vm3645_vm2, %v9885_v49  ;;  %v11287_v49 = vld [vmem:[#allocation56_spill] sm:$0xff]  ;;  %v3282_v8 = vadd.f32 %v9970_v29, %v10167_v44  ;;  %v11291_v44 = vld [vmem:[#allocation82_spill] sm:$0xff] }
 0x302   : > { %7759 = vmatprep.mubr.msk.f32.mxu1 %vm3645_vm2, %v11283_v47  ;;  %v11288_v47 = vld [vmem:[#allocation57_spill] sm:$0xff] }
 0x303   : > { %v3474_v41 = vmax.f32 %v3282_v8, 0.0 }
 0x305   : > { %v7572_v51 = vpop.f32.mrb[168].mxu0  ;;  %7760 = vmatmul.mubr.msk.f32.gmra.mrb[138].mxu1 %vm3645_vm2, %v11284_v43 }
 0x306   : > { %v3049_v58 = vadd.f32 %v7572_v51, %v11285_v16  ;;  %v3040_v1 = vpop.f32.mrb[169].mxu0  ;;  %7762 = vmatprep.mubr.msk.f32.mxu1 %vm3645_vm2, %v11286_v36  ;;  %v3280_v51 = vadd.f32 %v9970_v29, %v10170_v59  ;;  %v11289_v36 = vld [vmem:[#allocation58_spill] sm:$0xff] }
 0x307   : > { %v3041_v63 = vadd.f32 %v3040_v1, %v11287_v49  ;;  %v7573_v20 = vpop.f32.mrb[170].mxu0 }
 0x308   : > { %v3305_v15 = vadd.f32 %v9970_v29, %v3049_v58  ;;  %v3052_v43 = vadd.f32 %v7573_v20, %v11288_v47  ;;  %v3043_v62 = vpop.f32.mrb[171].mxu0  ;;  %v3471_v58 = vmax.f32 %v3279_v39, 0.0  ;;  %v3472_v5 = vmax.f32 %v3280_v51, 0.0  ;;  %v11292_v39 = vld [vmem:[#allocation84_spill] sm:$0xff] }
 0x309   : > { %v3303_v16 = vadd.f32 %v9970_v29, %v3041_v63  ;;  %v3044_v13 = vadd.f32 %v3043_v62, %v11289_v36  ;;  %7763 = vmatmul.mubr.msk.f32.gmra.mrb[140].mxu1 %vm3645_vm2, %v11290_v11  ;;  %v6635_v63 = vld [vmem:[%s11096_s5 + $0x30] sm:$0xff]  ;;  %v6636_v11 = vld [vmem:[%s11096_s5 + $0x38] sm:$0x7] }
 0x30a   : > { %v3497_v1 = vmax.f32 %v3305_v15, 0.0  ;;  %v3306_v49 = vadd.f32 %v9970_v29, %v3052_v43  ;;  %7765 = vmatprep.mubr.msk.f32.mxu1 %vm3645_vm2, %v11291_v44  ;;  %v11294_v44 = vld [vmem:[#allocation60_spill] sm:$0xff] }
 0x30b   : > { %v3495_v20 = vmax.f32 %v3303_v16, 0.0  ;;  %v3304_v47 = vadd.f32 %v9970_v29, %v3044_v13  ;;  %v3285_v13 = vadd.f32 %v9970_v29, %v10180_v60  ;;  %v11293_v16 = vld [vmem:[#allocation59_spill] sm:$0xff]  ;;  %v11295_v60 = vld [vmem:[#allocation61_spill] sm:$0xff] }
 0x30c   : > { %v3593_v59 = vmax.f32 %v3473_v6, %v3497_v1  ;;  %v3498_v34 = vmax.f32 %v3306_v49, 0.0  ;;  %v3283_v1 = vadd.f32 %v9970_v29, %v10187_v53 }
 0x30d   : > { %v3591_v15 = vmax.f32 %v3471_v58, %v3495_v20  ;;  %v3496_v43 = vmax.f32 %v3304_v47, 0.0  ;;  %v7576_v62 = vpop.f32.mrb[172].mxu0  ;;  %7766 = vmatmul.mubr.msk.f32.gmra.mrb[142].mxu1 %vm3645_vm2, %v11292_v39  ;;  %v8078_v58 = vpack.c.bf16 %v6636_v11, %v6635_v63  ;;  %v3286_v20 = vadd.f32 %v9970_v29, %v10192_v50  ;;  %v11298_v11 = vld [vmem:[#allocation62_spill] sm:$0xff] }
 0x30e   : > { %v3594_v8 = vmax.f32 %v3474_v41, %v3498_v34  ;;  %v3065_v36 = vadd.f32 %v7576_v62, %v11293_v16  ;;  %v3056_v6 = vpop.f32.mrb[173].mxu0  ;;  %v3477_v50 = vmax.f32 %v3285_v13, 0.0  ;;  %v3475_v39 = vmax.f32 %v3283_v1, 0.0  ;;  %v11299_v1 = vld [vmem:[#allocation63_spill] sm:$0xff] }
 0x30f   : > { %v3592_v49 = vmax.f32 %v3472_v5, %v3496_v43  ;;  %v3057_v38 = vadd.f32 %v3056_v6, %v11294_v44  ;;  %v7577_v51 = vpop.f32.mrb[174].mxu0  ;;  %7790 = vmatprep.mubr.msk.f32.mxu1 %vm3645_vm2, %v3591_v15  ;;  %v3284_v5 = vadd.f32 %v9970_v29, %v10195_v14  ;;  %v3478_v14 = vmax.f32 %v3286_v20, 0.0 }
 0x310   : > { %v3309_v47 = vadd.f32 %v9970_v29, %v3065_v36  ;;  %v3068_v34 = vadd.f32 %v7577_v51, %v11295_v60  ;;  %v3059_v41 = vpop.f32.mrb[175].mxu0  ;;  %v3287_v20 = vadd.f32 %v9970_v29, %v10218_v52  ;;  %v11302_v52 = vld [vmem:[#allocation66_spill] sm:$0xff] }
 0x311   : > { %v3307_v63 = vadd.f32 %v9970_v29, %v3057_v38  ;;  %v3060_v15 = vadd.f32 %v3059_v41, %v11298_v11  ;;  %7791 = vmatmul.mubr.msk.f32.vlgmr.msra.gmra.mrb[144].mxu1 %vm3645_vm2, %v3592_v49  ;;  %v3476_v44 = vmax.f32 %v3284_v5, 0.0  ;;  %v11300_v41 = vld [vmem:[#allocation64_spill] sm:$0xff]  ;;  %v11301_v11 = vld [vmem:[#allocation65_spill] sm:$0xff] }
 0x312   : > { %v3501_v43 = vmax.f32 %v3309_v47, 0.0  ;;  %v3310_v62 = vadd.f32 %v9970_v29, %v3068_v34  ;;  %7793 = vmatprep.mubr.msk.f32.mxu1 %vm3645_vm2, %v3593_v59  ;;  %8077 = vmatpush3.bf16.msra.mxu1 %v10274_v18  ;;  %v3289_v59 = vadd.f32 %v9970_v29, %v10210_v35 }
 0x313   : > { %v3499_v16 = vmax.f32 %v3307_v63, 0.0  ;;  %v3308_v36 = vadd.f32 %v9970_v29, %v3060_v15  ;;  %8080 = vmatprep.subr.msk.bf16.mxu1 %vm10364_vm5, %v8078_v58 }
 0x314   : > { %v3597_v38 = vmax.f32 %v3477_v50, %v3501_v43  ;;  %v3502_v6 = vmax.f32 %v3310_v62, 0.0 }
 0x315   : > { %v3595_v49 = vmax.f32 %v3475_v39, %v3499_v16  ;;  %v3500_v13 = vmax.f32 %v3308_v36, 0.0  ;;  %v7580_v51 = vpop.f32.mrb[176].mxu0  ;;  %7794 = vmatmul.mubr.msk.f32.gmra.mrb[146].mxu1 %vm3645_vm2, %v3594_v8  ;;  %v3290_v8 = vadd.f32 %v9970_v29, %v10224_v3  ;;  %v3481_v39 = vmax.f32 %v3289_v59, 0.0 }
 0x316   : > { %v3598_v18 = vmax.f32 %v3478_v14, %v3502_v6  ;;  %v3081_v47 = vadd.f32 %v7580_v51, %v11299_v1  ;;  %v3072_v60 = vpop.f32.mrb[177].mxu0  ;;  %8083 = vmatpush3.bf16.msk.msra.mxu1 %vm10364_vm5, %v8078_v58  ;;  %v3288_v58 = vadd.f32 %v9970_v29, %v10227_v28  ;;  %v3479_v3 = vmax.f32 %v3287_v20, 0.0 }
 0x317   : > { %v3596_v34 = vmax.f32 %v3476_v44, %v3500_v13  ;;  %v3073_v5 = vadd.f32 %v3072_v60, %v11300_v41  ;;  %v7581_v63 = vpop.f32.mrb[178].mxu0  ;;  %7796 = vmatprep.mubr.msk.f32.mxu1 %vm3645_vm2, %v3595_v49  ;;  %v3482_v44 = vmax.f32 %v3290_v8, 0.0  ;;  %v3293_v59 = vadd.f32 %v9970_v29, %v10242_v23 }
 0x318   : > { %v3313_v35 = vadd.f32 %v9970_v29, %v3081_v47  ;;  %v3084_v15 = vadd.f32 %v7581_v63, %v11301_v11  ;;  %v3075_v50 = vpop.f32.mrb[179].mxu0  ;;  %v3480_v28 = vmax.f32 %v3288_v58, 0.0  ;;  %v3291_v20 = vadd.f32 %v9970_v29, %v10250_v61  ;;  %v11304_v63 = vld [vmem:[#allocation68_spill] sm:$0xff]  ;;  %v11306_v61 = vld [vmem:[#allocation71_spill] sm:$0xff] }
 0x319   : > { %v3311_v43 = vadd.f32 %v9970_v29, %v3073_v5  ;;  %v3076_v62 = vadd.f32 %v3075_v50, %v11302_v52  ;;  %7797 = vmatmul.mubr.msk.f32.gmra.mrb[148].mxu1 %vm3645_vm2, %v3596_v34  ;;  %v11303_v34 = vld [vmem:[#allocation67_spill] sm:$0xff]  ;;  %v3294_v11 = vadd.f32 %v9970_v29, %v10256_v2  ;;  %v3292_v58 = vadd.f32 %v9970_v29, %v10265_v24 }
 0x31a   : > { %v3505_v16 = vmax.f32 %v3313_v35, 0.0  ;;  %v3314_v36 = vadd.f32 %v9970_v29, %v3084_v15  ;;  %7799 = vmatprep.mubr.msk.f32.mxu1 %vm3645_vm2, %v3597_v38  ;;  %v11305_v15 = vld [vmem:[#allocation70_spill] sm:$0xff]  ;;  %v3483_v2 = vmax.f32 %v3291_v20, 0.0  ;;  %v11308_v20 = vld [vmem:[#allocation73_spill] sm:$0xff] }
 0x31b   : > { %v3503_v14 = vmax.f32 %v3311_v43, 0.0  ;;  %v3312_v6 = vadd.f32 %v9970_v29, %v3076_v62  ;;  %v3485_v62 = vmax.f32 %v3293_v59, 0.0  ;;  %v3484_v24 = vmax.f32 %v3292_v58, 0.0  ;;  %v11307_v59 = vld [vmem:[#allocation72_spill] sm:$0xff] }
 0x31c   : > { %v3601_v49 = vmax.f32 %v3481_v39, %v3505_v16  ;;  %v3506_v13 = vmax.f32 %v3314_v36, 0.0 }
 0x31d   : > { %v3599_v51 = vmax.f32 %v3479_v3, %v3503_v14  ;;  %v3504_v1 = vmax.f32 %v3312_v6, 0.0  ;;  %v7584_v47 = vpop.f32.mrb[180].mxu0  ;;  %7800 = vmatmul.mubr.msk.f32.gmra.mrb[150].mxu1 %vm3645_vm2, %v3598_v18  ;;  %v3486_v14 = vmax.f32 %v3294_v11, 0.0 }
 0x31e   : > { %v3602_v60 = vmax.f32 %v3482_v44, %v3506_v13  ;;  %v3097_v41 = vadd.f32 %v7584_v47, %v11303_v34  ;;  %v3088_v38 = vpop.f32.mrb[181].mxu0 }
 0x31f   : > { %v3600_v5 = vmax.f32 %v3480_v28, %v3504_v1  ;;  %v3089_v8 = vadd.f32 %v3088_v38, %v11304_v63  ;;  %v7585_v35 = vpop.f32.mrb[182].mxu0  ;;  %7802 = vmatprep.mubr.msk.f32.mxu1 %vm3645_vm2, %v3599_v51  ;;  %v3297_v1 = vadd.f32 %v9970_v29, %v10279_v57 }
 0x320   : > { %v3317_v18 = vadd.f32 %v9970_v29, %v3097_v41  ;;  %v3100_v23 = vadd.f32 %v7585_v35, %v11305_v15  ;;  %v3091_v50 = vpop.f32.mrb[183].mxu0  ;;  %v3295_v41 = vadd.f32 %v9970_v29, %v10286_v46  ;;  %v11309_v35 = vld [vmem:[#allocation74_spill] sm:$0xff]  ;;  %v11310_v46 = vld [vmem:[#allocation75_spill] sm:$0xff] }
 0x321   : > { %v3315_v43 = vadd.f32 %v9970_v29, %v3089_v8  ;;  %v3092_v52 = vadd.f32 %v3091_v50, %v11306_v61  ;;  %7803 = vmatmul.mubr.msk.f32.gmra.mrb[152].mxu1 %vm3645_vm2, %v3600_v5  ;;  %v3298_v8 = vadd.f32 %v9970_v29, %v10290_v12  ;;  %v3489_v50 = vmax.f32 %v3297_v1, 0.0  ;;  %v11312_v1 = vld [vmem:[#allocation77_spill] sm:$0xff] }
 0x322   : > { %v3509_v39 = vmax.f32 %v3317_v18, 0.0  ;;  %v3318_v16 = vadd.f32 %v9970_v29, %v3100_v23  ;;  %7805 = vmatprep.mubr.msk.f32.mxu1 %vm3645_vm2, %v3601_v49  ;;  %v3296_v18 = vadd.f32 %v9970_v29, %v10293_v30  ;;  %v3487_v12 = vmax.f32 %v3295_v41, 0.0  ;;  %v11313_v41 = vld [vmem:[#allocation78_spill] sm:$0xff] }
 0x323   : > { %v3507_v36 = vmax.f32 %v3315_v43, 0.0  ;;  %v3316_v3 = vadd.f32 %v9970_v29, %v3092_v52 }
 0x324   : > { %v3605_v6 = vmax.f32 %v3485_v62, %v3509_v39  ;;  %v3510_v44 = vmax.f32 %v3318_v16, 0.0  ;;  %v3490_v62 = vmax.f32 %v3298_v8, 0.0  ;;  %v3488_v30 = vmax.f32 %v3296_v18, 0.0 }
 0x325   : > { %v3603_v13 = vmax.f32 %v3483_v2, %v3507_v36  ;;  %v3508_v28 = vmax.f32 %v3316_v3, 0.0  ;;  %v7588_v51 = vpop.f32.mrb[184].mxu0  ;;  %7806 = vmatmul.mubr.msk.f32.gmra.mrb[154].mxu1 %vm3645_vm2, %v3602_v60 }
 0x326   : > { %v3606_v47 = vmax.f32 %v3486_v14, %v3510_v44  ;;  %v3113_v34 = vadd.f32 %v7588_v51, %v11307_v59  ;;  %v3104_v49 = vpop.f32.mrb[185].mxu0  ;;  %v3301_v14 = vadd.f32 %v9970_v29, %v10302_v7 }
 0x327   : > { %v3604_v38 = vmax.f32 %v3484_v24, %v3508_v28  ;;  %v3105_v5 = vadd.f32 %v3104_v49, %v11308_v20  ;;  %v7589_v63 = vpop.f32.mrb[186].mxu0  ;;  %7808 = vmatprep.mubr.msk.f32.mxu1 %vm3645_vm2, %v3603_v13  ;;  %v11311_v24 = vld [vmem:[#allocation76_spill] sm:$0xff]  ;;  %v3299_v28 = vadd.f32 %v9970_v29, %v10307_v40  ;;  %v3302_v49 = vadd.f32 %v9970_v29, %v10310_v54  ;;  %v11314_v40 = vld [vmem:[#allocation79_spill] sm:$0xff] }
 0x328   : > { %v3321_v60 = vadd.f32 %v9970_v29, %v3113_v34  ;;  %v3116_v57 = vadd.f32 %v7589_v63, %v11309_v35  ;;  %v3107_v11 = vpop.f32.mrb[187].mxu0  ;;  %v3300_v20 = vadd.f32 %v9970_v29, %v10313_v21  ;;  %v3493_v8 = vmax.f32 %v3301_v14, 0.0 }
 0x329   : > { %v3319_v15 = vadd.f32 %v9970_v29, %v3105_v5  ;;  %v3108_v23 = vadd.f32 %v3107_v11, %v11310_v46  ;;  %7809 = vmatmul.mubr.msk.f32.gmra.mrb[156].mxu1 %vm3645_vm2, %v3604_v38  ;;  %v3491_v54 = vmax.f32 %v3299_v28, 0.0  ;;  %v8581_v11 = vld [vmem:[%s11093_s2] ss:$0 sm:$0xff]  ;;  %v3494_v21 = vmax.f32 %v3302_v49, 0.0  ;;  %v5125_v28 = vld [vmem:[%s11096_s5 + $0x10] sm:$0xff] }
 0x32a   : > { %v3513_v58 = vmax.f32 %v3321_v60, 0.0  ;;  %v3322_v43 = vadd.f32 %v9970_v29, %v3116_v57  ;;  %7811 = vmatprep.mubr.msk.f32.mxu1 %vm3645_vm2, %v3605_v6 }
 0x32b   : > { %v3511_v61 = vmax.f32 %v3319_v15, 0.0  ;;  %v3320_v52 = vadd.f32 %v9970_v29, %v3108_v23  ;;  %v3492_v23 = vmax.f32 %v3300_v20, 0.0 }
 0x32c   : > { %v3609_v39 = vmax.f32 %v3489_v50, %v3513_v58  ;;  %v3514_v16 = vmax.f32 %v3322_v43, 0.0 }
 0x32d   : > { %v3607_v2 = vmax.f32 %v3487_v12, %v3511_v61  ;;  %v3512_v36 = vmax.f32 %v3320_v52, 0.0  ;;  %v7592_v3 = vpop.f32.mrb[188].mxu0  ;;  %7812 = vmatmul.mubr.msk.f32.gmra.mrb[158].mxu1 %vm3645_vm2, %v3606_v47  ;;  %v5124_v61 = vld [vmem:[%s11096_s5 + $0x8] sm:$0xff] }
 0x32e   : > { %v3610_v44 = vmax.f32 %v3490_v62, %v3514_v16  ;;  %v3129_v13 = vadd.f32 %v7592_v3, %v11311_v24  ;;  %v3120_v6 = vpop.f32.mrb[189].mxu0  ;;  %v10477_v62 = vld [vmem:[%s11095_s4] ss:$0 sm:$0xff] }
 0x32f   : > { %v3608_v51 = vmax.f32 %v3488_v30, %v3512_v36  ;;  %v3121_v59 = vadd.f32 %v3120_v6, %v11312_v1  ;;  %v7593_v34 = vpop.f32.mrb[190].mxu0  ;;  %7814 = vmatprep.mubr.msk.f32.mxu1 %vm3645_vm2, %v3607_v2  ;;  %v3789_v16 = vadd.f32 %v10477_v62, %v10091_v37  ;;  %v3809_v20 = vadd.f32 %v10477_v62, %v10124_v9 }
 0x330   : > { %v3325_v47 = vadd.f32 %v9970_v29, %v3129_v13  ;;  %v3132_v7 = vadd.f32 %v7593_v34, %v11313_v41  ;;  %v3123_v38 = vpop.f32.mrb[191].mxu0 }
 0x331   : > { %v3323_v5 = vadd.f32 %v9970_v29, %v3121_v59  ;;  %v3124_v63 = vadd.f32 %v3123_v38, %v11314_v40  ;;  %7815 = vmatmul.mubr.msk.f32.gmra.mrb[160].mxu1 %vm3645_vm2, %v3608_v51  ;;  %v3907_v13 = vmax.f32 %v3789_v16, 0.0  ;;  %v5126_v51 = vld [vmem:[%s11096_s5 + $0x18] sm:$0x7] }
 0x332   : > { %v3517_v60 = vmax.f32 %v3325_v47, 0.0  ;;  %v3326_v35 = vadd.f32 %v9970_v29, %v3132_v7  ;;  %7817 = vmatprep.mubr.msk.f32.mxu1 %vm3645_vm2, %v3609_v39  ;;  %v5123_v29 = vld [vmem:[%s11096_s5] sm:$0xff]  ;;  %v3794_v39 = vadd.f32 %v10086_v32, %v10477_v62  ;;  %v3799_v32 = vadd.f32 %v10477_v62, %v10106_v22 }
 0x333   : > { %v3515_v57 = vmax.f32 %v3323_v5, 0.0  ;;  %v3324_v18 = vadd.f32 %v8581_v11, %v3124_v63  ;;  %v8084_v52 = vpack.c.bf16 %v5124_v61, %v5123_v29  ;;  %v3814_v47 = vadd.f32 %v10120_v19, %v10477_v62 }
 0x334   : > { %v3613_v15 = vmax.f32 %v3493_v8, %v3517_v60  ;;  %v3518_v46 = vmax.f32 %v3326_v35, 0.0  ;;  %v3908_v14 = vmax.f32 %v3794_v39, 0.0  ;;  %v8088_v7 = vpack.c.bf16 %v5126_v51, %v5125_v28 }
 0x335   : > { %v3611_v50 = vmax.f32 %v3491_v54, %v3515_v57  ;;  %v3516_v58 = vmax.f32 %v3324_v18, 0.0  ;;  %7818 = vmatmul.mubr.msk.f32.gmra.mrb[162].mxu1 %vm3645_vm2, %v3610_v44  ;;  %8085 = vmatprep.subr.bf16.mxu1 %v8084_v52  ;;  %v3804_v44 = vadd.f32 %v10099_v33, %v10477_v62  ;;  %v3909_v38 = vmax.f32 %v3799_v32, 0.0 }
 0x336   : > { %v3614_v43 = vmax.f32 %v3494_v21, %v3518_v46  ;;  %v3912_v9 = vmax.f32 %v3814_v47, 0.0  ;;  %v3824_v54 = vadd.f32 %v10130_v42, %v10477_v62  ;;  %v3911_v11 = vmax.f32 %v3809_v20, 0.0 }
 0x337   : > { %v3612_v12 = vmax.f32 %v3492_v23, %v3516_v58  ;;  %7820 = vmatprep.mubr.msk.f32.mxu1 %vm3645_vm2, %v3611_v50  ;;  %v3910_v49 = vmax.f32 %v3804_v44, 0.0  ;;  %v3819_v18 = vadd.f32 %v10477_v62, %v10135_v27  ;;  %v3829_v61 = vadd.f32 %v10477_v62, %v10152_v10 }
 0x338   : > { %v3914_v27 = vmax.f32 %v3824_v54, 0.0  ;;  %v3839_v32 = vadd.f32 %v10477_v62, %v10163_v56  ;;  %v3864_v54 = vadd.f32 %v10182_v48, %v10477_v62 }
 0x339   : > { %7821 = vmatmul.mubr.msk.f32.gmra.mrb[164].mxu1 %vm3645_vm2, %v3612_v12  ;;  %v3913_v29 = vmax.f32 %v3819_v18, 0.0 }
 0x33a   : > { %7823 = vmatprep.mubr.msk.f32.mxu1 %vm3645_vm2, %v3613_v15 }
 0x33d   : > { %7824 = vmatmul.mubr.msk.f32.gmra.mrb[166].mxu1 %vm3645_vm2, %v3614_v43  ;;  %v3834_v43 = vadd.f32 %v10148_v17, %v10477_v62 }
 0x33f   : > { %v3916_v10 = vmax.f32 %v3834_v43, 0.0 }
 0x3b4   : > { %v7734_v30 = vpop.f32.mrb[120].mxu1 }
 0x3b5   : > { %v10484_v2 = vadd.f32 %v7734_v30, %v10477_v62  ;;  %v4329_v36 = vpop.f32.mrb[121].mxu1 }
 0x3b6   : > { %v10487_v3 = vadd.f32 %v10477_v62, %v4329_v36 }
 0x3b7   : > { %v4473_v24 = vmax.f32 %v10484_v2, 0.0 }
 0x3b8   : > { %v4472_v37 = vmax.f32 %v10487_v3, 0.0  ;;  %v7737_v6 = vpop.f32.mrb[122].mxu1 }
 0x3b9   : > { %v4778_v33 = vmax.f32 %v3908_v14, %v4473_v24  ;;  %v10504_v1 = vadd.f32 %v7737_v6, %v10477_v62  ;;  %v4339_v59 = vpop.f32.mrb[123].mxu1  ;;  %v3844_v14 = vadd.f32 %v10158_v0, %v10477_v62 }
 0x3ba   : > { %v4777_v22 = vmax.f32 %v3907_v13, %v4472_v37  ;;  %v10509_v34 = vadd.f32 %v10477_v62, %v4339_v59  ;;  %v3915_v13 = vmax.f32 %v3829_v61, 0.0  ;;  %v3874_v61 = vadd.f32 %v10199_v4, %v10477_v62 }
 0x3bb   : > { %v4475_v41 = vmax.f32 %v10504_v1, 0.0  ;;  %v3918_v56 = vmax.f32 %v3844_v14, 0.0 }
 0x3bc   : > { %v4474_v5 = vmax.f32 %v10509_v34, 0.0  ;;  %v7740_v40 = vpop.f32.mrb[124].mxu1  ;;  %7834 = vmatprep.mubr.msk.f32.mxu1 %vm4837_vm6, %v4777_v22 }
 0x3bd   : > { %v4780_v63 = vmax.f32 %v3910_v49, %v4475_v41  ;;  %v10521_v8 = vadd.f32 %v7740_v40, %v10477_v62  ;;  %v4349_v60 = vpop.f32.mrb[125].mxu1  ;;  %7835 = vmatmul.mubr.msk.f32.vlgmr.msra.gmra.mrb[168].mxu1 %vm4837_vm6, %v4778_v33  ;;  %v3854_v49 = vadd.f32 %v10173_v31, %v10477_v62 }
 0x3be   : > { %v4779_v19 = vmax.f32 %v3909_v38, %v4474_v5  ;;  %v10527_v35 = vadd.f32 %v10477_v62, %v4349_v60  ;;  %8087 = vmatpush3.bf16.msra.mxu1 %v8084_v52  ;;  %v3849_v38 = vadd.f32 %v10477_v62, %v10176_v45 }
 0x3bf   : > { %v4477_v57 = vmax.f32 %v10521_v8, 0.0  ;;  %8090 = vmatprep.subr.msk.bf16.mxu1 %vm10364_vm5, %v8088_v7  ;;  %v3920_v45 = vmax.f32 %v3854_v49, 0.0 }
 0x3c0   : > { %v4476_v21 = vmax.f32 %v10527_v35, 0.0  ;;  %v7743_v15 = vpop.f32.mrb[126].mxu1  ;;  %7837 = vmatprep.mubr.msk.f32.mxu1 %vm4837_vm6, %v4779_v19  ;;  %v3919_v18 = vmax.f32 %v3849_v38, 0.0 }
 0x3c1   : > { %v4782_v46 = vmax.f32 %v3912_v9, %v4477_v57  ;;  %v10541_v23 = vadd.f32 %v7743_v15, %v10477_v62  ;;  %v4359_v42 = vpop.f32.mrb[127].mxu1  ;;  %7838 = vmatmul.mubr.msk.f32.gmra.mrb[170].mxu1 %vm4837_vm6, %v4780_v63  ;;  %v3859_v15 = vadd.f32 %v10477_v62, %v10189_v55  ;;  %v3922_v55 = vmax.f32 %v3864_v54, 0.0  ;;  %v11316_v54 = vld [vmem:[#allocation15_spill] sm:$0xff] }
 0x3c2   : > { %v4781_v50 = vmax.f32 %v3911_v11, %v4476_v21  ;;  %v10547_v58 = vadd.f32 %v10477_v62, %v4359_v42  ;;  %8093 = vmatpush3.bf16.msk.msra.mxu1 %vm10364_vm5, %v8088_v7  ;;  %v3917_v7 = vmax.f32 %v3839_v32, 0.0 }
 0x3c3   : > { %v4479_v12 = vmax.f32 %v10541_v23, 0.0 }
 0x3c4   : > { %v4478_v52 = vmax.f32 %v10547_v58, 0.0  ;;  %v7746_v39 = vpop.f32.mrb[128].mxu1  ;;  %7840 = vmatprep.mubr.msk.f32.mxu1 %vm4837_vm6, %v4781_v50 }
 0x3c5   : > { %v4784_v16 = vmax.f32 %v3914_v27, %v4479_v12  ;;  %v10561_v53 = vadd.f32 %v7746_v39, %v10477_v62  ;;  %v4369_v30 = vpop.f32.mrb[129].mxu1  ;;  %7841 = vmatmul.mubr.msk.f32.gmra.mrb[172].mxu1 %vm4837_vm6, %v4782_v46 }
 0x3c6   : > { %v4783_v17 = vmax.f32 %v3913_v29, %v4478_v52  ;;  %v10567_v36 = vadd.f32 %v10477_v62, %v4369_v30  ;;  %v3869_v30 = vadd.f32 %v10477_v62, %v10204_v25  ;;  %v3924_v25 = vmax.f32 %v3874_v61, 0.0 }
 0x3c7   : > { %v4481_v44 = vmax.f32 %v10561_v53, 0.0 }
 0x3c8   : > { %v4480_v6 = vmax.f32 %v10567_v36, 0.0  ;;  %v7749_v28 = vpop.f32.mrb[130].mxu1  ;;  %7843 = vmatprep.mubr.msk.f32.mxu1 %vm4837_vm6, %v4783_v17 }
 0x3c9   : > { %v4786_v51 = vmax.f32 %v3916_v10, %v4481_v44  ;;  %v10579_v33 = vadd.f32 %v7749_v28, %v10477_v62  ;;  %v4379_v59 = vpop.f32.mrb[131].mxu1  ;;  %7844 = vmatmul.mubr.msk.f32.gmra.mrb[174].mxu1 %vm4837_vm6, %v4784_v16  ;;  %v3921_v16 = vmax.f32 %v3859_v15, 0.0 }
 0x3ca   : > { %v4785_v0 = vmax.f32 %v3915_v13, %v4480_v6  ;;  %v10585_v22 = vadd.f32 %v10477_v62, %v4379_v59 }
 0x3cb   : > { %v4483_v47 = vmax.f32 %v10579_v33, 0.0 }
 0x3cc   : > { %v4482_v20 = vmax.f32 %v10585_v22, 0.0  ;;  %v7752_v40 = vpop.f32.mrb[132].mxu1  ;;  %7846 = vmatprep.mubr.msk.f32.mxu1 %vm4837_vm6, %v4785_v0  ;;  %v3923_v0 = vmax.f32 %v3869_v30, 0.0 }
 0x3cd   : > { %v4788_v63 = vmax.f32 %v3918_v56, %v4483_v47  ;;  %v10597_v60 = vadd.f32 %v7752_v40, %v10477_v62  ;;  %v4389_v19 = vpop.f32.mrb[133].mxu1  ;;  %7847 = vmatmul.mubr.msk.f32.gmra.mrb[176].mxu1 %vm4837_vm6, %v4786_v51  ;;  %v3884_v51 = vadd.f32 %v10212_v26, %v10477_v62  ;;  %v11315_v56 = vld [vmem:[#allocation14_spill] sm:$0xff] }
 0x3ce   : > { %v4787_v31 = vmax.f32 %v3917_v7, %v4482_v20  ;;  %v10603_v9 = vadd.f32 %v10477_v62, %v4389_v19  ;;  %v3879_v49 = vadd.f32 %v10477_v62, %v11315_v56  ;;  %v11319_v56 = vld [vmem:[#allocation18_spill] sm:$0xff] }
 0x3cf   : > { %v4485_v11 = vmax.f32 %v10597_v60, 0.0 }
 0x3d0   : > { %v4484_v46 = vmax.f32 %v10603_v9, 0.0  ;;  %v7755_v42 = vpop.f32.mrb[134].mxu1  ;;  %7849 = vmatprep.mubr.msk.f32.mxu1 %vm4837_vm6, %v4787_v31 }
 0x3d1   : > { %v4790_v50 = vmax.f32 %v3920_v45, %v4485_v11  ;;  %v10615_v27 = vadd.f32 %v7755_v42, %v10477_v62  ;;  %v4399_v43 = vpop.f32.mrb[135].mxu1  ;;  %7850 = vmatmul.mubr.msk.f32.gmra.mrb[178].mxu1 %vm4837_vm6, %v4788_v63  ;;  %v3926_v45 = vmax.f32 %v3884_v51, 0.0  ;;  %v3925_v42 = vmax.f32 %v3879_v49, 0.0 }
 0x3d2   : > { %v4789_v48 = vmax.f32 %v3919_v18, %v4484_v46  ;;  %v10621_v29 = vadd.f32 %v10477_v62, %v4399_v43  ;;  %v3894_v18 = vadd.f32 %v11316_v54, %v10477_v62  ;;  %v3899_v49 = vadd.f32 %v10477_v62, %v11319_v56 }
 0x3d3   : > { %v4487_v39 = vmax.f32 %v10615_v27, 0.0 }
 0x3d4   : > { %v4486_v17 = vmax.f32 %v10621_v29, 0.0  ;;  %v7758_v10 = vpop.f32.mrb[136].mxu1  ;;  %7852 = vmatprep.mubr.msk.f32.mxu1 %vm4837_vm6, %v4789_v48 }
 0x3d5   : > { %v4792_v14 = vmax.f32 %v3922_v55, %v4487_v39  ;;  %v10633_v13 = vadd.f32 %v7758_v10, %v10477_v62  ;;  %v4409_v32 = vpop.f32.mrb[137].mxu1  ;;  %7853 = vmatmul.mubr.msk.f32.gmra.mrb[180].mxu1 %vm4837_vm6, %v4790_v50  ;;  %v11317_v50 = vld [vmem:[#allocation16_spill] sm:$0xff] }
 0x3d6   : > { %v4791_v4 = vmax.f32 %v3921_v16, %v4486_v17  ;;  %v10639_v28 = vadd.f32 %v10477_v62, %v4409_v32  ;;  %v3889_v43 = vadd.f32 %v10477_v62, %v11317_v50  ;;  %v3928_v32 = vmax.f32 %v3894_v18, 0.0 }
 0x3d7   : > { %v4489_v59 = vmax.f32 %v10633_v13, 0.0 }
 0x3d8   : > { %v4488_v7 = vmax.f32 %v10639_v28, 0.0  ;;  %v7761_v38 = vpop.f32.mrb[138].mxu1  ;;  %7855 = vmatprep.mubr.msk.f32.mxu1 %vm4837_vm6, %v4791_v4  ;;  %v11318_v4 = vld [vmem:[#allocation17_spill] sm:$0xff] }
 0x3d9   : > { %v4794_v40 = vmax.f32 %v3924_v25, %v4489_v59  ;;  %v10651_v63 = vadd.f32 %v7761_v38, %v10477_v62  ;;  %v4419_v19 = vpop.f32.mrb[139].mxu1  ;;  %7856 = vmatmul.mubr.msk.f32.gmra.mrb[182].mxu1 %vm4837_vm6, %v4792_v14  ;;  %v3904_v25 = vadd.f32 %v11318_v4, %v10477_v62 }
 0x3da   : > { %v4793_v26 = vmax.f32 %v3923_v0, %v4488_v7  ;;  %v10657_v31 = vadd.f32 %v10477_v62, %v4419_v19  ;;  %v3927_v0 = vmax.f32 %v3889_v43, 0.0  ;;  %v3929_v43 = vmax.f32 %v3899_v49, 0.0 }
 0x3db   : > { %v4491_v15 = vmax.f32 %v10651_v63, 0.0 }
 0x3dc   : > { %v4490_v48 = vmax.f32 %v10657_v31, 0.0  ;;  %v7764_v55 = vpop.f32.mrb[140].mxu1  ;;  %7858 = vmatprep.mubr.msk.f32.mxu1 %vm4837_vm6, %v4793_v26 }
 0x3dd   : > { %v4796_v61 = vmax.f32 %v3926_v45, %v4491_v15  ;;  %v10669_v16 = vadd.f32 %v7764_v55, %v10477_v62  ;;  %v4429_v30 = vpop.f32.mrb[141].mxu1  ;;  %7859 = vmatmul.mubr.msk.f32.gmra.mrb[184].mxu1 %vm4837_vm6, %v4794_v40 }
 0x3de   : > { %v4795_v10 = vmax.f32 %v3925_v42, %v4490_v48  ;;  %v10675_v14 = vadd.f32 %v10477_v62, %v4429_v30  ;;  %v3930_v42 = vmax.f32 %v3904_v25, 0.0 }
 0x3df   : > { %v4493_v51 = vmax.f32 %v10669_v16, 0.0 }
 0x3e0   : > { %v4492_v38 = vmax.f32 %v10675_v14, 0.0  ;;  %v7767_v19 = vpop.f32.mrb[142].mxu1  ;;  %7861 = vmatprep.mubr.msk.f32.mxu1 %vm4837_vm6, %v4795_v10  ;;  %v5413_v14 = vld [vmem:[%s11099_s8] sm:$0xff] }
 0x3e1   : > { %v4798_v40 = vmax.f32 %v3928_v32, %v4493_v51  ;;  %v10687_v26 = vadd.f32 %v7767_v19, %v10477_v62  ;;  %v4439_v45 = vpop.f32.mrb[143].mxu1  ;;  %7862 = vmatmul.mubr.msk.f32.gmra.mrb[186].mxu1 %vm4837_vm6, %v4796_v61 }
 0x3e2   : > { %v4797_v54 = vmax.f32 %v3927_v0, %v4492_v38  ;;  %v10693_v18 = vadd.f32 %v10477_v62, %v4439_v45 }
 0x3e3   : > { %v4495_v50 = vmax.f32 %v10687_v26, 0.0  ;;  %v5411_v26 = vld [vmem:[%s11098_s7] sm:$0xff] }
 0x3e4   : > { %v4494_v55 = vmax.f32 %v10693_v18, 0.0  ;;  %v7792_v30 = vpop.f32.mrb[144].mxu1  ;;  %7864 = vmatprep.mubr.msk.f32.mxu1 %vm4837_vm6, %v4797_v54  ;;  %v5412_v18 = vld [vmem:[%s11098_s7 + $0x8] sm:$0x1] }
 0x3e5   : > { %v4800_v10 = vmax.f32 %v3930_v42, %v4495_v50  ;;  %v4640_v61 = vadd.f32 %v7792_v30, %v10477_v62  ;;  %v4634_v32 = vpop.f32.mrb[145].mxu1  ;;  %7865 = vmatmul.mubr.msk.f32.gmra.mrb[188].mxu1 %vm4837_vm6, %v4798_v40 }
 0x3e6   : > { %v4799_v4 = vmax.f32 %v3929_v43, %v4494_v55  ;;  %v4635_v25 = vadd.f32 %v10477_v62, %v4634_v32 }
 0x3e7   : > { %v4754_v0 = vmax.f32 %v4640_v61, 0.0 }
 0x3e8   : > { %v4753_v56 = vmax.f32 %v4635_v25, 0.0  ;;  %v7795_v49 = vpop.f32.mrb[146].mxu1  ;;  %7867 = vmatprep.mubr.msk.f32.mxu1 %vm4837_vm6, %v4799_v4 }
 0x3e9   : > { %v4802_v19 = vmax.f32 %v4473_v24, %v4754_v0  ;;  %v4650_v45 = vadd.f32 %v7795_v49, %v10477_v62  ;;  %v4644_v54 = vpop.f32.mrb[147].mxu1  ;;  %7868 = vmatmul.mubr.msk.f32.gmra.mrb[190].mxu1 %vm4837_vm6, %v4800_v10 }
 0x3ea   : > { %v4801_v40 = vmax.f32 %v4472_v37, %v4753_v56  ;;  %v4645_v42 = vadd.f32 %v10477_v62, %v4644_v54 }
 0x3eb   : > { %v4756_v43 = vmax.f32 %v4650_v45, 0.0 }
 0x3ec   : > { %v4755_v30 = vmax.f32 %v4645_v42, 0.0  ;;  %v7798_v61 = vpop.f32.mrb[148].mxu1  ;;  %7878 = vmatprep.mubr.msk.f32.mxu1 %vm4837_vm6, %v4801_v40 }
 0x3ed   : > { %v4804_v32 = vmax.f32 %v4475_v41, %v4756_v43  ;;  %v4660_v2 = vadd.f32 %v7798_v61, %v10477_v62  ;;  %v4654_v24 = vpop.f32.mrb[149].mxu1  ;;  %7879 = vmatmul.mubr.msk.f32.vlgmr.msra.gmra.mrb[192].mxu1 %vm4837_vm6, %v4802_v19 }
 0x3ee   : > { %v4803_v10 = vmax.f32 %v4474_v5, %v4755_v30  ;;  %v4655_v3 = vadd.f32 %v10477_v62, %v4654_v24 }
 0x3ef   : > { %v4758_v37 = vmax.f32 %v4660_v2, 0.0 }
 0x3f0   : > { %v4757_v4 = vmax.f32 %v4655_v3, 0.0  ;;  %v7801_v25 = vpop.f32.mrb[150].mxu1  ;;  %7881 = vmatprep.mubr.msk.f32.mxu1 %vm4837_vm6, %v4803_v10 }
 0x3f1   : > { %v4806_v0 = vmax.f32 %v4477_v57, %v4758_v37  ;;  %v4670_v1 = vadd.f32 %v7801_v25, %v10477_v62  ;;  %v4664_v41 = vpop.f32.mrb[151].mxu1  ;;  %7882 = vmatmul.mubr.msk.f32.gmra.mrb[194].mxu1 %vm4837_vm6, %v4804_v32 }
 0x3f2   : > { %v4805_v56 = vmax.f32 %v4476_v21, %v4757_v4  ;;  %v4665_v34 = vadd.f32 %v10477_v62, %v4664_v41 }
 0x3f3   : > { %v4760_v5 = vmax.f32 %v4670_v1, 0.0 }
 0x3f4   : > { %v4759_v49 = vmax.f32 %v4665_v34, 0.0  ;;  %v7804_v19 = vpop.f32.mrb[152].mxu1  ;;  %7884 = vmatprep.mubr.msk.f32.mxu1 %vm4837_vm6, %v4805_v56 }
 0x3f5   : > { %v4808_v45 = vmax.f32 %v4479_v12, %v4760_v5  ;;  %v4680_v8 = vadd.f32 %v7804_v19, %v10477_v62  ;;  %v4674_v57 = vpop.f32.mrb[153].mxu1  ;;  %7885 = vmatmul.mubr.msk.f32.gmra.mrb[196].mxu1 %vm4837_vm6, %v4806_v0 }
 0x3f6   : > { %v4807_v54 = vmax.f32 %v4478_v52, %v4759_v49  ;;  %v4675_v35 = vadd.f32 %v10477_v62, %v4674_v57 }
 0x3f7   : > { %v4762_v21 = vmax.f32 %v4680_v8, 0.0 }
 0x3f8   : > { %v4761_v40 = vmax.f32 %v4675_v35, 0.0  ;;  %v7807_v42 = vpop.f32.mrb[154].mxu1  ;;  %7887 = vmatprep.mubr.msk.f32.mxu1 %vm4837_vm6, %v4807_v54 }
 0x3f9   : > { %v4810_v43 = vmax.f32 %v4481_v44, %v4762_v21  ;;  %v4690_v23 = vadd.f32 %v7807_v42, %v10477_v62  ;;  %v4684_v12 = vpop.f32.mrb[155].mxu1  ;;  %7888 = vmatmul.mubr.msk.f32.gmra.mrb[198].mxu1 %vm4837_vm6, %v4808_v45 }
 0x3fa   : > { %v4809_v30 = vmax.f32 %v4480_v6, %v4761_v40  ;;  %v4685_v58 = vadd.f32 %v10477_v62, %v4684_v12 }
 0x3fb   : > { %v4764_v52 = vmax.f32 %v4690_v23, 0.0 }
 0x3fc   : > { %v4763_v61 = vmax.f32 %v4685_v58, 0.0  ;;  %v7810_v32 = vpop.f32.mrb[156].mxu1  ;;  %7890 = vmatprep.mubr.msk.f32.mxu1 %vm4837_vm6, %v4809_v30 }
 0x3fd   : > { %v4812_v2 = vmax.f32 %v4483_v47, %v4764_v52  ;;  %v4700_v53 = vadd.f32 %v7810_v32, %v10477_v62  ;;  %v4694_v44 = vpop.f32.mrb[157].mxu1  ;;  %7891 = vmatmul.mubr.msk.f32.gmra.mrb[200].mxu1 %vm4837_vm6, %v4810_v43 }
 0x3fe   : > { %v4811_v24 = vmax.f32 %v4482_v20, %v4763_v61  ;;  %v4695_v36 = vadd.f32 %v10477_v62, %v4694_v44 }
 0x3ff   : > { %v4766_v6 = vmax.f32 %v4700_v53, 0.0 }
 0x400   : > { %v4765_v10 = vmax.f32 %v4695_v36, 0.0  ;;  %v7813_v3 = vpop.f32.mrb[158].mxu1  ;;  %7893 = vmatprep.mubr.msk.f32.mxu1 %vm4837_vm6, %v4811_v24 }
 0x401   : > { %v4814_v37 = vmax.f32 %v4485_v11, %v4766_v6  ;;  %v4710_v33 = vadd.f32 %v7813_v3, %v10477_v62  ;;  %v4704_v47 = vpop.f32.mrb[159].mxu1  ;;  %7894 = vmatmul.mubr.msk.f32.gmra.mrb[202].mxu1 %vm4837_vm6, %v4812_v2 }
 0x402   : > { %v4813_v4 = vmax.f32 %v4484_v46, %v4765_v10  ;;  %v4705_v22 = vadd.f32 %v10477_v62, %v4704_v47 }
 0x403   : > { %v4768_v20 = vmax.f32 %v4710_v33, 0.0 }
 0x404   : > { %v4767_v25 = vmax.f32 %v4705_v22, 0.0  ;;  %v7816_v0 = vpop.f32.mrb[160].mxu1  ;;  %7896 = vmatprep.mubr.msk.f32.mxu1 %vm4837_vm6, %v4813_v4 }
 0x405   : > { %v4816_v1 = vmax.f32 %v4487_v39, %v4768_v20  ;;  %v4720_v60 = vadd.f32 %v7816_v0, %v10477_v62  ;;  %v4714_v11 = vpop.f32.mrb[161].mxu1  ;;  %7897 = vmatmul.mubr.msk.f32.gmra.mrb[204].mxu1 %vm4837_vm6, %v4814_v37 }
 0x406   : > { %v4815_v41 = vmax.f32 %v4486_v17, %v4767_v25  ;;  %v4715_v9 = vadd.f32 %v10477_v62, %v4714_v11 }
 0x407   : > { %v4770_v46 = vmax.f32 %v4720_v60, 0.0 }
 0x408   : > { %v4769_v56 = vmax.f32 %v4715_v9, 0.0  ;;  %v7819_v34 = vpop.f32.mrb[162].mxu1  ;;  %7899 = vmatprep.mubr.msk.f32.mxu1 %vm4837_vm6, %v4815_v41 }
 0x409   : > { %v4818_v5 = vmax.f32 %v4489_v59, %v4770_v46  ;;  %v4730_v27 = vadd.f32 %v7819_v34, %v10477_v62  ;;  %v4724_v39 = vpop.f32.mrb[163].mxu1  ;;  %7900 = vmatmul.mubr.msk.f32.gmra.mrb[206].mxu1 %vm4837_vm6, %v4816_v1  ;;  %v10876_v1 = vld [vmem:[%s11097_s6] ss:$0 sm:$0xff] }
 0x40a   : > { %v4817_v49 = vmax.f32 %v4488_v7, %v4769_v56  ;;  %v4725_v29 = vadd.f32 %v10477_v62, %v4724_v39 }
 0x40b   : > { %v4772_v17 = vmax.f32 %v4730_v27, 0.0 }
 0x40c   : > { %v4771_v19 = vmax.f32 %v4725_v29, 0.0  ;;  %v7822_v45 = vpop.f32.mrb[164].mxu1  ;;  %7902 = vmatprep.mubr.msk.f32.mxu1 %vm4837_vm6, %v4817_v49 }
 0x40d   : > { %v4820_v8 = vmax.f32 %v4491_v15, %v4772_v17  ;;  %v4740_v13 = vadd.f32 %v7822_v45, %v10477_v62  ;;  %v4734_v59 = vpop.f32.mrb[165].mxu1  ;;  %7903 = vmatmul.mubr.msk.f32.gmra.mrb[208].mxu1 %vm4837_vm6, %v4818_v5 }
 0x40e   : > { %v4819_v57 = vmax.f32 %v4490_v48, %v4771_v19  ;;  %v4735_v28 = vadd.f32 %v10477_v62, %v4734_v59 }
 0x40f   : > { %v4774_v7 = vmax.f32 %v4740_v13, 0.0 }
 0x410   : > { %v4773_v54 = vmax.f32 %v4735_v28, 0.0  ;;  %v7825_v35 = vpop.f32.mrb[166].mxu1  ;;  %7905 = vmatprep.mubr.msk.f32.mxu1 %vm4837_vm6, %v4819_v57 }
 0x411   : > { %v4822_v21 = vmax.f32 %v4493_v51, %v4774_v7  ;;  %v4750_v63 = vadd.f32 %v7825_v35, %v10477_v62  ;;  %v4744_v15 = vpop.f32.mrb[167].mxu1  ;;  %7906 = vmatmul.mubr.msk.f32.gmra.mrb[210].mxu1 %vm4837_vm6, %v4820_v8 }
 0x412   : > { %v4821_v40 = vmax.f32 %v4492_v38, %v4773_v54  ;;  %v4745_v31 = vadd.f32 %v10477_v62, %v4744_v15  ;;  %v5414_v62 = vld [vmem:[%s11099_s8 + $0x8] sm:$0x1] }
 0x413   : > { %v4776_v48 = vmax.f32 %v4750_v63, 0.0  ;;  %v8094_v38 = vpack.c.bf16 %v5414_v62, %v5413_v14 }
 0x414   : > { %v4775_v42 = vmax.f32 %v4745_v31, 0.0  ;;  %7908 = vmatprep.mubr.msk.f32.mxu1 %vm4837_vm6, %v4821_v40 }
 0x415   : > { %v4824_v43 = vmax.f32 %v4495_v50, %v4776_v48  ;;  %7909 = vmatmul.mubr.msk.f32.gmra.mrb[212].mxu1 %vm4837_vm6, %v4822_v21  ;;  %8096 = vmatprep.subr.msk.bf16.mxu1 %vm10808_vm7, %v8094_v38  ;;  %v8100_v50 = vpack.c.bf16 %v5412_v18, %v5411_v26 }
 0x416   : > { %v4823_v16 = vmax.f32 %v4494_v55, %v4775_v42  ;;  %8099 = vmatpush3.bf16.msk.msra.mxu1 %vm10808_vm7, %v8094_v38 }
 0x417   : > { %8102 = vmatprep.subr.msk.bf16.mxu1 %vm10808_vm7, %v8100_v50 }
 0x418   : > { %7911 = vmatprep.mubr.msk.f32.mxu1 %vm4837_vm6, %v4823_v16 }
 0x419   : > { %7912 = vmatmul.mubr.msk.f32.gmra.mrb[214].mxu1 %vm4837_vm6, %v4824_v43 }
 0x490   : > { %v10825_v55 = vpop.f32.mrb[168].mxu1 }
 0x491   : > { %v10827_v23 = vpop.f32.mrb[169].mxu1 }
 0x494   : > { %v10829_v12 = vpop.f32.mrb[170].mxu1 }
 0x495   : > { %v10831_v30 = vpop.f32.mrb[171].mxu1 }
 0x498   : > { %v10833_v58 = vpop.f32.mrb[172].mxu1 }
 0x499   : > { %v10835_v52 = vpop.f32.mrb[173].mxu1 }
 0x49c   : > { %v10837_v61 = vpop.f32.mrb[174].mxu1 }
 0x49d   : > { %v10839_v32 = vpop.f32.mrb[175].mxu1 }
 0x4a0   : > { %v10841_v2 = vpop.f32.mrb[176].mxu1 }
 0x4a1   : > { %v10843_v53 = vpop.f32.mrb[177].mxu1 }
 0x4a4   : > { %v10845_v44 = vpop.f32.mrb[178].mxu1 }
 0x4a5   : > { %v10847_v24 = vpop.f32.mrb[179].mxu1 }
 0x4a8   : > { %v10849_v36 = vpop.f32.mrb[180].mxu1 }
 0x4a9   : > { %v10851_v6 = vpop.f32.mrb[181].mxu1 }
 0x4ac   : > { %v10853_v10 = vpop.f32.mrb[182].mxu1 }
 0x4ad   : > { %v10855_v3 = vpop.f32.mrb[183].mxu1 }
 0x4b0   : > { %v10857_v37 = vpop.f32.mrb[184].mxu1 }
 0x4b1   : > { %v10859_v33 = vpop.f32.mrb[185].mxu1 }
 0x4b4   : > { %v10861_v47 = vpop.f32.mrb[186].mxu1 }
 0x4b5   : > { %v10863_v4 = vpop.f32.mrb[187].mxu1 }
 0x4b8   : > { %v10865_v22 = vpop.f32.mrb[188].mxu1 }
 0x4b9   : > { %v10867_v20 = vpop.f32.mrb[189].mxu1 }
 0x4bc   : > { %v10869_v25 = vpop.f32.mrb[190].mxu1 }
 0x4bd   : > { %v10871_v0 = vpop.f32.mrb[191].mxu1 }
 0x4c0   : > { %v7880_v60 = vpop.f32.mrb[192].mxu1 }
 0x4c1   : > { %v5274_v11 = vadd.f32 %v7880_v60, %v10876_v1  ;;  %v5268_v41 = vpop.f32.mrb[193].mxu1 }
 0x4c2   : > { %v5269_v9 = vadd.f32 %v10876_v1, %v5268_v41 }
 0x4c3   : > { %v5388_v34 = vmax.f32 %v5274_v11, 0.0 }
 0x4c4   : > { %v5387_v46 = vmax.f32 %v5269_v9, 0.0  ;;  %v7883_v56 = vpop.f32.mrb[194].mxu1 }
 0x4c5   : > { %v5284_v5 = vadd.f32 %v7883_v56, %v10876_v1  ;;  %v5278_v27 = vpop.f32.mrb[195].mxu1 }
 0x4c6   : > { %v5279_v39 = vadd.f32 %v10876_v1, %v5278_v27  ;;  %7918 = vmatprep.mubr.msk.f32.mxu1 %vm5415_vm8, %v5387_v46 }
 0x4c7   : > { %7919 = vmatmul.mubr.msk.f32.vlgmr.msra.gmra.mrb[216].mxu1 %vm5415_vm8, %v5388_v34  ;;  %v5390_v17 = vmax.f32 %v5284_v5, 0.0 }
 0x4c8   : > { %v5389_v49 = vmax.f32 %v5279_v39, 0.0  ;;  %v7886_v29 = vpop.f32.mrb[196].mxu1  ;;  %8105 = vmatpush3.bf16.msk.msra.mxu1 %vm10808_vm7, %v8100_v50 }
 0x4c9   : > { %v5294_v19 = vadd.f32 %v7886_v29, %v10876_v1  ;;  %v5288_v45 = vpop.f32.mrb[197].mxu1 }
 0x4ca   : > { %v5289_v8 = vadd.f32 %v10876_v1, %v5288_v45  ;;  %7921 = vmatprep.mubr.msk.f32.mxu1 %vm5415_vm8, %v5389_v49 }
 0x4cb   : > { %7922 = vmatmul.mubr.msk.f32.gmra.mrb[218].mxu1 %vm5415_vm8, %v5390_v17  ;;  %v5392_v57 = vmax.f32 %v5294_v19, 0.0 }
 0x4cc   : > { %v5391_v13 = vmax.f32 %v5289_v8, 0.0  ;;  %v7889_v59 = vpop.f32.mrb[198].mxu1 }
 0x4cd   : > { %v5304_v28 = vadd.f32 %v7889_v59, %v10876_v1  ;;  %v5298_v7 = vpop.f32.mrb[199].mxu1 }
 0x4ce   : > { %v5299_v54 = vadd.f32 %v10876_v1, %v5298_v7  ;;  %7924 = vmatprep.mubr.msk.f32.mxu1 %vm5415_vm8, %v5391_v13 }
 0x4cf   : > { %7925 = vmatmul.mubr.msk.f32.gmra.mrb[220].mxu1 %vm5415_vm8, %v5392_v57  ;;  %v5394_v63 = vmax.f32 %v5304_v28, 0.0 }
 0x4d0   : > { %v5393_v35 = vmax.f32 %v5299_v54, 0.0  ;;  %v7892_v21 = vpop.f32.mrb[200].mxu1 }
 0x4d1   : > { %v5314_v15 = vadd.f32 %v7892_v21, %v10876_v1  ;;  %v5308_v40 = vpop.f32.mrb[201].mxu1 }
 0x4d2   : > { %v5309_v31 = vadd.f32 %v10876_v1, %v5308_v40  ;;  %7927 = vmatprep.mubr.msk.f32.mxu1 %vm5415_vm8, %v5393_v35 }
 0x4d3   : > { %7928 = vmatmul.mubr.msk.f32.gmra.mrb[222].mxu1 %vm5415_vm8, %v5394_v63  ;;  %v5396_v43 = vmax.f32 %v5314_v15, 0.0 }
 0x4d4   : > { %v5395_v48 = vmax.f32 %v5309_v31, 0.0  ;;  %v7895_v42 = vpop.f32.mrb[202].mxu1 }
 0x4d5   : > { %v5324_v16 = vadd.f32 %v7895_v42, %v10876_v1  ;;  %v5318_v14 = vpop.f32.mrb[203].mxu1 }
 0x4d6   : > { %v5319_v62 = vadd.f32 %v10876_v1, %v5318_v14  ;;  %7930 = vmatprep.mubr.msk.f32.mxu1 %vm5415_vm8, %v5395_v48 }
 0x4d7   : > { %7931 = vmatmul.mubr.msk.f32.gmra.mrb[224].mxu1 %vm5415_vm8, %v5396_v43  ;;  %v5398_v26 = vmax.f32 %v5324_v16, 0.0  ;;  %v4981_v43 = vadd.f32 %v10876_v1, %v10827_v23 }
 0x4d8   : > { %v5397_v51 = vmax.f32 %v5319_v62, 0.0  ;;  %v7898_v38 = vpop.f32.mrb[204].mxu1  ;;  %v4986_v62 = vadd.f32 %v10825_v55, %v10876_v1 }
 0x4d9   : > { %v5334_v18 = vadd.f32 %v7898_v38, %v10876_v1  ;;  %v5328_v50 = vpop.f32.mrb[205].mxu1  ;;  %v5099_v38 = vmax.f32 %v4981_v43, 0.0 }
 0x4da   : > { %v5329_v60 = vadd.f32 %v10876_v1, %v5328_v50  ;;  %7933 = vmatprep.mubr.msk.f32.mxu1 %vm5415_vm8, %v5397_v51  ;;  %v5100_v23 = vmax.f32 %v4986_v62, 0.0 }
 0x4db   : > { %7934 = vmatmul.mubr.msk.f32.gmra.mrb[226].mxu1 %vm5415_vm8, %v5398_v26  ;;  %v5400_v9 = vmax.f32 %v5334_v18, 0.0  ;;  %v4991_v26 = vadd.f32 %v10876_v1, %v10831_v30  ;;  %v4996_v18 = vadd.f32 %v10829_v12, %v10876_v1  ;;  %v5006_v30 = vadd.f32 %v10833_v58, %v10876_v1 }
 0x4dc   : > { %v5399_v11 = vmax.f32 %v5329_v60, 0.0  ;;  %v7901_v41 = vpop.f32.mrb[206].mxu1  ;;  %v5001_v60 = vadd.f32 %v10876_v1, %v10835_v52  ;;  %v5016_v52 = vadd.f32 %v10837_v61, %v10876_v1 }
 0x4dd   : > { %v5344_v46 = vadd.f32 %v7901_v41, %v10876_v1  ;;  %v5338_v56 = vpop.f32.mrb[207].mxu1  ;;  %v5101_v50 = vmax.f32 %v4991_v26, 0.0  ;;  %v5102_v55 = vmax.f32 %v4996_v18, 0.0  ;;  %v5011_v41 = vadd.f32 %v10876_v1, %v10839_v32 }
 0x4de   : > { %v5339_v34 = vadd.f32 %v10876_v1, %v5338_v56  ;;  %7936 = vmatprep.mubr.msk.f32.mxu1 %vm5415_vm8, %v5399_v11  ;;  %v5103_v11 = vmax.f32 %v5001_v60, 0.0  ;;  %v5104_v12 = vmax.f32 %v5006_v30, 0.0  ;;  %v5106_v58 = vmax.f32 %v5016_v52, 0.0 }
 0x4df   : > { %7937 = vmatmul.mubr.msk.f32.gmra.mrb[228].mxu1 %vm5415_vm8, %v5400_v9  ;;  %v5402_v39 = vmax.f32 %v5344_v46, 0.0  ;;  %v5105_v9 = vmax.f32 %v5011_v41, 0.0  ;;  %v5021_v46 = vadd.f32 %v10876_v1, %v10843_v53  ;;  %v5026_v32 = vadd.f32 %v10841_v2, %v10876_v1 }
 0x4e0   : > { %v5401_v5 = vmax.f32 %v5339_v34, 0.0  ;;  %v7904_v27 = vpop.f32.mrb[208].mxu1  ;;  %v5031_v34 = vadd.f32 %v10876_v1, %v10847_v24  ;;  %v5036_v53 = vadd.f32 %v10845_v44, %v10876_v1  ;;  %v5046_v24 = vadd.f32 %v10849_v36, %v10876_v1 }
 0x4e1   : > { %v5354_v49 = vadd.f32 %v7904_v27, %v10876_v1  ;;  %v5348_v29 = vpop.f32.mrb[209].mxu1  ;;  %v5107_v56 = vmax.f32 %v5021_v46, 0.0  ;;  %v5108_v61 = vmax.f32 %v5026_v32, 0.0  ;;  %v5041_v27 = vadd.f32 %v10876_v1, %v10851_v6 }
 0x4e2   : > { %v5349_v17 = vadd.f32 %v10876_v1, %v5348_v29  ;;  %7939 = vmatprep.mubr.msk.f32.mxu1 %vm5415_vm8, %v5401_v5  ;;  %v5109_v5 = vmax.f32 %v5031_v34, 0.0  ;;  %v5110_v2 = vmax.f32 %v5036_v53, 0.0  ;;  %v5112_v44 = vmax.f32 %v5046_v24, 0.0 }
 0x4e3   : > { %7940 = vmatmul.mubr.msk.f32.gmra.mrb[230].mxu1 %vm5415_vm8, %v5402_v39  ;;  %v5404_v8 = vmax.f32 %v5354_v49, 0.0  ;;  %v5111_v39 = vmax.f32 %v5041_v27, 0.0  ;;  %v5051_v49 = vadd.f32 %v10876_v1, %v10855_v3  ;;  %v5056_v6 = vadd.f32 %v10853_v10, %v10876_v1 }
 0x4e4   : > { %v5403_v19 = vmax.f32 %v5349_v17, 0.0  ;;  %v7907_v45 = vpop.f32.mrb[210].mxu1  ;;  %v5061_v17 = vadd.f32 %v10876_v1, %v10859_v33  ;;  %v5066_v3 = vadd.f32 %v10857_v37, %v10876_v1  ;;  %v5076_v33 = vadd.f32 %v10861_v47, %v10876_v1 }
 0x4e5   : > { %v5364_v13 = vadd.f32 %v7907_v45, %v10876_v1  ;;  %v5358_v59 = vpop.f32.mrb[211].mxu1  ;;  %v5113_v29 = vmax.f32 %v5051_v49, 0.0  ;;  %v5114_v36 = vmax.f32 %v5056_v6, 0.0  ;;  %v5071_v45 = vadd.f32 %v10876_v1, %v10863_v4 }
 0x4e6   : > { %v5359_v57 = vadd.f32 %v10876_v1, %v5358_v59  ;;  %7942 = vmatprep.mubr.msk.f32.mxu1 %vm5415_vm8, %v5403_v19  ;;  %v5115_v19 = vmax.f32 %v5061_v17, 0.0  ;;  %v5116_v10 = vmax.f32 %v5066_v3, 0.0  ;;  %v5118_v37 = vmax.f32 %v5076_v33, 0.0 }
 0x4e7   : > { %7943 = vmatmul.mubr.msk.f32.gmra.mrb[232].mxu1 %vm5415_vm8, %v5404_v8  ;;  %v5406_v54 = vmax.f32 %v5364_v13, 0.0  ;;  %v5117_v8 = vmax.f32 %v5071_v45, 0.0  ;;  %v5081_v13 = vadd.f32 %v10876_v1, %v10867_v20  ;;  %v5086_v4 = vadd.f32 %v10865_v22, %v10876_v1  ;;  %v11003_v22 = vld [vmem:[%s11100_s9] ss:$0 sm:$0xff] }
 0x4e8   : > { %v5405_v28 = vmax.f32 %v5359_v57, 0.0  ;;  %v7910_v7 = vpop.f32.mrb[212].mxu1  ;;  %v5091_v57 = vadd.f32 %v10876_v1, %v10871_v0  ;;  %v5096_v20 = vadd.f32 %v10869_v25, %v10876_v1 }
 0x4e9   : > { %v5374_v35 = vadd.f32 %v7910_v7, %v10876_v1  ;;  %v5368_v21 = vpop.f32.mrb[213].mxu1  ;;  %v5119_v59 = vmax.f32 %v5081_v13, 0.0  ;;  %v5120_v47 = vmax.f32 %v5086_v4, 0.0 }
 0x4ea   : > { %v5369_v63 = vadd.f32 %v10876_v1, %v5368_v21  ;;  %7945 = vmatprep.mubr.msk.f32.mxu1 %vm5415_vm8, %v5405_v28  ;;  %v5121_v28 = vmax.f32 %v5091_v57, 0.0  ;;  %v5122_v7 = vmax.f32 %v5096_v20, 0.0 }
 0x4eb   : > { %7946 = vmatmul.mubr.msk.f32.gmra.mrb[234].mxu1 %vm5415_vm8, %v5406_v54  ;;  %v5408_v31 = vmax.f32 %v5374_v35, 0.0 }
 0x4ec   : > { %v5407_v15 = vmax.f32 %v5369_v63, 0.0  ;;  %v7913_v40 = vpop.f32.mrb[214].mxu1 }
 0x4ed   : > { %v5384_v48 = vadd.f32 %v7913_v40, %v10876_v1  ;;  %v5378_v42 = vpop.f32.mrb[215].mxu1 }
 0x4ee   : > { %v5379_v16 = vadd.f32 %v10876_v1, %v5378_v42  ;;  %7948 = vmatprep.mubr.msk.f32.mxu1 %vm5415_vm8, %v5407_v15 }
 0x4ef   : > { %7949 = vmatmul.mubr.msk.f32.gmra.mrb[236].mxu1 %vm5415_vm8, %v5408_v31  ;;  %v5410_v51 = vmax.f32 %v5384_v48, 0.0 }
 0x4f0   : > { %v5409_v14 = vmax.f32 %v5379_v16, 0.0 }
 0x4f2   : > { %7951 = vmatprep.mubr.msk.f32.mxu1 %vm5415_vm8, %v5409_v14 }
 0x4f3   : > { %7952 = vmatmul.mubr.msk.f32.gmra.mrb[238].mxu1 %vm5415_vm8, %v5410_v51 }
 0x4f4   : > { %7958 = vmatprep.mubr.msk.f32.mxu1 %vm5415_vm8, %v5099_v38 }
 0x4f7   : > { %7959 = vmatmul.mubr.msk.f32.vlgmr.msra.gmra.mrb[216].mxu1 %vm5415_vm8, %v5100_v23 }
 0x4f8   : > { %7961 = vmatprep.mubr.msk.f32.mxu1 %vm5415_vm8, %v5101_v50 }
 0x4fb   : > { %7962 = vmatmul.mubr.msk.f32.gmra.mrb[218].mxu1 %vm5415_vm8, %v5102_v55 }
 0x4fc   : > { %7964 = vmatprep.mubr.msk.f32.mxu1 %vm5415_vm8, %v5103_v11 }
 0x4ff   : > { %7965 = vmatmul.mubr.msk.f32.gmra.mrb[220].mxu1 %vm5415_vm8, %v5104_v12 }
 0x500   : > { %7967 = vmatprep.mubr.msk.f32.mxu1 %vm5415_vm8, %v5105_v9 }
 0x503   : > { %7968 = vmatmul.mubr.msk.f32.gmra.mrb[222].mxu1 %vm5415_vm8, %v5106_v58 }
 0x504   : > { %7970 = vmatprep.mubr.msk.f32.mxu1 %vm5415_vm8, %v5107_v56 }
 0x507   : > { %7971 = vmatmul.mubr.msk.f32.gmra.mrb[224].mxu1 %vm5415_vm8, %v5108_v61 }
 0x508   : > { %7973 = vmatprep.mubr.msk.f32.mxu1 %vm5415_vm8, %v5109_v5 }
 0x50b   : > { %7974 = vmatmul.mubr.msk.f32.gmra.mrb[226].mxu1 %vm5415_vm8, %v5110_v2 }
 0x50c   : > { %7976 = vmatprep.mubr.msk.f32.mxu1 %vm5415_vm8, %v5111_v39 }
 0x50f   : > { %7977 = vmatmul.mubr.msk.f32.gmra.mrb[228].mxu1 %vm5415_vm8, %v5112_v44 }
 0x510   : > { %7979 = vmatprep.mubr.msk.f32.mxu1 %vm5415_vm8, %v5113_v29 }
 0x513   : > { %7980 = vmatmul.mubr.msk.f32.gmra.mrb[230].mxu1 %vm5415_vm8, %v5114_v36 }
 0x514   : > { %7982 = vmatprep.mubr.msk.f32.mxu1 %vm5415_vm8, %v5115_v19 }
 0x517   : > { %7983 = vmatmul.mubr.msk.f32.gmra.mrb[232].mxu1 %vm5415_vm8, %v5116_v10 }
 0x518   : > { %7985 = vmatprep.mubr.msk.f32.mxu1 %vm5415_vm8, %v5117_v8 }
 0x51b   : > { %7986 = vmatmul.mubr.msk.f32.gmra.mrb[234].mxu1 %vm5415_vm8, %v5118_v37 }
 0x51c   : > { %7988 = vmatprep.mubr.msk.f32.mxu1 %vm5415_vm8, %v5119_v59 }
 0x51f   : > { %7989 = vmatmul.mubr.msk.f32.gmra.mrb[236].mxu1 %vm5415_vm8, %v5120_v47 }
 0x520   : > { %7991 = vmatprep.mubr.msk.f32.mxu1 %vm5415_vm8, %v5121_v28 }
 0x523   : > { %7992 = vmatmul.mubr.msk.f32.gmra.mrb[238].mxu1 %vm5415_vm8, %v5122_v7 }
 0x5ca   : > { %v7960_v0 = vpop.f32.mrb[216].mxu1 }
 0x5cb   : > { %v5944_v54 = vadd.f32 %v7960_v0, %v11003_v22  ;;  %v5817_v35 = vpop.f32.mrb[217].mxu1 }
 0x5cc   : > { %v5943_v21 = vadd.f32 %v11003_v22, %v5817_v35 }
 0x5cd   : > { %v5968_v25 = vsub.f32 0.0, %v5944_v54 }
 0x5ce   : > { %v5967_v1 = vsub.f32 0.0, %v5943_v21  ;;  %v7963_v63 = vpop.f32.mrb[218].mxu1 }
 0x5cf   : > { %v5993_v15 = vmul.f32 1.442695, %v5968_v25  ;;  %v5946_v40 = vadd.f32 %v7963_v63, %v11003_v22  ;;  %v5827_v31 = vpop.f32.mrb[219].mxu1 }
 0x5d0   : > { %v5991_v48 = vmul.f32 1.442695, %v5967_v1  ;;  %v5945_v42 = vadd.f32 %v11003_v22, %v5827_v31 }
 0x5d1   : > { %8483 = vpow2.f32 %v5993_v15  ;;  %v5970_v43 = vsub.f32 0.0, %v5946_v40 }
 0x5d2   : > { %8485 = vpow2.f32 %v5991_v48  ;;  %v5969_v16 = vsub.f32 0.0, %v5945_v42  ;;  %v7966_v14 = vpop.f32.mrb[220].mxu1 }
 0x5d3   : > { %v5997_v62 = vmul.f32 1.442695, %v5970_v43  ;;  %v5948_v51 = vadd.f32 %v7966_v14, %v11003_v22  ;;  %v5837_v38 = vpop.f32.mrb[221].mxu1 }
 0x5d4   : > { %v5995_v26 = vmul.f32 1.442695, %v5969_v16  ;;  %v5947_v23 = vadd.f32 %v11003_v22, %v5837_v38 }
 0x5d5   : > { %8487 = vpow2.f32 %v5997_v62  ;;  %v5972_v18 = vsub.f32 0.0, %v5948_v51 }
 0x5d6   : > { %8489 = vpow2.f32 %v5995_v26  ;;  %v5971_v50 = vsub.f32 0.0, %v5947_v23  ;;  %v7969_v60 = vpop.f32.mrb[222].mxu1 }
 0x5d7   : > { %v6001_v55 = vmul.f32 1.442695, %v5972_v18  ;;  %v5950_v30 = vadd.f32 %v7969_v60, %v11003_v22  ;;  %v5847_v11 = vpop.f32.mrb[223].mxu1 }
 0x5d8   : > { %v5999_v41 = vmul.f32 1.442695, %v5971_v50  ;;  %v5949_v12 = vadd.f32 %v11003_v22, %v5847_v11 }
 0x5d9   : > { %8491 = vpow2.f32 %v6001_v55  ;;  %v5974_v52 = vsub.f32 0.0, %v5950_v30 }
 0x5da   : > { %8493 = vpow2.f32 %v5999_v41  ;;  %v5973_v9 = vsub.f32 0.0, %v5949_v12  ;;  %v7972_v46 = vpop.f32.mrb[224].mxu1 }
 0x5db   : > { %v8484_v58 = vpop.eup %8483  ;;  %v6005_v32 = vmul.f32 1.442695, %v5974_v52  ;;  %v5952_v56 = vadd.f32 %v7972_v46, %v11003_v22  ;;  %v5857_v34 = vpop.f32.mrb[225].mxu1 }
 0x5dc   : > { %v8486_v61 = vpop.eup %8485  ;;  %v6040_v53 = vadd.f32 1.0, %v8484_v58  ;;  %v6003_v5 = vmul.f32 1.442695, %v5973_v9  ;;  %v5951_v27 = vadd.f32 %v11003_v22, %v5857_v34 }
 0x5dd   : > { %v6039_v2 = vadd.f32 1.0, %v8486_v61  ;;  %8495 = vpow2.f32 %v6005_v32  ;;  %v5976_v24 = vsub.f32 0.0, %v5952_v56 }
 0x5de   : > { %8497 = vrcp.f32 %v6040_v53  ;;  %v5975_v39 = vsub.f32 0.0, %v5951_v27  ;;  %v7975_v49 = vpop.f32.mrb[226].mxu1 }
 0x5df   : > { %v8488_v44 = vpop.eup %8487  ;;  %8499 = vrcp.f32 %v6039_v2  ;;  %v6009_v6 = vmul.f32 1.442695, %v5976_v24  ;;  %v5954_v29 = vadd.f32 %v7975_v49, %v11003_v22  ;;  %v5867_v17 = vpop.f32.mrb[227].mxu1 }
 0x5e0   : > { %v8490_v36 = vpop.eup %8489  ;;  %v6042_v3 = vadd.f32 1.0, %v8488_v44  ;;  %8501 = vpow2.f32 %v6003_v5  ;;  %v6007_v19 = vmul.f32 1.442695, %v5975_v39  ;;  %v5953_v45 = vadd.f32 %v11003_v22, %v5867_v17 }
 0x5e1   : > { %v6041_v10 = vadd.f32 1.0, %v8490_v36  ;;  %8503 = vpow2.f32 %v6009_v6  ;;  %v5978_v33 = vsub.f32 0.0, %v5954_v29 }
 0x5e2   : > { %8505 = vrcp.f32 %v6042_v3  ;;  %v5977_v8 = vsub.f32 0.0, %v5953_v45  ;;  %v7978_v13 = vpop.f32.mrb[228].mxu1 }
 0x5e3   : > { %v8492_v37 = vpop.eup %8491  ;;  %8507 = vrcp.f32 %v6041_v10  ;;  %v6013_v4 = vmul.f32 1.442695, %v5978_v33  ;;  %v5956_v59 = vadd.f32 %v7978_v13, %v11003_v22  ;;  %v5877_v57 = vpop.f32.mrb[229].mxu1 }
 0x5e4   : > { %v8494_v47 = vpop.eup %8493  ;;  %v6044_v20 = vadd.f32 1.0, %v8492_v37  ;;  %8509 = vpow2.f32 %v6007_v19  ;;  %v6011_v28 = vmul.f32 1.442695, %v5977_v8  ;;  %v5955_v7 = vadd.f32 %v11003_v22, %v5877_v57 }
 0x5e5   : > { %v6043_v0 = vadd.f32 1.0, %v8494_v47  ;;  %8511 = vpow2.f32 %v6013_v4  ;;  %v5980_v54 = vsub.f32 0.0, %v5956_v59 }
 0x5e6   : > { %8513 = vrcp.f32 %v6044_v20  ;;  %v5979_v35 = vsub.f32 0.0, %v5955_v7  ;;  %v7981_v21 = vpop.f32.mrb[230].mxu1 }
 0x5e7   : > { %v8496_v25 = vpop.eup %8495  ;;  %8515 = vrcp.f32 %v6043_v0  ;;  %v6017_v1 = vmul.f32 1.442695, %v5980_v54  ;;  %v5958_v63 = vadd.f32 %v7981_v21, %v11003_v22  ;;  %v5887_v15 = vpop.f32.mrb[231].mxu1 }
 0x5e8   : > { %v8498_v40 = vpop.eup %8497  ;;  %v6046_v31 = vadd.f32 1.0, %v8496_v25  ;;  %8517 = vpow2.f32 %v6011_v28  ;;  %v6015_v48 = vmul.f32 1.442695, %v5979_v35  ;;  %v5957_v42 = vadd.f32 %v11003_v22, %v5887_v15 }
 0x5e9   : > { %v8500_v43 = vpop.eup %8499  ;;  %6113 = vst.msk [vmem:[%s11028_s16 + $0x8] sm:$0xff] %vm6111_vm9, %v8498_v40  ;;  %8519 = vpow2.f32 %v6017_v1  ;;  %v5982_v16 = vsub.f32 0.0, %v5958_v63 }
 0x5ea   : > { %v8502_v14 = vpop.eup %8501  ;;  %6112 = vst.msk [vmem:[%s11028_s16] sm:$0xff] %vm6111_vm9, %v8500_v43  ;;  %8521 = vrcp.f32 %v6046_v31  ;;  %v5981_v62 = vsub.f32 0.0, %v5957_v42  ;;  %v7984_v51 = vpop.f32.mrb[232].mxu1 }
 0x5eb   : > { %v8504_v38 = vpop.eup %8503  ;;  %v6045_v26 = vadd.f32 1.0, %v8502_v14  ;;  %8523 = vpow2.f32 %v6015_v48  ;;  %v6021_v23 = vmul.f32 1.442695, %v5982_v16  ;;  %v5960_v18 = vadd.f32 %v7984_v51, %v11003_v22  ;;  %v5897_v50 = vpop.f32.mrb[233].mxu1 }
 0x5ec   : > { %v8506_v60 = vpop.eup %8505  ;;  %v6048_v55 = vadd.f32 1.0, %v8504_v38  ;;  %v6019_v30 = vmul.f32 1.442695, %v5981_v62  ;;  %v5959_v11 = vadd.f32 %v11003_v22, %v5897_v50 }
 0x5ed   : > { %v8508_v41 = vpop.eup %8507  ;;  %6115 = vst.msk [vmem:[%s11028_s16 + $0x18] sm:$0xff] %vm6111_vm9, %v8506_v60  ;;  %8525 = vrcp.f32 %v6045_v26  ;;  %v5984_v12 = vsub.f32 0.0, %v5960_v18 }
 0x5ee   : > { %v8510_v52 = vpop.eup %8509  ;;  %6114 = vst.msk [vmem:[%s11028_s16 + $0x10] sm:$0xff] %vm6111_vm9, %v8508_v41  ;;  %8527 = vrcp.f32 %v6048_v55  ;;  %v5983_v9 = vsub.f32 0.0, %v5959_v11  ;;  %v7987_v46 = vpop.f32.mrb[234].mxu1 }
 0x5ef   : > { %v8512_v58 = vpop.eup %8511  ;;  %v6047_v32 = vadd.f32 1.0, %v8510_v52  ;;  %8529 = vpow2.f32 %v6021_v23  ;;  %v6025_v56 = vmul.f32 1.442695, %v5984_v12  ;;  %v5962_v34 = vadd.f32 %v7987_v46, %v11003_v22  ;;  %v5907_v61 = vpop.f32.mrb[235].mxu1 }
 0x5f0   : > { %v8514_v53 = vpop.eup %8513  ;;  %v6050_v5 = vadd.f32 1.0, %v8512_v58  ;;  %8531 = vpow2.f32 %v6019_v30  ;;  %v6023_v27 = vmul.f32 1.442695, %v5983_v9  ;;  %v5961_v2 = vadd.f32 %v11003_v22, %v5907_v61 }
 0x5f1   : > { %v8516_v24 = vpop.eup %8515  ;;  %6117 = vst.msk [vmem:[%s11028_s16 + $0x28] sm:$0xff] %vm6111_vm9, %v8514_v53  ;;  %8533 = vrcp.f32 %v6047_v32  ;;  %v5986_v39 = vsub.f32 0.0, %v5962_v34 }
 0x5f2   : > { %v8518_v49 = vpop.eup %8517  ;;  %6116 = vst.msk [vmem:[%s11028_s16 + $0x20] sm:$0xff] %vm6111_vm9, %v8516_v24  ;;  %8535 = vrcp.f32 %v6050_v5  ;;  %v5985_v44 = vsub.f32 0.0, %v5961_v2  ;;  %v7990_v6 = vpop.f32.mrb[236].mxu1 }
 0x5f3   : > { %v8520_v29 = vpop.eup %8519  ;;  %v6049_v17 = vadd.f32 1.0, %v8518_v49  ;;  %8537 = vpow2.f32 %v6025_v56  ;;  %v6029_v36 = vmul.f32 1.442695, %v5986_v39  ;;  %v5964_v3 = vadd.f32 %v7990_v6, %v11003_v22  ;;  %v5917_v19 = vpop.f32.mrb[237].mxu1 }
 0x5f4   : > { %v8522_v45 = vpop.eup %8521  ;;  %v6052_v10 = vadd.f32 1.0, %v8520_v29  ;;  %8539 = vpow2.f32 %v6023_v27  ;;  %v5963_v33 = vadd.f32 %v11003_v22, %v5917_v19  ;;  %v6027_v13 = vmul.f32 1.442695, %v5985_v44 }
 0x5f5   : > { %v8524_v8 = vpop.eup %8523  ;;  %6119 = vst.msk [vmem:[%s11028_s16 + $0x38] sm:$0xff] %vm6111_vm9, %v8522_v45  ;;  %8541 = vrcp.f32 %v6049_v17  ;;  %v5988_v37 = vsub.f32 0.0, %v5964_v3 }
 0x5f6   : > { %8543 = vrcp.f32 %v6052_v10  ;;  %v6051_v4 = vadd.f32 1.0, %v8524_v8  ;;  %v5987_v59 = vsub.f32 0.0, %v5963_v33  ;;  %v7993_v57 = vpop.f32.mrb[238].mxu1 }
 0x5f7   : > { %v8526_v47 = vpop.eup %8525  ;;  %8545 = vpow2.f32 %v6029_v36  ;;  %v6033_v20 = vmul.f32 1.442695, %v5988_v37  ;;  %v5966_v28 = vadd.f32 %v7993_v57, %v11003_v22  ;;  %v5927_v7 = vpop.f32.mrb[239].mxu1 }
 0x5f8   : > { %v8528_v0 = vpop.eup %8527  ;;  %6118 = vst.msk [vmem:[%s11028_s16 + $0x30] sm:$0xff] %vm6111_vm9, %v8526_v47  ;;  %8547 = vrcp.f32 %v6051_v4  ;;  %v6031_v54 = vmul.f32 1.442695, %v5987_v59  ;;  %v5965_v35 = vadd.f32 %v11003_v22, %v5927_v7 }
 0x5f9   : > { %v8530_v21 = vpop.eup %8529  ;;  %6121 = vst.msk [vmem:[%s11028_s16 + $0x48] sm:$0xff] %vm6111_vm9, %v8528_v0  ;;  %8549 = vpow2.f32 %v6027_v13  ;;  %v5990_v25 = vsub.f32 0.0, %v5966_v28 }
 0x5fa   : > { %v8532_v1 = vpop.eup %8531  ;;  %v6054_v63 = vadd.f32 1.0, %v8530_v21  ;;  %8551 = vpow2.f32 %v6033_v20  ;;  %v5989_v15 = vsub.f32 0.0, %v5965_v35 }
 0x5fb   : > { %v8534_v40 = vpop.eup %8533  ;;  %v6053_v31 = vadd.f32 1.0, %v8532_v1  ;;  %8553 = vpow2.f32 %v6031_v54  ;;  %v6037_v48 = vmul.f32 1.442695, %v5990_v25 }
 0x5fc   : > { %v8536_v42 = vpop.eup %8535  ;;  %6120 = vst.msk [vmem:[%s11028_s16 + $0x40] sm:$0xff] %vm6111_vm9, %v8534_v40  ;;  %8555 = vrcp.f32 %v6054_v63  ;;  %v6035_v22 = vmul.f32 1.442695, %v5989_v15 }
 0x5fd   : > { %v8538_v43 = vpop.eup %8537  ;;  %6123 = vst.msk [vmem:[%s11028_s16 + $0x58] sm:$0xff] %vm6111_vm9, %v8536_v42  ;;  %8557 = vrcp.f32 %v6053_v31 }
 0x5fe   : > { %v8540_v16 = vpop.eup %8539  ;;  %v6056_v14 = vadd.f32 1.0, %v8538_v43  ;;  %8559 = vpow2.f32 %v6037_v48 }
 0x5ff   : > { %v8542_v62 = vpop.eup %8541  ;;  %v6055_v51 = vadd.f32 1.0, %v8540_v16  ;;  %8561 = vpow2.f32 %v6035_v22 }
 0x600   : > { %v8544_v38 = vpop.eup %8543  ;;  %6122 = vst.msk [vmem:[%s11028_s16 + $0x50] sm:$0xff] %vm6111_vm9, %v8542_v62  ;;  %8563 = vrcp.f32 %v6056_v14 }
 0x601   : > { %v8546_v26 = vpop.eup %8545  ;;  %6125 = vst.msk [vmem:[%s11028_s16 + $0x68] sm:$0xff] %vm6111_vm9, %v8544_v38  ;;  %8565 = vrcp.f32 %v6055_v51 }
 0x602   : > { %v8548_v23 = vpop.eup %8547  ;;  %v6058_v18 = vadd.f32 1.0, %v8546_v26 }
 0x603   : > { %v8550_v50 = vpop.eup %8549  ;;  %6124 = vst.msk [vmem:[%s11028_s16 + $0x60] sm:$0xff] %vm6111_vm9, %v8548_v23 }
 0x604   : > { %v8552_v60 = vpop.eup %8551  ;;  %8567 = vrcp.f32 %v6058_v18  ;;  %v6057_v55 = vadd.f32 1.0, %v8550_v50 }
 0x605   : > { %v8554_v30 = vpop.eup %8553  ;;  %v6060_v11 = vadd.f32 1.0, %v8552_v60 }
 0x606   : > { %v8556_v41 = vpop.eup %8555  ;;  %8569 = vrcp.f32 %v6057_v55  ;;  %v6059_v12 = vadd.f32 1.0, %v8554_v30 }
 0x607   : > { %v8558_v52 = vpop.eup %8557  ;;  %6127 = vst.msk [vmem:[%s11028_s16 + $0x78] sm:$0xff] %vm6111_vm9, %v8556_v41  ;;  %8571 = vrcp.f32 %v6060_v11 }
 0x608   : > { %v8560_v9 = vpop.eup %8559  ;;  %6126 = vst.msk [vmem:[%s11028_s16 + $0x70] sm:$0xff] %vm6111_vm9, %v8558_v52  ;;  %8573 = vrcp.f32 %v6059_v12 }
 0x609   : > { %v8562_v46 = vpop.eup %8561  ;;  %v6062_v58 = vadd.f32 1.0, %v8560_v9 }
 0x60a   : > { %v8564_v32 = vpop.eup %8563  ;;  %v6061_v56 = vadd.f32 1.0, %v8562_v46 }
 0x60b   : > { %v8566_v34 = vpop.eup %8565  ;;  %6129 = vst.msk [vmem:[%s11028_s16 + $0x88] sm:$0xff] %vm6111_vm9, %v8564_v32  ;;  %8575 = vrcp.f32 %v6062_v58 }
 0x60c   : > { %6128 = vst.msk [vmem:[%s11028_s16 + $0x80] sm:$0xff] %vm6111_vm9, %v8566_v34  ;;  %8577 = vrcp.f32 %v6061_v56 }
 0x60e   : > { %v8568_v61 = vpop.eup %8567 }
 0x60f   : > { %6131 = vst.msk [vmem:[%s11028_s16 + $0x98] sm:$0xff] %vm6111_vm9, %v8568_v61 }
 0x610   : > { %v8570_v53 = vpop.eup %8569 }
 0x611   : > { %v8572_v5 = vpop.eup %8571  ;;  %6130 = vst.msk [vmem:[%s11028_s16 + $0x90] sm:$0xff] %vm6111_vm9, %v8570_v53 }
 0x612   : > { %v8574_v27 = vpop.eup %8573  ;;  %6133 = vst.msk [vmem:[%s11028_s16 + $0xa8] sm:$0xff] %vm6111_vm9, %v8572_v5 }
 0x613   : > { %6132 = vst.msk [vmem:[%s11028_s16 + $0xa0] sm:$0xff] %vm6111_vm9, %v8574_v27 }
 0x615   : > { %v8576_v2 = vpop.eup %8575 }
 0x616   : > { %v8578_v24 = vpop.eup %8577  ;;  %6135 = vst.msk [vmem:[%s11028_s16 + $0xb8] sm:$0xff] %vm6111_vm9, %v8576_v2 }
 0x617   : > { %6134 = vst.msk [vmem:[%s11028_s16 + $0xb0] sm:$0xff] %vm6111_vm9, %v8578_v24 }
 0x618 PF: > { %s20_s13 = sadd.s32 1, %s8588_s13  }
 0x619   : > { %p17_p5 = scmp.ge.s32.totalorder %s20_s13, 4  }
 0x61b   :  { %19 = sbr.rel (!%p17_p5) target bundleno = 1 (0x1), region = 93 }

</bundles_post_ra>
